<compile_context>
chip_gen: v7x
topology: tpu7x:2x2x1
jax: 0.10.0
libtpu: 0.0.40
codegen_flags: <defaults>
</compile_context>

<pallas_src>
import functools

import jax
import jax.numpy as jnp
from jax.experimental import pallas as pl
from jax.experimental.pallas import tpu as pltpu

BN_EPS = 1e-5
_LANE = 128                      # channel dims are padded to this lane width
_BAND_TARGET_ROWS = 128          # ~matmul M rows per grid step (tunable)
_VMEM_LIMIT = 32 * 1024 * 1024   # explicit scoped-VMEM budget (fits v5e/v6e/v7x)


# --------------------------- Pallas kernels ---------------------------------

def _conv_stats_kernel(x_ref, w_ref, sc_ref, sh_ref, y_ref, st_ref, *,
                       th, H, W, bands, fuse_input_bn_relu):
    """3x3 conv over one row band; emits raw conv output + BN partial stats.

    x_ref : (1, th+2, W+2, Ci) f32  spatially padded input band (with halo)
    w_ref : (3, 3, Ci, Co)     bf16 HWIO conv weights (channel padded)
    sc/sh : (1, Ci)            f32  input-side BN scale/shift (fused BN1+ReLU)
    y_ref : (1, th, W, Co)     f32  raw conv output (pre-BN)
    st_ref: (1, 2, Co)         f32  [column sum, column sum-of-squares]
    """
    x = x_ref[0]                                            # (th+2, W+2, Ci)
    if fuse_input_bn_relu:
        # BN + ReLU of the previous conv, fused into this kernel's input path.
        x = jnp.maximum(x * sc_ref[...] + sh_ref[...], 0.0)
        # The band halo mixes real neighbour rows with true zero padding; the
        # zero padding must remain zero *after* the affine+ReLU, so mask it
        # using the global (padded) row/col index of this band.
        b = pl.program_id(0) % bands
        row = jax.lax.broadcasted_iota(jnp.int32, (th + 2, W + 2, 1), 0) + b * th
        col = jax.lax.broadcasted_iota(jnp.int32, (th + 2, W + 2, 1), 1)
        keep = (row >= 1) & (row <= H) & (col >= 1) & (col <= W)
        x = jnp.where(keep, x, 0.0)

    xb = x.astype(jnp.bfloat16)                             # bf16 MXU operands
    Ci = xb.shape[-1]
    Co = y_ref.shape[-1]

    acc = jnp.zeros((th * W, Co), jnp.float32)
    for kh in range(3):                                     # 9 accumulating
        for kw in range(3):                                 # matmuls, K = Ci
            patch = xb[kh:kh + th, kw:kw + W, :].reshape(th * W, Ci)
            acc = acc + jnp.dot(patch, w_ref[kh, kw],
                                preferred_element_type=jnp.float32)

    y_ref[...] = acc.reshape(1, th, W, Co)
    # One-pass BN statistics for this tile (reduced across tiles in glue).
    s = jnp.sum(acc, axis=0, keepdims=True)
    ss = jnp.sum(acc * acc, axis=0, keepdims=True)
    st_ref[...] = jnp.concatenate([s, ss], axis=0).reshape(1, 2, Co)


def _bn_relu_pool_kernel(y_ref, sc_ref, sh_ref, o_ref, *, tpo, pool_type):
    """BN + ReLU + 2x2 pool over one band of 2*tpo rows.

    y_ref : (1, 2*tpo, W, Co)  f32  raw conv2 output
    sc/sh : (1, Co)            f32
    o_ref : (1, tpo, W//2, Co) f32
    """
    W = y_ref.shape[2]
    Wo = o_ref.shape[2]
    sc = sc_ref[...]
    sh = sh_ref[...]
    # Exact 0/1 selection matrices picking even / odd columns via a matmul,
    # keeping the pooling epilogue on well-supported ops only.
    ji = jax.lax.broadcasted_iota(jnp.int32, (Wo, W), 0)
    wi = jax.lax.broadcasted_iota(jnp.int32, (Wo, W), 1)
    sel_even = (wi == 2 * ji).astype(jnp.float32)
    sel_odd = (wi == 2 * ji + 1).astype(jnp.float32)

    for i in range(tpo):
        h0 = jnp.maximum(y_ref[0, 2 * i] * sc + sh, 0.0)        # (W, Co)
        h1 = jnp.maximum(y_ref[0, 2 * i + 1] * sc + sh, 0.0)
        if pool_type in ("avg", "avg+max"):
            s = h0 + h1
            p_avg = 0.25 * (
                jnp.dot(sel_even, s, preferred_element_type=jnp.float32)
                + jnp.dot(sel_odd, s, preferred_element_type=jnp.float32))
        if pool_type in ("max", "avg+max"):
            m = jnp.maximum(h0, h1)
            p_max = jnp.maximum(
                jnp.dot(sel_even, m, preferred_element_type=jnp.float32),
                jnp.dot(sel_odd, m, preferred_element_type=jnp.float32))
        if pool_type == "avg":
            out = p_avg
        elif pool_type == "max":
            out = p_max
        elif pool_type == "avg+max":
            out = p_avg + p_max
        else:
            raise ValueError("Incorrect pool_type!")
        o_ref[0, i] = out


# --------------------------- pallas_call wrappers ----------------------------

def _conv_bn_stats(x_banded, w, in_scale, in_shift, *, th, H, W, bands,
                   fuse_input_bn_relu):
    G, THP, WP, Ci = x_banded.shape            # G = N * bands, THP = th + 2
    Co = w.shape[-1]
    kern = functools.partial(
        _conv_stats_kernel, th=th, H=H, W=W, bands=bands,
        fuse_input_bn_relu=fuse_input_bn_relu)
    y, st = pl.pallas_call(
        kern,
        out_shape=(jax.ShapeDtypeStruct((G, th, W, Co), jnp.float32),
                   jax.ShapeDtypeStruct((G, 2, Co), jnp.float32)),
        grid=(G,),
        in_specs=[
            pl.BlockSpec((1, THP, WP, Ci), lambda g: (g, 0, 0, 0)),
            pl.BlockSpec((3, 3, Ci, Co), lambda g: (0, 0, 0, 0)),
            pl.BlockSpec((1, Ci), lambda g: (0, 0)),
            pl.BlockSpec((1, Ci), lambda g: (0, 0)),
        ],
        out_specs=(
            pl.BlockSpec((1, th, W, Co), lambda g: (g, 0, 0, 0)),
            pl.BlockSpec((1, 2, Co), lambda g: (g, 0, 0)),
        ),
        compiler_params=pltpu.CompilerParams(
            dimension_semantics=("parallel",),
            vmem_limit_bytes=_VMEM_LIMIT),
    )(x_banded, w, in_scale, in_shift)
    return y, st


def _bn_relu_pool(y_banded, scale, shift, *, tpo, pool_type):
    G, HH, W, Co = y_banded.shape              # HH = 2 * tpo
    Wo = W // 2
    kern = functools.partial(_bn_relu_pool_kernel, tpo=tpo, pool_type=pool_type)
    return pl.pallas_call(
        kern,
        out_shape=jax.ShapeDtypeStruct((G, tpo, Wo, Co), jnp.float32),
        grid=(G,),
        in_specs=[
            pl.BlockSpec((1, HH, W, Co), lambda g: (g, 0, 0, 0)),
            pl.BlockSpec((1, Co), lambda g: (0, 0)),
            pl.BlockSpec((1, Co), lambda g: (0, 0)),
        ],
        out_specs=pl.BlockSpec((1, tpo, Wo, Co), lambda g: (g, 0, 0, 0)),
        compiler_params=pltpu.CompilerParams(
            dimension_semantics=("parallel",),
            vmem_limit_bytes=_VMEM_LIMIT),
    )(y_banded, scale, shift)


# ------------------------------ glue -----------------------------------------

def _round_up(v, m):
    return ((v + m - 1) // m) * m


def _largest_divisor_leq(n, cap):
    cap = max(1, min(n, cap))
    for d in range(cap, 0, -1):
        if n % d == 0:
            return d
    return 1


def _pad_last(a, target):
    c = a.shape[-1]
    if c == target:
        return a
    return jnp.pad(a, [(0, 0)] * (a.ndim - 1) + [(0, target - c)])


def _pad_hwio(w, ci_t, co_t):
    _, _, ci, co = w.shape
    return jnp.pad(w, ((0, 0), (0, 0), (0, ci_t - ci), (0, co_t - co)))


def _band_with_halo(x_nhwc, th):
    """(N,H,W,C) -> (N*B, th+2, W+2, C): zero-padded overlapping row bands."""
    N, H, W, C = x_nhwc.shape
    B = H // th
    xp = jnp.pad(x_nhwc, ((0, 0), (1, 1), (1, 1), (0, 0)))
    rows = (jnp.arange(B) * th)[:, None] + jnp.arange(th + 2)[None, :]
    xb = jnp.take(xp, rows, axis=1)                    # (N, B, th+2, W+2, C)
    return xb.reshape(N * B, th + 2, W + 2, C)


def _bn_scale_shift(stats, gamma_p, beta_p, count):
    """Reduce per-tile [sum, sumsq] to per-channel BN scale/shift (f32)."""
    s = jnp.sum(stats[:, 0, :], axis=0)
    ss = jnp.sum(stats[:, 1, :], axis=0)
    mean = s / count
    var = jnp.maximum(ss / count - mean * mean, 0.0)
    scale = gamma_p.reshape(-1) * jax.lax.rsqrt(var + BN_EPS)
    shift = beta_p.reshape(-1) - mean * scale
    return scale.reshape(1, -1), shift.reshape(1, -1)


def conv_block_forward(x_nchw, params, pool_size=(2, 2), pool_type="avg"):
    """Pallas implementation of ConvBlock.forward (training-mode BatchNorm)."""
    if pool_type not in ("avg", "max", "avg+max"):
        raise Exception("Incorrect argument!")
    assert pool_size == (2, 2), "kernel specialized for 2x2 pooling"
    w1, w2, g1, b1, g2, b2 = params                     # w: (3,3,Cin,Cout) HWIO
    N, Cin, H, W = x_nchw.shape
    Cout = w1.shape[-1]
    assert H % 2 == 0 and W % 2 == 0, "2x2 pooling needs even H, W"
    assert W % 8 == 0, "W must be a multiple of 8 (sublane tiling)"

    Cip = _round_up(Cin, _LANE)
    Cop = _round_up(Cout, _LANE)

    x = jnp.transpose(x_nchw, (0, 2, 3, 1)).astype(jnp.float32)   # NHWC
    x = _pad_last(x, Cip)

    w1p = _pad_hwio(w1.astype(jnp.float32), Cip, Cop).astype(jnp.bfloat16)
    w2p = _pad_hwio(w2.astype(jnp.float32), Cop, Cop).astype(jnp.bfloat16)
    g1p = _pad_last(g1.astype(jnp.float32), Cop)
    b1p = _pad_last(b1.astype(jnp.float32), Cop)
    g2p = _pad_last(g2.astype(jnp.float32), Cop)
    b2p = _pad_last(b2.astype(jnp.float32), Cop)

    th = _largest_divisor_leq(H, max(1, _BAND_TARGET_ROWS // W))
    B = H // th
    count = N * H * W

    # ---- conv1 (raw output + BN1 partial statistics) ----
    ones_ci = jnp.ones((1, Cip), jnp.float32)
    zeros_ci = jnp.zeros((1, Cip), jnp.float32)
    x_b = _band_with_halo(x, th)
    y1, st1 = _conv_bn_stats(x_b, w1p, ones_ci, zeros_ci,
                             th=th, H=H, W=W, bands=B,
                             fuse_input_bn_relu=False)
    y1 = y1.reshape(N, H, W, Cop)
    scale1, shift1 = _bn_scale_shift(st1, g1p, b1p, count)

    # ---- conv2 with bn1+relu fused into its input (+ BN2 partial stats) ----
    y1_b = _band_with_halo(y1, th)
    y2, st2 = _conv_bn_stats(y1_b, w2p, scale1, shift1,
                             th=th, H=H, W=W, bands=B,
                             fuse_input_bn_relu=True)
    y2 = y2.reshape(N, H, W, Cop)
    scale2, shift2 = _bn_scale_shift(st2, g2p, b2p, count)

    # ---- bn2 + relu + 2x2 pool ----
    Ho, Wo = H // 2, W // 2
    tpo = _largest_divisor_leq(Ho, 8)
    Bp = Ho // tpo
    y2_b = y2.reshape(N * Bp, 2 * tpo, W, Cop)
    out = _bn_relu_pool(y2_b, scale2, shift2, tpo=tpo, pool_type=pool_type)
    out = out.reshape(N, Ho, Wo, Cop)[..., :Cout]
    return jnp.transpose(out, (0, 3, 1, 2))             # back to NCHW


def init_conv_block_params(key, in_channels, out_channels):
    """Deterministic init matching ConvBlock.init_weight (xavier_uniform, bn=1/0)."""
    k1, k2 = jax.random.split(key)

    def xavier(k, cin, cout):
        fan_in, fan_out = cin * 9, cout * 9
        bound = (6.0 / (fan_in + fan_out)) ** 0.5
        return jax.random.uniform(k, (3, 3, cin, cout), jnp.float32, -bound, bound)

    w1 = xavier(k1, in_channels, out_channels)
    w2 = xavier(k2, out_channels, out_channels)
    g1 = jnp.ones((1, out_channels), jnp.float32)
    b1 = jnp.zeros((1, out_channels), jnp.float32)
    g2 = jnp.ones((1, out_channels), jnp.float32)
    b2 = jnp.zeros((1, out_channels), jnp.float32)
    return (w1, w2, g1, b1, g2, b2)


# ------------------------- pure-JAX reference --------------------------------

def _reference(x_nchw, params, pool_type="avg"):
    w1, w2, g1, b1, g2, b2 = params
    x = jnp.transpose(x_nchw, (0, 2, 3, 1)).astype(jnp.float32)

    def conv(y, w):
        return jax.lax.conv_general_dilated(
            y, w, (1, 1), ((1, 1), (1, 1)),
            dimension_numbers=("NHWC", "HWIO", "NHWC"),
            precision=jax.lax.Precision.HIGHEST)

    def bn_relu(y, g, b):
        mean = y.mean(axis=(0, 1, 2), keepdims=True)
        var = jnp.square(y - mean).mean(axis=(0, 1, 2), keepdims=True)
        return jnp.maximum((y - mean) * jax.lax.rsqrt(var + BN_EPS)
                           * g.reshape(1, 1, 1, -1) + b.reshape(1, 1, 1, -1), 0.0)

    h1 = bn_relu(conv(x, w1), g1, b1)
    h2 = bn_relu(conv(h1, w2), g2, b2)
    N, H, W, C = h2.shape
    h2r = h2.reshape(N, H // 2, 2, W // 2, 2, C)
    if pool_type == "avg":
        p = h2r.mean(axis=(2, 4))
    elif pool_type == "max":
        p = h2r.max(axis=(2, 4))
    else:
        p = h2r.mean(axis=(2, 4)) + h2r.max(axis=(2, 4))
    return jnp.transpose(p, (0, 3, 1, 2))


# ------------------------------- main -----------------------------------------

if __name__ == "__main__":
    key = jax.random.PRNGKey(0)
    kx, kp = jax.random.split(key)

    N, Cin, Cout, H, W = 2, 4, 8, 16, 16
    x = jax.random.normal(kx, (N, Cin, H, W), jnp.float32)
    params = init_conv_block_params(kp, Cin, Cout)

    fwd = jax.jit(conv_block_forward, static_argnames=("pool_size", "pool_type"))

    out = jax.block_until_ready(fwd(x, params, pool_size=(2, 2), pool_type="avg"))
    ref = _reference(x, params, pool_type="avg")
    assert out.shape == (N, Cout, H // 2, W // 2), out.shape
    err = float(jnp.max(jnp.abs(out - ref)))
    assert err < 5e-2, f"avg pooling mismatch vs reference: {err}"

    for pt in ("max", "avg+max"):
        o = jax.block_until_ready(fwd(x, params, pool_size=(2, 2), pool_type=pt))
        r = _reference(x, params, pool_type=pt)
        e = float(jnp.max(jnp.abs(o - r)))
        assert e < 5e-2, f"{pt} pooling mismatch vs reference: {e}"

    print("KERNEL_OK")
</pallas_src>

<mosaic_0001>
module attributes {stable_mosaic.version = 11 : i64} {
  func.func @_conv_stats_kernel(%arg0: i32, %arg1: memref<1x10x18x128xf32, #tpu.memory_space<vmem>>, %arg2: memref<3x3x128x128xbf16, #tpu.memory_space<vmem>>, %arg3: memref<1x128xf32, #tpu.memory_space<vmem>>, %arg4: memref<1x128xf32, #tpu.memory_space<vmem>>, %arg5: memref<1x8x16x128xf32, #tpu.memory_space<vmem>>, %arg6: memref<1x2x128xf32, #tpu.memory_space<vmem>>) attributes {dimension_semantics = [#tpu.dimension_semantics<parallel>], iteration_bounds = array<i64: 4>, scalar_prefetch = 0 : i64, scratch_operands = 0 : i64, tpu.core_type = #tpu.core_type<tc>, window_params = [{transform_indices = @transform_0, window_bounds = array<i64: 1, 10, 18, 128>}, {pipeline_mode = #tpu.pipeline_mode<synchronous>, transform_indices = @transform_1, window_bounds = array<i64: 3, 3, 128, 128>}, {pipeline_mode = #tpu.pipeline_mode<synchronous>, transform_indices = @transform_2, window_bounds = array<i64: 1, 128>}, {pipeline_mode = #tpu.pipeline_mode<synchronous>, transform_indices = @transform_3, window_bounds = array<i64: 1, 128>}, {transform_indices = @transform_4, window_bounds = array<i64: 1, 8, 16, 128>}, {transform_indices = @transform_5, window_bounds = array<i64: 1, 2, 128>}]} {
    %c0 = arith.constant 0 : index
    %c0_0 = arith.constant 0 : index
    %c0_1 = arith.constant 0 : index
    %c0_2 = arith.constant 0 : index
    %0 = vector.load %arg1[%c0, %c0_0, %c0_1, %c0_2] : memref<1x10x18x128xf32, #tpu.memory_space<vmem>>, vector<1x10x18x128xf32>
    %1 = vector.shape_cast %0 : vector<1x10x18x128xf32> to vector<10x18x128xf32>
    %2 = arith.truncf %1 : vector<10x18x128xf32> to vector<10x18x128xbf16>
    %cst = arith.constant 0.000000e+00 : f32
    %3 = vector.broadcast %cst : f32 to vector<128x128xf32>
    %4 = vector.extract_strided_slice %2 {offsets = [0, 0, 0], sizes = [8, 16, 128], strides = [1, 1, 1]} : vector<10x18x128xbf16> to vector<8x16x128xbf16>
    %5 = vector.shape_cast %4 : vector<8x16x128xbf16> to vector<128x128xbf16>
    %c0_3 = arith.constant 0 : index
    %c0_4 = arith.constant 0 : index
    %c0_5 = arith.constant 0 : index
    %c0_6 = arith.constant 0 : index
    %6 = vector.load %arg2[%c0_3, %c0_4, %c0_5, %c0_6] : memref<3x3x128x128xbf16, #tpu.memory_space<vmem>>, vector<1x1x128x128xbf16>
    %7 = vector.shape_cast %6 : vector<1x1x128x128xbf16> to vector<128x128xbf16>
    %cst_7 = arith.constant dense<0.000000e+00> : vector<128x128xf32>
    %8 = tpu.matmul %5, %7, %cst_7 {dimension_numbers = #tpu.dot_dimension_numbers<[1], [0], [0], [1], [0, 0, 1, 1], [], []>} : vector<128x128xbf16>, vector<128x128xbf16>, vector<128x128xf32> -> vector<128x128xf32>
    %9 = arith.addf %3, %8 : vector<128x128xf32>
    %10 = vector.extract_strided_slice %2 {offsets = [0, 1, 0], sizes = [8, 16, 128], strides = [1, 1, 1]} : vector<10x18x128xbf16> to vector<8x16x128xbf16>
    %11 = vector.shape_cast %10 : vector<8x16x128xbf16> to vector<128x128xbf16>
    %c0_8 = arith.constant 0 : index
    %c1 = arith.constant 1 : index
    %c0_9 = arith.constant 0 : index
    %c0_10 = arith.constant 0 : index
    %12 = vector.load %arg2[%c0_8, %c1, %c0_9, %c0_10] : memref<3x3x128x128xbf16, #tpu.memory_space<vmem>>, vector<1x1x128x128xbf16>
    %13 = vector.shape_cast %12 : vector<1x1x128x128xbf16> to vector<128x128xbf16>
    %cst_11 = arith.constant dense<0.000000e+00> : vector<128x128xf32>
    %14 = tpu.matmul %11, %13, %cst_11 {dimension_numbers = #tpu.dot_dimension_numbers<[1], [0], [0], [1], [0, 0, 1, 1], [], []>} : vector<128x128xbf16>, vector<128x128xbf16>, vector<128x128xf32> -> vector<128x128xf32>
    %15 = arith.addf %9, %14 : vector<128x128xf32>
    %16 = vector.extract_strided_slice %2 {offsets = [0, 2, 0], sizes = [8, 16, 128], strides = [1, 1, 1]} : vector<10x18x128xbf16> to vector<8x16x128xbf16>
    %17 = vector.shape_cast %16 : vector<8x16x128xbf16> to vector<128x128xbf16>
    %c0_12 = arith.constant 0 : index
    %c2 = arith.constant 2 : index
    %c0_13 = arith.constant 0 : index
    %c0_14 = arith.constant 0 : index
    %18 = vector.load %arg2[%c0_12, %c2, %c0_13, %c0_14] : memref<3x3x128x128xbf16, #tpu.memory_space<vmem>>, vector<1x1x128x128xbf16>
    %19 = vector.shape_cast %18 : vector<1x1x128x128xbf16> to vector<128x128xbf16>
    %cst_15 = arith.constant dense<0.000000e+00> : vector<128x128xf32>
    %20 = tpu.matmul %17, %19, %cst_15 {dimension_numbers = #tpu.dot_dimension_numbers<[1], [0], [0], [1], [0, 0, 1, 1], [], []>} : vector<128x128xbf16>, vector<128x128xbf16>, vector<128x128xf32> -> vector<128x128xf32>
    %21 = arith.addf %15, %20 : vector<128x128xf32>
    %22 = vector.extract_strided_slice %2 {offsets = [1, 0, 0], sizes = [8, 16, 128], strides = [1, 1, 1]} : vector<10x18x128xbf16> to vector<8x16x128xbf16>
    %23 = vector.shape_cast %22 : vector<8x16x128xbf16> to vector<128x128xbf16>
    %c1_16 = arith.constant 1 : index
    %c0_17 = arith.constant 0 : index
    %c0_18 = arith.constant 0 : index
    %c0_19 = arith.constant 0 : index
    %24 = vector.load %arg2[%c1_16, %c0_17, %c0_18, %c0_19] : memref<3x3x128x128xbf16, #tpu.memory_space<vmem>>, vector<1x1x128x128xbf16>
    %25 = vector.shape_cast %24 : vector<1x1x128x128xbf16> to vector<128x128xbf16>
    %cst_20 = arith.constant dense<0.000000e+00> : vector<128x128xf32>
    %26 = tpu.matmul %23, %25, %cst_20 {dimension_numbers = #tpu.dot_dimension_numbers<[1], [0], [0], [1], [0, 0, 1, 1], [], []>} : vector<128x128xbf16>, vector<128x128xbf16>, vector<128x128xf32> -> vector<128x128xf32>
    %27 = arith.addf %21, %26 : vector<128x128xf32>
    %28 = vector.extract_strided_slice %2 {offsets = [1, 1, 0], sizes = [8, 16, 128], strides = [1, 1, 1]} : vector<10x18x128xbf16> to vector<8x16x128xbf16>
    %29 = vector.shape_cast %28 : vector<8x16x128xbf16> to vector<128x128xbf16>
    %c1_21 = arith.constant 1 : index
    %c1_22 = arith.constant 1 : index
    %c0_23 = arith.constant 0 : index
    %c0_24 = arith.constant 0 : index
    %30 = vector.load %arg2[%c1_21, %c1_22, %c0_23, %c0_24] : memref<3x3x128x128xbf16, #tpu.memory_space<vmem>>, vector<1x1x128x128xbf16>
    %31 = vector.shape_cast %30 : vector<1x1x128x128xbf16> to vector<128x128xbf16>
    %cst_25 = arith.constant dense<0.000000e+00> : vector<128x128xf32>
    %32 = tpu.matmul %29, %31, %cst_25 {dimension_numbers = #tpu.dot_dimension_numbers<[1], [0], [0], [1], [0, 0, 1, 1], [], []>} : vector<128x128xbf16>, vector<128x128xbf16>, vector<128x128xf32> -> vector<128x128xf32>
    %33 = arith.addf %27, %32 : vector<128x128xf32>
    %34 = vector.extract_strided_slice %2 {offsets = [1, 2, 0], sizes = [8, 16, 128], strides = [1, 1, 1]} : vector<10x18x128xbf16> to vector<8x16x128xbf16>
    %35 = vector.shape_cast %34 : vector<8x16x128xbf16> to vector<128x128xbf16>
    %c1_26 = arith.constant 1 : index
    %c2_27 = arith.constant 2 : index
    %c0_28 = arith.constant 0 : index
    %c0_29 = arith.constant 0 : index
    %36 = vector.load %arg2[%c1_26, %c2_27, %c0_28, %c0_29] : memref<3x3x128x128xbf16, #tpu.memory_space<vmem>>, vector<1x1x128x128xbf16>
    %37 = vector.shape_cast %36 : vector<1x1x128x128xbf16> to vector<128x128xbf16>
    %cst_30 = arith.constant dense<0.000000e+00> : vector<128x128xf32>
    %38 = tpu.matmul %35, %37, %cst_30 {dimension_numbers = #tpu.dot_dimension_numbers<[1], [0], [0], [1], [0, 0, 1, 1], [], []>} : vector<128x128xbf16>, vector<128x128xbf16>, vector<128x128xf32> -> vector<128x128xf32>
    %39 = arith.addf %33, %38 : vector<128x128xf32>
    %40 = vector.extract_strided_slice %2 {offsets = [2, 0, 0], sizes = [8, 16, 128], strides = [1, 1, 1]} : vector<10x18x128xbf16> to vector<8x16x128xbf16>
    %41 = vector.shape_cast %40 : vector<8x16x128xbf16> to vector<128x128xbf16>
    %c2_31 = arith.constant 2 : index
    %c0_32 = arith.constant 0 : index
    %c0_33 = arith.constant 0 : index
    %c0_34 = arith.constant 0 : index
    %42 = vector.load %arg2[%c2_31, %c0_32, %c0_33, %c0_34] : memref<3x3x128x128xbf16, #tpu.memory_space<vmem>>, vector<1x1x128x128xbf16>
    %43 = vector.shape_cast %42 : vector<1x1x128x128xbf16> to vector<128x128xbf16>
    %cst_35 = arith.constant dense<0.000000e+00> : vector<128x128xf32>
    %44 = tpu.matmul %41, %43, %cst_35 {dimension_numbers = #tpu.dot_dimension_numbers<[1], [0], [0], [1], [0, 0, 1, 1], [], []>} : vector<128x128xbf16>, vector<128x128xbf16>, vector<128x128xf32> -> vector<128x128xf32>
    %45 = arith.addf %39, %44 : vector<128x128xf32>
    %46 = vector.extract_strided_slice %2 {offsets = [2, 1, 0], sizes = [8, 16, 128], strides = [1, 1, 1]} : vector<10x18x128xbf16> to vector<8x16x128xbf16>
    %47 = vector.shape_cast %46 : vector<8x16x128xbf16> to vector<128x128xbf16>
    %c2_36 = arith.constant 2 : index
    %c1_37 = arith.constant 1 : index
    %c0_38 = arith.constant 0 : index
    %c0_39 = arith.constant 0 : index
    %48 = vector.load %arg2[%c2_36, %c1_37, %c0_38, %c0_39] : memref<3x3x128x128xbf16, #tpu.memory_space<vmem>>, vector<1x1x128x128xbf16>
    %49 = vector.shape_cast %48 : vector<1x1x128x128xbf16> to vector<128x128xbf16>
    %cst_40 = arith.constant dense<0.000000e+00> : vector<128x128xf32>
    %50 = tpu.matmul %47, %49, %cst_40 {dimension_numbers = #tpu.dot_dimension_numbers<[1], [0], [0], [1], [0, 0, 1, 1], [], []>} : vector<128x128xbf16>, vector<128x128xbf16>, vector<128x128xf32> -> vector<128x128xf32>
    %51 = arith.addf %45, %50 : vector<128x128xf32>
    %52 = vector.extract_strided_slice %2 {offsets = [2, 2, 0], sizes = [8, 16, 128], strides = [1, 1, 1]} : vector<10x18x128xbf16> to vector<8x16x128xbf16>
    %53 = vector.shape_cast %52 : vector<8x16x128xbf16> to vector<128x128xbf16>
    %c2_41 = arith.constant 2 : index
    %c2_42 = arith.constant 2 : index
    %c0_43 = arith.constant 0 : index
    %c0_44 = arith.constant 0 : index
    %54 = vector.load %arg2[%c2_41, %c2_42, %c0_43, %c0_44] : memref<3x3x128x128xbf16, #tpu.memory_space<vmem>>, vector<1x1x128x128xbf16>
    %55 = vector.shape_cast %54 : vector<1x1x128x128xbf16> to vector<128x128xbf16>
    %cst_45 = arith.constant dense<0.000000e+00> : vector<128x128xf32>
    %56 = tpu.matmul %53, %55, %cst_45 {dimension_numbers = #tpu.dot_dimension_numbers<[1], [0], [0], [1], [0, 0, 1, 1], [], []>} : vector<128x128xbf16>, vector<128x128xbf16>, vector<128x128xf32> -> vector<128x128xf32>
    %57 = arith.addf %51, %56 : vector<128x128xf32>
    %58 = vector.shape_cast %57 : vector<128x128xf32> to vector<1x8x16x128xf32>
    %c0_46 = arith.constant 0 : index
    %c0_47 = arith.constant 0 : index
    %c0_48 = arith.constant 0 : index
    %c0_49 = arith.constant 0 : index
    %59 = vector.load %arg5[%c0_46, %c0_47, %c0_48, %c0_49] : memref<1x8x16x128xf32, #tpu.memory_space<vmem>>, vector<1x8x16x128xf32>
    tpu.vector_store %arg5[%c0_46, %c0_47, %c0_48, %c0_49], %58 {strides = array<i32>} : memref<1x8x16x128xf32, #tpu.memory_space<vmem>>, vector<1x8x16x128xf32>,
    %cst_50 = arith.constant dense<0.000000e+00> : vector<128xf32>
    %60 = vector.multi_reduction <add>, %57, %cst_50 [0] : vector<128x128xf32> to vector<128xf32>
    %61 = vector.shape_cast %60 : vector<128xf32> to vector<1x128xf32>
    %62 = arith.mulf %57, %57 : vector<128x128xf32>
    %cst_51 = arith.constant dense<0.000000e+00> : vector<128xf32>
    %63 = vector.multi_reduction <add>, %62, %cst_51 [0] : vector<128x128xf32> to vector<128xf32>
    %64 = vector.shape_cast %63 : vector<128xf32> to vector<1x128xf32>
    %65 = tpu.concatenate %61, %64 in 0 : vector<1x128xf32>, vector<1x128xf32> -> vector<2x128xf32>
    %66 = vector.shape_cast %65 : vector<2x128xf32> to vector<1x2x128xf32>
    %c0_52 = arith.constant 0 : index
    %c0_53 = arith.constant 0 : index
    %c0_54 = arith.constant 0 : index
    %67 = vector.load %arg6[%c0_52, %c0_53, %c0_54] : memref<1x2x128xf32, #tpu.memory_space<vmem>>, vector<1x2x128xf32>
    tpu.vector_store %arg6[%c0_52, %c0_53, %c0_54], %66 {strides = array<i32>} : memref<1x2x128xf32, #tpu.memory_space<vmem>>, vector<1x2x128xf32>,
    return
  }
  func.func @transform_0(%arg0: i32) -> (i32, i32, i32, i32) {
    %c0_i32 = arith.constant 0 : i32
    %c0_i32_0 = arith.constant 0 : i32
    %c0_i32_1 = arith.constant 0 : i32
    %c0_i32_2 = arith.constant 0 : i32
    return %arg0, %c0_i32, %c0_i32_0, %c0_i32_1 : i32, i32, i32, i32
  }
  func.func @transform_1(%arg0: i32) -> (i32, i32, i32, i32) {
    %c0_i32 = arith.constant 0 : i32
    %c0_i32_0 = arith.constant 0 : i32
    %c0_i32_1 = arith.constant 0 : i32
    %c0_i32_2 = arith.constant 0 : i32
    %c0_i32_3 = arith.constant 0 : i32
    return %c0_i32, %c0_i32_0, %c0_i32_1, %c0_i32_2 : i32, i32, i32, i32
  }
  func.func @transform_2(%arg0: i32) -> (i32, i32) {
    %c0_i32 = arith.constant 0 : i32
    %c0_i32_0 = arith.constant 0 : i32
    %c0_i32_1 = arith.constant 0 : i32
    return %c0_i32, %c0_i32_0 : i32, i32
  }
  func.func @transform_3(%arg0: i32) -> (i32, i32) {
    %c0_i32 = arith.constant 0 : i32
    %c0_i32_0 = arith.constant 0 : i32
    %c0_i32_1 = arith.constant 0 : i32
    return %c0_i32, %c0_i32_0 : i32, i32
  }
  func.func @transform_4(%arg0: i32) -> (i32, i32, i32, i32) {
    %c0_i32 = arith.constant 0 : i32
    %c0_i32_0 = arith.constant 0 : i32
    %c0_i32_1 = arith.constant 0 : i32
    %c0_i32_2 = arith.constant 0 : i32
    return %arg0, %c0_i32, %c0_i32_0, %c0_i32_1 : i32, i32, i32, i32
  }
  func.func @transform_5(%arg0: i32) -> (i32, i32, i32) {
    %c0_i32 = arith.constant 0 : i32
    %c0_i32_0 = arith.constant 0 : i32
    %c0_i32_1 = arith.constant 0 : i32
    return %arg0, %c0_i32, %c0_i32_0 : i32, i32, i32
  }
}

module attributes {stable_mosaic.version = 11 : i64} {
  func.func @_conv_stats_kernel(%arg0: i32, %arg1: memref<1x10x18x128xf32, #tpu.memory_space<vmem>>, %arg2: memref<3x3x128x128xbf16, #tpu.memory_space<vmem>>, %arg3: memref<1x128xf32, #tpu.memory_space<vmem>>, %arg4: memref<1x128xf32, #tpu.memory_space<vmem>>, %arg5: memref<1x8x16x128xf32, #tpu.memory_space<vmem>>, %arg6: memref<1x2x128xf32, #tpu.memory_space<vmem>>) attributes {dimension_semantics = [#tpu.dimension_semantics<parallel>], iteration_bounds = array<i64: 4>, scalar_prefetch = 0 : i64, scratch_operands = 0 : i64, tpu.core_type = #tpu.core_type<tc>, window_params = [{transform_indices = @transform_0, window_bounds = array<i64: 1, 10, 18, 128>}, {pipeline_mode = #tpu.pipeline_mode<synchronous>, transform_indices = @transform_1, window_bounds = array<i64: 3, 3, 128, 128>}, {pipeline_mode = #tpu.pipeline_mode<synchronous>, transform_indices = @transform_2, window_bounds = array<i64: 1, 128>}, {pipeline_mode = #tpu.pipeline_mode<synchronous>, transform_indices = @transform_3, window_bounds = array<i64: 1, 128>}, {transform_indices = @transform_4, window_bounds = array<i64: 1, 8, 16, 128>}, {transform_indices = @transform_5, window_bounds = array<i64: 1, 2, 128>}]} {
    %c0 = arith.constant 0 : index
    %c0_0 = arith.constant 0 : index
    %c0_1 = arith.constant 0 : index
    %c0_2 = arith.constant 0 : index
    %0 = vector.load %arg1[%c0, %c0_0, %c0_1, %c0_2] : memref<1x10x18x128xf32, #tpu.memory_space<vmem>>, vector<1x10x18x128xf32>
    %1 = vector.shape_cast %0 : vector<1x10x18x128xf32> to vector<10x18x128xf32>
    %c0_3 = arith.constant 0 : index
    %c0_4 = arith.constant 0 : index
    %2 = vector.load %arg3[%c0_3, %c0_4] : memref<1x128xf32, #tpu.memory_space<vmem>>, vector<1x128xf32>
    %3 = vector.shape_cast %2 : vector<1x128xf32> to vector<1x1x128xf32>
    %4 = vector.broadcast %3 : vector<1x1x128xf32> to vector<10x18x128xf32>
    %5 = arith.mulf %1, %4 : vector<10x18x128xf32>
    %c0_5 = arith.constant 0 : index
    %c0_6 = arith.constant 0 : index
    %6 = vector.load %arg4[%c0_5, %c0_6] : memref<1x128xf32, #tpu.memory_space<vmem>>, vector<1x128xf32>
    %7 = vector.shape_cast %6 : vector<1x128xf32> to vector<1x1x128xf32>
    %8 = vector.broadcast %7 : vector<1x1x128xf32> to vector<10x18x128xf32>
    %9 = arith.addf %5, %8 : vector<10x18x128xf32>
    %cst = arith.constant 0.000000e+00 : f32
    %10 = vector.broadcast %cst : f32 to vector<10x18x128xf32>
    %11 = arith.maximumf %9, %10 : vector<10x18x128xf32>
    %c2_i32 = arith.constant 2 : i32
    %c0_i32 = arith.constant 0 : i32
    %12 = arith.cmpi eq, %c2_i32, %c0_i32 : i32
    %c1_i32 = arith.constant 1 : i32
    %13 = arith.select %12, %c1_i32, %c2_i32 : i32
    %14 = arith.remsi %arg0, %13 : i32
    %c0_i32_7 = arith.constant 0 : i32
    %15 = arith.cmpi ne, %14, %c0_i32_7 : i32
    %c0_i32_8 = arith.constant 0 : i32
    %16 = arith.cmpi slt, %14, %c0_i32_8 : i32
    %c0_i32_9 = arith.constant 0 : i32
    %17 = arith.cmpi slt, %13, %c0_i32_9 : i32
    %18 = arith.xori %16, %17 : i1
    %19 = arith.andi %18, %15 : i1
    %20 = arith.addi %14, %13 : i32
    %21 = arith.select %19, %20, %14 : i32
    %22 = tpu.iota {dimensions = array<i32: 0>} : vector<10x18x1xi32>
    %c8_i32 = arith.constant 8 : i32
    %23 = arith.muli %21, %c8_i32 : i32
    %24 = vector.broadcast %23 : i32 to vector<10x18x1xi32>
    %25 = arith.addi %22, %24 : vector<10x18x1xi32>
    %26 = tpu.iota {dimensions = array<i32: 1>} : vector<10x18x1xi32>
    %c1_i32_10 = arith.constant 1 : i32
    %27 = vector.broadcast %c1_i32_10 : i32 to vector<10x18x1xi32>
    %28 = arith.cmpi sge, %25, %27 : vector<10x18x1xi32>
    %c16_i32 = arith.constant 16 : i32
    %29 = vector.broadcast %c16_i32 : i32 to vector<10x18x1xi32>
    %30 = arith.cmpi sle, %25, %29 : vector<10x18x1xi32>
    %31 = arith.andi %28, %30 : vector<10x18x1xi1>
    %c1_i32_11 = arith.constant 1 : i32
    %32 = vector.broadcast %c1_i32_11 : i32 to vector<10x18x1xi32>
    %33 = arith.cmpi sge, %26, %32 : vector<10x18x1xi32>
    %34 = arith.andi %31, %33 : vector<10x18x1xi1>
    %c16_i32_12 = arith.constant 16 : i32
    %35 = vector.broadcast %c16_i32_12 : i32 to vector<10x18x1xi32>
    %36 = arith.cmpi sle, %26, %35 : vector<10x18x1xi32>
    %37 = arith.andi %34, %36 : vector<10x18x1xi1>
    %cst_13 = arith.constant 0.000000e+00 : f32
    %38 = vector.shape_cast %37 : vector<10x18x1xi1> to vector<10x18x1xi1>
    %39 = vector.broadcast %38 : vector<10x18x1xi1> to vector<10x18x128xi1>
    %40 = vector.broadcast %cst_13 : f32 to vector<10x18x128xf32>
    %41 = arith.select %39, %11, %40 : vector<10x18x128xi1>, vector<10x18x128xf32>
    %42 = arith.truncf %41 : vector<10x18x128xf32> to vector<10x18x128xbf16>
    %cst_14 = arith.constant 0.000000e+00 : f32
    %43 = vector.broadcast %cst_14 : f32 to vector<128x128xf32>
    %44 = vector.extract_strided_slice %42 {offsets = [0, 0, 0], sizes = [8, 16, 128], strides = [1, 1, 1]} : vector<10x18x128xbf16> to vector<8x16x128xbf16>
    %45 = vector.shape_cast %44 : vector<8x16x128xbf16> to vector<128x128xbf16>
    %c0_15 = arith.constant 0 : index
    %c0_16 = arith.constant 0 : index
    %c0_17 = arith.constant 0 : index
    %c0_18 = arith.constant 0 : index
    %46 = vector.load %arg2[%c0_15, %c0_16, %c0_17, %c0_18] : memref<3x3x128x128xbf16, #tpu.memory_space<vmem>>, vector<1x1x128x128xbf16>
    %47 = vector.shape_cast %46 : vector<1x1x128x128xbf16> to vector<128x128xbf16>
    %cst_19 = arith.constant dense<0.000000e+00> : vector<128x128xf32>
    %48 = tpu.matmul %45, %47, %cst_19 {dimension_numbers = #tpu.dot_dimension_numbers<[1], [0], [0], [1], [0, 0, 1, 1], [], []>} : vector<128x128xbf16>, vector<128x128xbf16>, vector<128x128xf32> -> vector<128x128xf32>
    %49 = arith.addf %43, %48 : vector<128x128xf32>
    %50 = vector.extract_strided_slice %42 {offsets = [0, 1, 0], sizes = [8, 16, 128], strides = [1, 1, 1]} : vector<10x18x128xbf16> to vector<8x16x128xbf16>
    %51 = vector.shape_cast %50 : vector<8x16x128xbf16> to vector<128x128xbf16>
    %c0_20 = arith.constant 0 : index
    %c1 = arith.constant 1 : index
    %c0_21 = arith.constant 0 : index
    %c0_22 = arith.constant 0 : index
    %52 = vector.load %arg2[%c0_20, %c1, %c0_21, %c0_22] : memref<3x3x128x128xbf16, #tpu.memory_space<vmem>>, vector<1x1x128x128xbf16>
    %53 = vector.shape_cast %52 : vector<1x1x128x128xbf16> to vector<128x128xbf16>
    %cst_23 = arith.constant dense<0.000000e+00> : vector<128x128xf32>
    %54 = tpu.matmul %51, %53, %cst_23 {dimension_numbers = #tpu.dot_dimension_numbers<[1], [0], [0], [1], [0, 0, 1, 1], [], []>} : vector<128x128xbf16>, vector<128x128xbf16>, vector<128x128xf32> -> vector<128x128xf32>
    %55 = arith.addf %49, %54 : vector<128x128xf32>
    %56 = vector.extract_strided_slice %42 {offsets = [0, 2, 0], sizes = [8, 16, 128], strides = [1, 1, 1]} : vector<10x18x128xbf16> to vector<8x16x128xbf16>
    %57 = vector.shape_cast %56 : vector<8x16x128xbf16> to vector<128x128xbf16>
    %c0_24 = arith.constant 0 : index
    %c2 = arith.constant 2 : index
    %c0_25 = arith.constant 0 : index
    %c0_26 = arith.constant 0 : index
    %58 = vector.load %arg2[%c0_24, %c2, %c0_25, %c0_26] : memref<3x3x128x128xbf16, #tpu.memory_space<vmem>>, vector<1x1x128x128xbf16>
    %59 = vector.shape_cast %58 : vector<1x1x128x128xbf16> to vector<128x128xbf16>
    %cst_27 = arith.constant dense<0.000000e+00> : vector<128x128xf32>
    %60 = tpu.matmul %57, %59, %cst_27 {dimension_numbers = #tpu.dot_dimension_numbers<[1], [0], [0], [1], [0, 0, 1, 1], [], []>} : vector<128x128xbf16>, vector<128x128xbf16>, vector<128x128xf32> -> vector<128x128xf32>
    %61 = arith.addf %55, %60 : vector<128x128xf32>
    %62 = vector.extract_strided_slice %42 {offsets = [1, 0, 0], sizes = [8, 16, 128], strides = [1, 1, 1]} : vector<10x18x128xbf16> to vector<8x16x128xbf16>
    %63 = vector.shape_cast %62 : vector<8x16x128xbf16> to vector<128x128xbf16>
    %c1_28 = arith.constant 1 : index
    %c0_29 = arith.constant 0 : index
    %c0_30 = arith.constant 0 : index
    %c0_31 = arith.constant 0 : index
    %64 = vector.load %arg2[%c1_28, %c0_29, %c0_30, %c0_31] : memref<3x3x128x128xbf16, #tpu.memory_space<vmem>>, vector<1x1x128x128xbf16>
    %65 = vector.shape_cast %64 : vector<1x1x128x128xbf16> to vector<128x128xbf16>
    %cst_32 = arith.constant dense<0.000000e+00> : vector<128x128xf32>
    %66 = tpu.matmul %63, %65, %cst_32 {dimension_numbers = #tpu.dot_dimension_numbers<[1], [0], [0], [1], [0, 0, 1, 1], [], []>} : vector<128x128xbf16>, vector<128x128xbf16>, vector<128x128xf32> -> vector<128x128xf32>
    %67 = arith.addf %61, %66 : vector<128x128xf32>
    %68 = vector.extract_strided_slice %42 {offsets = [1, 1, 0], sizes = [8, 16, 128], strides = [1, 1, 1]} : vector<10x18x128xbf16> to vector<8x16x128xbf16>
    %69 = vector.shape_cast %68 : vector<8x16x128xbf16> to vector<128x128xbf16>
    %c1_33 = arith.constant 1 : index
    %c1_34 = arith.constant 1 : index
    %c0_35 = arith.constant 0 : index
    %c0_36 = arith.constant 0 : index
    %70 = vector.load %arg2[%c1_33, %c1_34, %c0_35, %c0_36] : memref<3x3x128x128xbf16, #tpu.memory_space<vmem>>, vector<1x1x128x128xbf16>
    %71 = vector.shape_cast %70 : vector<1x1x128x128xbf16> to vector<128x128xbf16>
    %cst_37 = arith.constant dense<0.000000e+00> : vector<128x128xf32>
    %72 = tpu.matmul %69, %71, %cst_37 {dimension_numbers = #tpu.dot_dimension_numbers<[1], [0], [0], [1], [0, 0, 1, 1], [], []>} : vector<128x128xbf16>, vector<128x128xbf16>, vector<128x128xf32> -> vector<128x128xf32>
    %73 = arith.addf %67, %72 : vector<128x128xf32>
    %74 = vector.extract_strided_slice %42 {offsets = [1, 2, 0], sizes = [8, 16, 128], strides = [1, 1, 1]} : vector<10x18x128xbf16> to vector<8x16x128xbf16>
    %75 = vector.shape_cast %74 : vector<8x16x128xbf16> to vector<128x128xbf16>
    %c1_38 = arith.constant 1 : index
    %c2_39 = arith.constant 2 : index
    %c0_40 = arith.constant 0 : index
    %c0_41 = arith.constant 0 : index
    %76 = vector.load %arg2[%c1_38, %c2_39, %c0_40, %c0_41] : memref<3x3x128x128xbf16, #tpu.memory_space<vmem>>, vector<1x1x128x128xbf16>
    %77 = vector.shape_cast %76 : vector<1x1x128x128xbf16> to vector<128x128xbf16>
    %cst_42 = arith.constant dense<0.000000e+00> : vector<128x128xf32>
    %78 = tpu.matmul %75, %77, %cst_42 {dimension_numbers = #tpu.dot_dimension_numbers<[1], [0], [0], [1], [0, 0, 1, 1], [], []>} : vector<128x128xbf16>, vector<128x128xbf16>, vector<128x128xf32> -> vector<128x128xf32>
    %79 = arith.addf %73, %78 : vector<128x128xf32>
    %80 = vector.extract_strided_slice %42 {offsets = [2, 0, 0], sizes = [8, 16, 128], strides = [1, 1, 1]} : vector<10x18x128xbf16> to vector<8x16x128xbf16>
    %81 = vector.shape_cast %80 : vector<8x16x128xbf16> to vector<128x128xbf16>
    %c2_43 = arith.constant 2 : index
    %c0_44 = arith.constant 0 : index
    %c0_45 = arith.constant 0 : index
    %c0_46 = arith.constant 0 : index
    %82 = vector.load %arg2[%c2_43, %c0_44, %c0_45, %c0_46] : memref<3x3x128x128xbf16, #tpu.memory_space<vmem>>, vector<1x1x128x128xbf16>
    %83 = vector.shape_cast %82 : vector<1x1x128x128xbf16> to vector<128x128xbf16>
    %cst_47 = arith.constant dense<0.000000e+00> : vector<128x128xf32>
    %84 = tpu.matmul %81, %83, %cst_47 {dimension_numbers = #tpu.dot_dimension_numbers<[1], [0], [0], [1], [0, 0, 1, 1], [], []>} : vector<128x128xbf16>, vector<128x128xbf16>, vector<128x128xf32> -> vector<128x128xf32>
    %85 = arith.addf %79, %84 : vector<128x128xf32>
    %86 = vector.extract_strided_slice %42 {offsets = [2, 1, 0], sizes = [8, 16, 128], strides = [1, 1, 1]} : vector<10x18x128xbf16> to vector<8x16x128xbf16>
    %87 = vector.shape_cast %86 : vector<8x16x128xbf16> to vector<128x128xbf16>
    %c2_48 = arith.constant 2 : index
    %c1_49 = arith.constant 1 : index
    %c0_50 = arith.constant 0 : index
    %c0_51 = arith.constant 0 : index
    %88 = vector.load %arg2[%c2_48, %c1_49, %c0_50, %c0_51] : memref<3x3x128x128xbf16, #tpu.memory_space<vmem>>, vector<1x1x128x128xbf16>
    %89 = vector.shape_cast %88 : vector<1x1x128x128xbf16> to vector<128x128xbf16>
    %cst_52 = arith.constant dense<0.000000e+00> : vector<128x128xf32>
    %90 = tpu.matmul %87, %89, %cst_52 {dimension_numbers = #tpu.dot_dimension_numbers<[1], [0], [0], [1], [0, 0, 1, 1], [], []>} : vector<128x128xbf16>, vector<128x128xbf16>, vector<128x128xf32> -> vector<128x128xf32>
    %91 = arith.addf %85, %90 : vector<128x128xf32>
    %92 = vector.extract_strided_slice %42 {offsets = [2, 2, 0], sizes = [8, 16, 128], strides = [1, 1, 1]} : vector<10x18x128xbf16> to vector<8x16x128xbf16>
    %93 = vector.shape_cast %92 : vector<8x16x128xbf16> to vector<128x128xbf16>
    %c2_53 = arith.constant 2 : index
    %c2_54 = arith.constant 2 : index
    %c0_55 = arith.constant 0 : index
    %c0_56 = arith.constant 0 : index
    %94 = vector.load %arg2[%c2_53, %c2_54, %c0_55, %c0_56] : memref<3x3x128x128xbf16, #tpu.memory_space<vmem>>, vector<1x1x128x128xbf16>
    %95 = vector.shape_cast %94 : vector<1x1x128x128xbf16> to vector<128x128xbf16>
    %cst_57 = arith.constant dense<0.000000e+00> : vector<128x128xf32>
    %96 = tpu.matmul %93, %95, %cst_57 {dimension_numbers = #tpu.dot_dimension_numbers<[1], [0], [0], [1], [0, 0, 1, 1], [], []>} : vector<128x128xbf16>, vector<128x128xbf16>, vector<128x128xf32> -> vector<128x128xf32>
    %97 = arith.addf %91, %96 : vector<128x128xf32>
    %98 = vector.shape_cast %97 : vector<128x128xf32> to vector<1x8x16x128xf32>
    %c0_58 = arith.constant 0 : index
    %c0_59 = arith.constant 0 : index
    %c0_60 = arith.constant 0 : index
    %c0_61 = arith.constant 0 : index
    %99 = vector.load %arg5[%c0_58, %c0_59, %c0_60, %c0_61] : memref<1x8x16x128xf32, #tpu.memory_space<vmem>>, vector<1x8x16x128xf32>
    tpu.vector_store %arg5[%c0_58, %c0_59, %c0_60, %c0_61], %98 {strides = array<i32>} : memref<1x8x16x128xf32, #tpu.memory_space<vmem>>, vector<1x8x16x128xf32>,
    %cst_62 = arith.constant dense<0.000000e+00> : vector<128xf32>
    %100 = vector.multi_reduction <add>, %97, %cst_62 [0] : vector<128x128xf32> to vector<128xf32>
    %101 = vector.shape_cast %100 : vector<128xf32> to vector<1x128xf32>
    %102 = arith.mulf %97, %97 : vector<128x128xf32>
    %cst_63 = arith.constant dense<0.000000e+00> : vector<128xf32>
    %103 = vector.multi_reduction <add>, %102, %cst_63 [0] : vector<128x128xf32> to vector<128xf32>
    %104 = vector.shape_cast %103 : vector<128xf32> to vector<1x128xf32>
    %105 = tpu.concatenate %101, %104 in 0 : vector<1x128xf32>, vector<1x128xf32> -> vector<2x128xf32>
    %106 = vector.shape_cast %105 : vector<2x128xf32> to vector<1x2x128xf32>
    %c0_64 = arith.constant 0 : index
    %c0_65 = arith.constant 0 : index
    %c0_66 = arith.constant 0 : index
    %107 = vector.load %arg6[%c0_64, %c0_65, %c0_66] : memref<1x2x128xf32, #tpu.memory_space<vmem>>, vector<1x2x128xf32>
    tpu.vector_store %arg6[%c0_64, %c0_65, %c0_66], %106 {strides = array<i32>} : memref<1x2x128xf32, #tpu.memory_space<vmem>>, vector<1x2x128xf32>,
    return
  }
  func.func @transform_0(%arg0: i32) -> (i32, i32, i32, i32) {
    %c0_i32 = arith.constant 0 : i32
    %c0_i32_0 = arith.constant 0 : i32
    %c0_i32_1 = arith.constant 0 : i32
    %c0_i32_2 = arith.constant 0 : i32
    return %arg0, %c0_i32, %c0_i32_0, %c0_i32_1 : i32, i32, i32, i32
  }
  func.func @transform_1(%arg0: i32) -> (i32, i32, i32, i32) {
    %c0_i32 = arith.constant 0 : i32
    %c0_i32_0 = arith.constant 0 : i32
    %c0_i32_1 = arith.constant 0 : i32
    %c0_i32_2 = arith.constant 0 : i32
    %c0_i32_3 = arith.constant 0 : i32
    return %c0_i32, %c0_i32_0, %c0_i32_1, %c0_i32_2 : i32, i32, i32, i32
  }
  func.func @transform_2(%arg0: i32) -> (i32, i32) {
    %c0_i32 = arith.constant 0 : i32
    %c0_i32_0 = arith.constant 0 : i32
    %c0_i32_1 = arith.constant 0 : i32
    return %c0_i32, %c0_i32_0 : i32, i32
  }
  func.func @transform_3(%arg0: i32) -> (i32, i32) {
    %c0_i32 = arith.constant 0 : i32
    %c0_i32_0 = arith.constant 0 : i32
    %c0_i32_1 = arith.constant 0 : i32
    return %c0_i32, %c0_i32_0 : i32, i32
  }
  func.func @transform_4(%arg0: i32) -> (i32, i32, i32, i32) {
    %c0_i32 = arith.constant 0 : i32
    %c0_i32_0 = arith.constant 0 : i32
    %c0_i32_1 = arith.constant 0 : i32
    %c0_i32_2 = arith.constant 0 : i32
    return %arg0, %c0_i32, %c0_i32_0, %c0_i32_1 : i32, i32, i32, i32
  }
  func.func @transform_5(%arg0: i32) -> (i32, i32, i32) {
    %c0_i32 = arith.constant 0 : i32
    %c0_i32_0 = arith.constant 0 : i32
    %c0_i32_1 = arith.constant 0 : i32
    return %arg0, %c0_i32, %c0_i32_0 : i32, i32, i32
  }
}

module attributes {stable_mosaic.version = 11 : i64} {
  func.func @_bn_relu_pool_kernel(%arg0: i32, %arg1: memref<1x16x16x128xf32, #tpu.memory_space<vmem>>, %arg2: memref<1x128xf32, #tpu.memory_space<vmem>>, %arg3: memref<1x128xf32, #tpu.memory_space<vmem>>, %arg4: memref<1x8x8x128xf32, #tpu.memory_space<vmem>>) attributes {dimension_semantics = [#tpu.dimension_semantics<parallel>], iteration_bounds = array<i64: 2>, scalar_prefetch = 0 : i64, scratch_operands = 0 : i64, tpu.core_type = #tpu.core_type<tc>, window_params = [{transform_indices = @transform_0, window_bounds = array<i64: 1, 16, 16, 128>}, {pipeline_mode = #tpu.pipeline_mode<synchronous>, transform_indices = @transform_1, window_bounds = array<i64: 1, 128>}, {pipeline_mode = #tpu.pipeline_mode<synchronous>, transform_indices = @transform_2, window_bounds = array<i64: 1, 128>}, {transform_indices = @transform_3, window_bounds = array<i64: 1, 8, 8, 128>}]} {
    %c0 = arith.constant 0 : index
    %c0_0 = arith.constant 0 : index
    %0 = vector.load %arg2[%c0, %c0_0] : memref<1x128xf32, #tpu.memory_space<vmem>>, vector<1x128xf32>
    %c0_1 = arith.constant 0 : index
    %c0_2 = arith.constant 0 : index
    %1 = vector.load %arg3[%c0_1, %c0_2] : memref<1x128xf32, #tpu.memory_space<vmem>>, vector<1x128xf32>
    %2 = tpu.iota {dimensions = array<i32: 0>} : vector<8x16xi32>
    %3 = tpu.iota {dimensions = array<i32: 1>} : vector<8x16xi32>
    %c2_i32 = arith.constant 2 : i32
    %4 = vector.broadcast %c2_i32 : i32 to vector<8x16xi32>
    %5 = arith.muli %4, %2 : vector<8x16xi32>
    %6 = arith.cmpi eq, %3, %5 : vector<8x16xi32>
    %7 = arith.extui %6 : vector<8x16xi1> to vector<8x16xi32>
    %8 = arith.sitofp %7 : vector<8x16xi32> to vector<8x16xf32>
    %c2_i32_3 = arith.constant 2 : i32
    %9 = vector.broadcast %c2_i32_3 : i32 to vector<8x16xi32>
    %10 = arith.muli %9, %2 : vector<8x16xi32>
    %c1_i32 = arith.constant 1 : i32
    %11 = vector.broadcast %c1_i32 : i32 to vector<8x16xi32>
    %12 = arith.addi %10, %11 : vector<8x16xi32>
    %13 = arith.cmpi eq, %3, %12 : vector<8x16xi32>
    %14 = arith.extui %13 : vector<8x16xi1> to vector<8x16xi32>
    %15 = arith.sitofp %14 : vector<8x16xi32> to vector<8x16xf32>
    %c0_4 = arith.constant 0 : index
    %c0_5 = arith.constant 0 : index
    %c0_6 = arith.constant 0 : index
    %c0_7 = arith.constant 0 : index
    %16 = vector.load %arg1[%c0_4, %c0_5, %c0_6, %c0_7] : memref<1x16x16x128xf32, #tpu.memory_space<vmem>>, vector<1x1x16x128xf32>
    %17 = vector.shape_cast %16 : vector<1x1x16x128xf32> to vector<16x128xf32>
    %18 = vector.broadcast %0 : vector<1x128xf32> to vector<16x128xf32>
    %19 = arith.mulf %17, %18 : vector<16x128xf32>
    %20 = vector.broadcast %1 : vector<1x128xf32> to vector<16x128xf32>
    %21 = arith.addf %19, %20 : vector<16x128xf32>
    %cst = arith.constant 0.000000e+00 : f32
    %22 = vector.broadcast %cst : f32 to vector<16x128xf32>
    %23 = arith.maximumf %21, %22 : vector<16x128xf32>
    %c0_8 = arith.constant 0 : index
    %c1 = arith.constant 1 : index
    %c0_9 = arith.constant 0 : index
    %c0_10 = arith.constant 0 : index
    %24 = vector.load %arg1[%c0_8, %c1, %c0_9, %c0_10] : memref<1x16x16x128xf32, #tpu.memory_space<vmem>>, vector<1x1x16x128xf32>
    %25 = vector.shape_cast %24 : vector<1x1x16x128xf32> to vector<16x128xf32>
    %26 = vector.broadcast %0 : vector<1x128xf32> to vector<16x128xf32>
    %27 = arith.mulf %25, %26 : vector<16x128xf32>
    %28 = vector.broadcast %1 : vector<1x128xf32> to vector<16x128xf32>
    %29 = arith.addf %27, %28 : vector<16x128xf32>
    %cst_11 = arith.constant 0.000000e+00 : f32
    %30 = vector.broadcast %cst_11 : f32 to vector<16x128xf32>
    %31 = arith.maximumf %29, %30 : vector<16x128xf32>
    %32 = arith.addf %23, %31 : vector<16x128xf32>
    %cst_12 = arith.constant dense<0.000000e+00> : vector<8x128xf32>
    %33 = tpu.matmul %8, %32, %cst_12 {dimension_numbers = #tpu.dot_dimension_numbers<[1], [0], [0], [1], [0, 0, 1, 1], [], []>} : vector<8x16xf32>, vector<16x128xf32>, vector<8x128xf32> -> vector<8x128xf32>
    %cst_13 = arith.constant dense<0.000000e+00> : vector<8x128xf32>
    %34 = tpu.matmul %15, %32, %cst_13 {dimension_numbers = #tpu.dot_dimension_numbers<[1], [0], [0], [1], [0, 0, 1, 1], [], []>} : vector<8x16xf32>, vector<16x128xf32>, vector<8x128xf32> -> vector<8x128xf32>
    %35 = arith.addf %33, %34 : vector<8x128xf32>
    %cst_14 = arith.constant 2.500000e-01 : f32
    %36 = vector.broadcast %cst_14 : f32 to vector<8x128xf32>
    %37 = arith.mulf %36, %35 : vector<8x128xf32>
    %c0_15 = arith.constant 0 : index
    %c0_16 = arith.constant 0 : index
    %c0_17 = arith.constant 0 : index
    %c0_18 = arith.constant 0 : index
    %38 = vector.load %arg4[%c0_15, %c0_16, %c0_17, %c0_18] : memref<1x8x8x128xf32, #tpu.memory_space<vmem>>, vector<1x1x8x128xf32>
    %39 = vector.shape_cast %38 : vector<1x1x8x128xf32> to vector<8x128xf32>
    %40 = vector.shape_cast %37 : vector<8x128xf32> to vector<1x1x8x128xf32>
    tpu.vector_store %arg4[%c0_15, %c0_16, %c0_17, %c0_18], %40 {strides = array<i32>} : memref<1x8x8x128xf32, #tpu.memory_space<vmem>>, vector<1x1x8x128xf32>,
    %c0_19 = arith.constant 0 : index
    %c2 = arith.constant 2 : index
    %c0_20 = arith.constant 0 : index
    %c0_21 = arith.constant 0 : index
    %41 = vector.load %arg1[%c0_19, %c2, %c0_20, %c0_21] : memref<1x16x16x128xf32, #tpu.memory_space<vmem>>, vector<1x1x16x128xf32>
    %42 = vector.shape_cast %41 : vector<1x1x16x128xf32> to vector<16x128xf32>
    %43 = vector.broadcast %0 : vector<1x128xf32> to vector<16x128xf32>
    %44 = arith.mulf %42, %43 : vector<16x128xf32>
    %45 = vector.broadcast %1 : vector<1x128xf32> to vector<16x128xf32>
    %46 = arith.addf %44, %45 : vector<16x128xf32>
    %cst_22 = arith.constant 0.000000e+00 : f32
    %47 = vector.broadcast %cst_22 : f32 to vector<16x128xf32>
    %48 = arith.maximumf %46, %47 : vector<16x128xf32>
    %c0_23 = arith.constant 0 : index
    %c3 = arith.constant 3 : index
    %c0_24 = arith.constant 0 : index
    %c0_25 = arith.constant 0 : index
    %49 = vector.load %arg1[%c0_23, %c3, %c0_24, %c0_25] : memref<1x16x16x128xf32, #tpu.memory_space<vmem>>, vector<1x1x16x128xf32>
    %50 = vector.shape_cast %49 : vector<1x1x16x128xf32> to vector<16x128xf32>
    %51 = vector.broadcast %0 : vector<1x128xf32> to vector<16x128xf32>
    %52 = arith.mulf %50, %51 : vector<16x128xf32>
    %53 = vector.broadcast %1 : vector<1x128xf32> to vector<16x128xf32>
    %54 = arith.addf %52, %53 : vector<16x128xf32>
    %cst_26 = arith.constant 0.000000e+00 : f32
    %55 = vector.broadcast %cst_26 : f32 to vector<16x128xf32>
    %56 = arith.maximumf %54, %55 : vector<16x128xf32>
    %57 = arith.addf %48, %56 : vector<16x128xf32>
    %cst_27 = arith.constant dense<0.000000e+00> : vector<8x128xf32>
    %58 = tpu.matmul %8, %57, %cst_27 {dimension_numbers = #tpu.dot_dimension_numbers<[1], [0], [0], [1], [0, 0, 1, 1], [], []>} : vector<8x16xf32>, vector<16x128xf32>, vector<8x128xf32> -> vector<8x128xf32>
    %cst_28 = arith.constant dense<0.000000e+00> : vector<8x128xf32>
    %59 = tpu.matmul %15, %57, %cst_28 {dimension_numbers = #tpu.dot_dimension_numbers<[1], [0], [0], [1], [0, 0, 1, 1], [], []>} : vector<8x16xf32>, vector<16x128xf32>, vector<8x128xf32> -> vector<8x128xf32>
    %60 = arith.addf %58, %59 : vector<8x128xf32>
    %cst_29 = arith.constant 2.500000e-01 : f32
    %61 = vector.broadcast %cst_29 : f32 to vector<8x128xf32>
    %62 = arith.mulf %61, %60 : vector<8x128xf32>
    %c0_30 = arith.constant 0 : index
    %c1_31 = arith.constant 1 : index
    %c0_32 = arith.constant 0 : index
    %c0_33 = arith.constant 0 : index
    %63 = vector.load %arg4[%c0_30, %c1_31, %c0_32, %c0_33] : memref<1x8x8x128xf32, #tpu.memory_space<vmem>>, vector<1x1x8x128xf32>
    %64 = vector.shape_cast %63 : vector<1x1x8x128xf32> to vector<8x128xf32>
    %65 = vector.shape_cast %62 : vector<8x128xf32> to vector<1x1x8x128xf32>
    tpu.vector_store %arg4[%c0_30, %c1_31, %c0_32, %c0_33], %65 {strides = array<i32>} : memref<1x8x8x128xf32, #tpu.memory_space<vmem>>, vector<1x1x8x128xf32>,
    %c0_34 = arith.constant 0 : index
    %c4 = arith.constant 4 : index
    %c0_35 = arith.constant 0 : index
    %c0_36 = arith.constant 0 : index
    %66 = vector.load %arg1[%c0_34, %c4, %c0_35, %c0_36] : memref<1x16x16x128xf32, #tpu.memory_space<vmem>>, vector<1x1x16x128xf32>
    %67 = vector.shape_cast %66 : vector<1x1x16x128xf32> to vector<16x128xf32>
    %68 = vector.broadcast %0 : vector<1x128xf32> to vector<16x128xf32>
    %69 = arith.mulf %67, %68 : vector<16x128xf32>
    %70 = vector.broadcast %1 : vector<1x128xf32> to vector<16x128xf32>
    %71 = arith.addf %69, %70 : vector<16x128xf32>
    %cst_37 = arith.constant 0.000000e+00 : f32
    %72 = vector.broadcast %cst_37 : f32 to vector<16x128xf32>
    %73 = arith.maximumf %71, %72 : vector<16x128xf32>
    %c0_38 = arith.constant 0 : index
    %c5 = arith.constant 5 : index
    %c0_39 = arith.constant 0 : index
    %c0_40 = arith.constant 0 : index
    %74 = vector.load %arg1[%c0_38, %c5, %c0_39, %c0_40] : memref<1x16x16x128xf32, #tpu.memory_space<vmem>>, vector<1x1x16x128xf32>
    %75 = vector.shape_cast %74 : vector<1x1x16x128xf32> to vector<16x128xf32>
    %76 = vector.broadcast %0 : vector<1x128xf32> to vector<16x128xf32>
    %77 = arith.mulf %75, %76 : vector<16x128xf32>
    %78 = vector.broadcast %1 : vector<1x128xf32> to vector<16x128xf32>
    %79 = arith.addf %77, %78 : vector<16x128xf32>
    %cst_41 = arith.constant 0.000000e+00 : f32
    %80 = vector.broadcast %cst_41 : f32 to vector<16x128xf32>
    %81 = arith.maximumf %79, %80 : vector<16x128xf32>
    %82 = arith.addf %73, %81 : vector<16x128xf32>
    %cst_42 = arith.constant dense<0.000000e+00> : vector<8x128xf32>
    %83 = tpu.matmul %8, %82, %cst_42 {dimension_numbers = #tpu.dot_dimension_numbers<[1], [0], [0], [1], [0, 0, 1, 1], [], []>} : vector<8x16xf32>, vector<16x128xf32>, vector<8x128xf32> -> vector<8x128xf32>
    %cst_43 = arith.constant dense<0.000000e+00> : vector<8x128xf32>
    %84 = tpu.matmul %15, %82, %cst_43 {dimension_numbers = #tpu.dot_dimension_numbers<[1], [0], [0], [1], [0, 0, 1, 1], [], []>} : vector<8x16xf32>, vector<16x128xf32>, vector<8x128xf32> -> vector<8x128xf32>
    %85 = arith.addf %83, %84 : vector<8x128xf32>
    %cst_44 = arith.constant 2.500000e-01 : f32
    %86 = vector.broadcast %cst_44 : f32 to vector<8x128xf32>
    %87 = arith.mulf %86, %85 : vector<8x128xf32>
    %c0_45 = arith.constant 0 : index
    %c2_46 = arith.constant 2 : index
    %c0_47 = arith.constant 0 : index
    %c0_48 = arith.constant 0 : index
    %88 = vector.load %arg4[%c0_45, %c2_46, %c0_47, %c0_48] : memref<1x8x8x128xf32, #tpu.memory_space<vmem>>, vector<1x1x8x128xf32>
    %89 = vector.shape_cast %88 : vector<1x1x8x128xf32> to vector<8x128xf32>
    %90 = vector.shape_cast %87 : vector<8x128xf32> to vector<1x1x8x128xf32>
    tpu.vector_store %arg4[%c0_45, %c2_46, %c0_47, %c0_48], %90 {strides = array<i32>} : memref<1x8x8x128xf32, #tpu.memory_space<vmem>>, vector<1x1x8x128xf32>,
    %c0_49 = arith.constant 0 : index
    %c6 = arith.constant 6 : index
    %c0_50 = arith.constant 0 : index
    %c0_51 = arith.constant 0 : index
    %91 = vector.load %arg1[%c0_49, %c6, %c0_50, %c0_51] : memref<1x16x16x128xf32, #tpu.memory_space<vmem>>, vector<1x1x16x128xf32>
    %92 = vector.shape_cast %91 : vector<1x1x16x128xf32> to vector<16x128xf32>
    %93 = vector.broadcast %0 : vector<1x128xf32> to vector<16x128xf32>
    %94 = arith.mulf %92, %93 : vector<16x128xf32>
    %95 = vector.broadcast %1 : vector<1x128xf32> to vector<16x128xf32>
    %96 = arith.addf %94, %95 : vector<16x128xf32>
    %cst_52 = arith.constant 0.000000e+00 : f32
    %97 = vector.broadcast %cst_52 : f32 to vector<16x128xf32>
    %98 = arith.maximumf %96, %97 : vector<16x128xf32>
    %c0_53 = arith.constant 0 : index
    %c7 = arith.constant 7 : index
    %c0_54 = arith.constant 0 : index
    %c0_55 = arith.constant 0 : index
    %99 = vector.load %arg1[%c0_53, %c7, %c0_54, %c0_55] : memref<1x16x16x128xf32, #tpu.memory_space<vmem>>, vector<1x1x16x128xf32>
    %100 = vector.shape_cast %99 : vector<1x1x16x128xf32> to vector<16x128xf32>
    %101 = vector.broadcast %0 : vector<1x128xf32> to vector<16x128xf32>
    %102 = arith.mulf %100, %101 : vector<16x128xf32>
    %103 = vector.broadcast %1 : vector<1x128xf32> to vector<16x128xf32>
    %104 = arith.addf %102, %103 : vector<16x128xf32>
    %cst_56 = arith.constant 0.000000e+00 : f32
    %105 = vector.broadcast %cst_56 : f32 to vector<16x128xf32>
    %106 = arith.maximumf %104, %105 : vector<16x128xf32>
    %107 = arith.addf %98, %106 : vector<16x128xf32>
    %cst_57 = arith.constant dense<0.000000e+00> : vector<8x128xf32>
    %108 = tpu.matmul %8, %107, %cst_57 {dimension_numbers = #tpu.dot_dimension_numbers<[1], [0], [0], [1], [0, 0, 1, 1], [], []>} : vector<8x16xf32>, vector<16x128xf32>, vector<8x128xf32> -> vector<8x128xf32>
    %cst_58 = arith.constant dense<0.000000e+00> : vector<8x128xf32>
    %109 = tpu.matmul %15, %107, %cst_58 {dimension_numbers = #tpu.dot_dimension_numbers<[1], [0], [0], [1], [0, 0, 1, 1], [], []>} : vector<8x16xf32>, vector<16x128xf32>, vector<8x128xf32> -> vector<8x128xf32>
    %110 = arith.addf %108, %109 : vector<8x128xf32>
    %cst_59 = arith.constant 2.500000e-01 : f32
    %111 = vector.broadcast %cst_59 : f32 to vector<8x128xf32>
    %112 = arith.mulf %111, %110 : vector<8x128xf32>
    %c0_60 = arith.constant 0 : index
    %c3_61 = arith.constant 3 : index
    %c0_62 = arith.constant 0 : index
    %c0_63 = arith.constant 0 : index
    %113 = vector.load %arg4[%c0_60, %c3_61, %c0_62, %c0_63] : memref<1x8x8x128xf32, #tpu.memory_space<vmem>>, vector<1x1x8x128xf32>
    %114 = vector.shape_cast %113 : vector<1x1x8x128xf32> to vector<8x128xf32>
    %115 = vector.shape_cast %112 : vector<8x128xf32> to vector<1x1x8x128xf32>
    tpu.vector_store %arg4[%c0_60, %c3_61, %c0_62, %c0_63], %115 {strides = array<i32>} : memref<1x8x8x128xf32, #tpu.memory_space<vmem>>, vector<1x1x8x128xf32>,
    %c0_64 = arith.constant 0 : index
    %c8 = arith.constant 8 : index
    %c0_65 = arith.constant 0 : index
    %c0_66 = arith.constant 0 : index
    %116 = vector.load %arg1[%c0_64, %c8, %c0_65, %c0_66] : memref<1x16x16x128xf32, #tpu.memory_space<vmem>>, vector<1x1x16x128xf32>
    %117 = vector.shape_cast %116 : vector<1x1x16x128xf32> to vector<16x128xf32>
    %118 = vector.broadcast %0 : vector<1x128xf32> to vector<16x128xf32>
    %119 = arith.mulf %117, %118 : vector<16x128xf32>
    %120 = vector.broadcast %1 : vector<1x128xf32> to vector<16x128xf32>
    %121 = arith.addf %119, %120 : vector<16x128xf32>
    %cst_67 = arith.constant 0.000000e+00 : f32
    %122 = vector.broadcast %cst_67 : f32 to vector<16x128xf32>
    %123 = arith.maximumf %121, %122 : vector<16x128xf32>
    %c0_68 = arith.constant 0 : index
    %c9 = arith.constant 9 : index
    %c0_69 = arith.constant 0 : index
    %c0_70 = arith.constant 0 : index
    %124 = vector.load %arg1[%c0_68, %c9, %c0_69, %c0_70] : memref<1x16x16x128xf32, #tpu.memory_space<vmem>>, vector<1x1x16x128xf32>
    %125 = vector.shape_cast %124 : vector<1x1x16x128xf32> to vector<16x128xf32>
    %126 = vector.broadcast %0 : vector<1x128xf32> to vector<16x128xf32>
    %127 = arith.mulf %125, %126 : vector<16x128xf32>
    %128 = vector.broadcast %1 : vector<1x128xf32> to vector<16x128xf32>
    %129 = arith.addf %127, %128 : vector<16x128xf32>
    %cst_71 = arith.constant 0.000000e+00 : f32
    %130 = vector.broadcast %cst_71 : f32 to vector<16x128xf32>
    %131 = arith.maximumf %129, %130 : vector<16x128xf32>
    %132 = arith.addf %123, %131 : vector<16x128xf32>
    %cst_72 = arith.constant dense<0.000000e+00> : vector<8x128xf32>
    %133 = tpu.matmul %8, %132, %cst_72 {dimension_numbers = #tpu.dot_dimension_numbers<[1], [0], [0], [1], [0, 0, 1, 1], [], []>} : vector<8x16xf32>, vector<16x128xf32>, vector<8x128xf32> -> vector<8x128xf32>
    %cst_73 = arith.constant dense<0.000000e+00> : vector<8x128xf32>
    %134 = tpu.matmul %15, %132, %cst_73 {dimension_numbers = #tpu.dot_dimension_numbers<[1], [0], [0], [1], [0, 0, 1, 1], [], []>} : vector<8x16xf32>, vector<16x128xf32>, vector<8x128xf32> -> vector<8x128xf32>
    %135 = arith.addf %133, %134 : vector<8x128xf32>
    %cst_74 = arith.constant 2.500000e-01 : f32
    %136 = vector.broadcast %cst_74 : f32 to vector<8x128xf32>
    %137 = arith.mulf %136, %135 : vector<8x128xf32>
    %c0_75 = arith.constant 0 : index
    %c4_76 = arith.constant 4 : index
    %c0_77 = arith.constant 0 : index
    %c0_78 = arith.constant 0 : index
    %138 = vector.load %arg4[%c0_75, %c4_76, %c0_77, %c0_78] : memref<1x8x8x128xf32, #tpu.memory_space<vmem>>, vector<1x1x8x128xf32>
    %139 = vector.shape_cast %138 : vector<1x1x8x128xf32> to vector<8x128xf32>
    %140 = vector.shape_cast %137 : vector<8x128xf32> to vector<1x1x8x128xf32>
    tpu.vector_store %arg4[%c0_75, %c4_76, %c0_77, %c0_78], %140 {strides = array<i32>} : memref<1x8x8x128xf32, #tpu.memory_space<vmem>>, vector<1x1x8x128xf32>,
    %c0_79 = arith.constant 0 : index
    %c10 = arith.constant 10 : index
    %c0_80 = arith.constant 0 : index
    %c0_81 = arith.constant 0 : index
    %141 = vector.load %arg1[%c0_79, %c10, %c0_80, %c0_81] : memref<1x16x16x128xf32, #tpu.memory_space<vmem>>, vector<1x1x16x128xf32>
    %142 = vector.shape_cast %141 : vector<1x1x16x128xf32> to vector<16x128xf32>
    %143 = vector.broadcast %0 : vector<1x128xf32> to vector<16x128xf32>
    %144 = arith.mulf %142, %143 : vector<16x128xf32>
    %145 = vector.broadcast %1 : vector<1x128xf32> to vector<16x128xf32>
    %146 = arith.addf %144, %145 : vector<16x128xf32>
    %cst_82 = arith.constant 0.000000e+00 : f32
    %147 = vector.broadcast %cst_82 : f32 to vector<16x128xf32>
    %148 = arith.maximumf %146, %147 : vector<16x128xf32>
    %c0_83 = arith.constant 0 : index
    %c11 = arith.constant 11 : index
    %c0_84 = arith.constant 0 : index
    %c0_85 = arith.constant 0 : index
    %149 = vector.load %arg1[%c0_83, %c11, %c0_84, %c0_85] : memref<1x16x16x128xf32, #tpu.memory_space<vmem>>, vector<1x1x16x128xf32>
    %150 = vector.shape_cast %149 : vector<1x1x16x128xf32> to vector<16x128xf32>
    %151 = vector.broadcast %0 : vector<1x128xf32> to vector<16x128xf32>
    %152 = arith.mulf %150, %151 : vector<16x128xf32>
    %153 = vector.broadcast %1 : vector<1x128xf32> to vector<16x128xf32>
    %154 = arith.addf %152, %153 : vector<16x128xf32>
    %cst_86 = arith.constant 0.000000e+00 : f32
    %155 = vector.broadcast %cst_86 : f32 to vector<16x128xf32>
    %156 = arith.maximumf %154, %155 : vector<16x128xf32>
    %157 = arith.addf %148, %156 : vector<16x128xf32>
    %cst_87 = arith.constant dense<0.000000e+00> : vector<8x128xf32>
    %158 = tpu.matmul %8, %157, %cst_87 {dimension_numbers = #tpu.dot_dimension_numbers<[1], [0], [0], [1], [0, 0, 1, 1], [], []>} : vector<8x16xf32>, vector<16x128xf32>, vector<8x128xf32> -> vector<8x128xf32>
    %cst_88 = arith.constant dense<0.000000e+00> : vector<8x128xf32>
    %159 = tpu.matmul %15, %157, %cst_88 {dimension_numbers = #tpu.dot_dimension_numbers<[1], [0], [0], [1], [0, 0, 1, 1], [], []>} : vector<8x16xf32>, vector<16x128xf32>, vector<8x128xf32> -> vector<8x128xf32>
    %160 = arith.addf %158, %159 : vector<8x128xf32>
    %cst_89 = arith.constant 2.500000e-01 : f32
    %161 = vector.broadcast %cst_89 : f32 to vector<8x128xf32>
    %162 = arith.mulf %161, %160 : vector<8x128xf32>
    %c0_90 = arith.constant 0 : index
    %c5_91 = arith.constant 5 : index
    %c0_92 = arith.constant 0 : index
    %c0_93 = arith.constant 0 : index
    %163 = vector.load %arg4[%c0_90, %c5_91, %c0_92, %c0_93] : memref<1x8x8x128xf32, #tpu.memory_space<vmem>>, vector<1x1x8x128xf32>
    %164 = vector.shape_cast %163 : vector<1x1x8x128xf32> to vector<8x128xf32>
    %165 = vector.shape_cast %162 : vector<8x128xf32> to vector<1x1x8x128xf32>
    tpu.vector_store %arg4[%c0_90, %c5_91, %c0_92, %c0_93], %165 {strides = array<i32>} : memref<1x8x8x128xf32, #tpu.memory_space<vmem>>, vector<1x1x8x128xf32>,
    %c0_94 = arith.constant 0 : index
    %c12 = arith.constant 12 : index
    %c0_95 = arith.constant 0 : index
    %c0_96 = arith.constant 0 : index
    %166 = vector.load %arg1[%c0_94, %c12, %c0_95, %c0_96] : memref<1x16x16x128xf32, #tpu.memory_space<vmem>>, vector<1x1x16x128xf32>
    %167 = vector.shape_cast %166 : vector<1x1x16x128xf32> to vector<16x128xf32>
    %168 = vector.broadcast %0 : vector<1x128xf32> to vector<16x128xf32>
    %169 = arith.mulf %167, %168 : vector<16x128xf32>
    %170 = vector.broadcast %1 : vector<1x128xf32> to vector<16x128xf32>
    %171 = arith.addf %169, %170 : vector<16x128xf32>
    %cst_97 = arith.constant 0.000000e+00 : f32
    %172 = vector.broadcast %cst_97 : f32 to vector<16x128xf32>
    %173 = arith.maximumf %171, %172 : vector<16x128xf32>
    %c0_98 = arith.constant 0 : index
    %c13 = arith.constant 13 : index
    %c0_99 = arith.constant 0 : index
    %c0_100 = arith.constant 0 : index
    %174 = vector.load %arg1[%c0_98, %c13, %c0_99, %c0_100] : memref<1x16x16x128xf32, #tpu.memory_space<vmem>>, vector<1x1x16x128xf32>
    %175 = vector.shape_cast %174 : vector<1x1x16x128xf32> to vector<16x128xf32>
    %176 = vector.broadcast %0 : vector<1x128xf32> to vector<16x128xf32>
    %177 = arith.mulf %175, %176 : vector<16x128xf32>
    %178 = vector.broadcast %1 : vector<1x128xf32> to vector<16x128xf32>
    %179 = arith.addf %177, %178 : vector<16x128xf32>
    %cst_101 = arith.constant 0.000000e+00 : f32
    %180 = vector.broadcast %cst_101 : f32 to vector<16x128xf32>
    %181 = arith.maximumf %179, %180 : vector<16x128xf32>
    %182 = arith.addf %173, %181 : vector<16x128xf32>
    %cst_102 = arith.constant dense<0.000000e+00> : vector<8x128xf32>
    %183 = tpu.matmul %8, %182, %cst_102 {dimension_numbers = #tpu.dot_dimension_numbers<[1], [0], [0], [1], [0, 0, 1, 1], [], []>} : vector<8x16xf32>, vector<16x128xf32>, vector<8x128xf32> -> vector<8x128xf32>
    %cst_103 = arith.constant dense<0.000000e+00> : vector<8x128xf32>
    %184 = tpu.matmul %15, %182, %cst_103 {dimension_numbers = #tpu.dot_dimension_numbers<[1], [0], [0], [1], [0, 0, 1, 1], [], []>} : vector<8x16xf32>, vector<16x128xf32>, vector<8x128xf32> -> vector<8x128xf32>
    %185 = arith.addf %183, %184 : vector<8x128xf32>
    %cst_104 = arith.constant 2.500000e-01 : f32
    %186 = vector.broadcast %cst_104 : f32 to vector<8x128xf32>
    %187 = arith.mulf %186, %185 : vector<8x128xf32>
    %c0_105 = arith.constant 0 : index
    %c6_106 = arith.constant 6 : index
    %c0_107 = arith.constant 0 : index
    %c0_108 = arith.constant 0 : index
    %188 = vector.load %arg4[%c0_105, %c6_106, %c0_107, %c0_108] : memref<1x8x8x128xf32, #tpu.memory_space<vmem>>, vector<1x1x8x128xf32>
    %189 = vector.shape_cast %188 : vector<1x1x8x128xf32> to vector<8x128xf32>
    %190 = vector.shape_cast %187 : vector<8x128xf32> to vector<1x1x8x128xf32>
    tpu.vector_store %arg4[%c0_105, %c6_106, %c0_107, %c0_108], %190 {strides = array<i32>} : memref<1x8x8x128xf32, #tpu.memory_space<vmem>>, vector<1x1x8x128xf32>,
    %c0_109 = arith.constant 0 : index
    %c14 = arith.constant 14 : index
    %c0_110 = arith.constant 0 : index
    %c0_111 = arith.constant 0 : index
    %191 = vector.load %arg1[%c0_109, %c14, %c0_110, %c0_111] : memref<1x16x16x128xf32, #tpu.memory_space<vmem>>, vector<1x1x16x128xf32>
    %192 = vector.shape_cast %191 : vector<1x1x16x128xf32> to vector<16x128xf32>
    %193 = vector.broadcast %0 : vector<1x128xf32> to vector<16x128xf32>
    %194 = arith.mulf %192, %193 : vector<16x128xf32>
    %195 = vector.broadcast %1 : vector<1x128xf32> to vector<16x128xf32>
    %196 = arith.addf %194, %195 : vector<16x128xf32>
    %cst_112 = arith.constant 0.000000e+00 : f32
    %197 = vector.broadcast %cst_112 : f32 to vector<16x128xf32>
    %198 = arith.maximumf %196, %197 : vector<16x128xf32>
    %c0_113 = arith.constant 0 : index
    %c15 = arith.constant 15 : index
    %c0_114 = arith.constant 0 : index
    %c0_115 = arith.constant 0 : index
    %199 = vector.load %arg1[%c0_113, %c15, %c0_114, %c0_115] : memref<1x16x16x128xf32, #tpu.memory_space<vmem>>, vector<1x1x16x128xf32>
    %200 = vector.shape_cast %199 : vector<1x1x16x128xf32> to vector<16x128xf32>
    %201 = vector.broadcast %0 : vector<1x128xf32> to vector<16x128xf32>
    %202 = arith.mulf %200, %201 : vector<16x128xf32>
    %203 = vector.broadcast %1 : vector<1x128xf32> to vector<16x128xf32>
    %204 = arith.addf %202, %203 : vector<16x128xf32>
    %cst_116 = arith.constant 0.000000e+00 : f32
    %205 = vector.broadcast %cst_116 : f32 to vector<16x128xf32>
    %206 = arith.maximumf %204, %205 : vector<16x128xf32>
    %207 = arith.addf %198, %206 : vector<16x128xf32>
    %cst_117 = arith.constant dense<0.000000e+00> : vector<8x128xf32>
    %208 = tpu.matmul %8, %207, %cst_117 {dimension_numbers = #tpu.dot_dimension_numbers<[1], [0], [0], [1], [0, 0, 1, 1], [], []>} : vector<8x16xf32>, vector<16x128xf32>, vector<8x128xf32> -> vector<8x128xf32>
    %cst_118 = arith.constant dense<0.000000e+00> : vector<8x128xf32>
    %209 = tpu.matmul %15, %207, %cst_118 {dimension_numbers = #tpu.dot_dimension_numbers<[1], [0], [0], [1], [0, 0, 1, 1], [], []>} : vector<8x16xf32>, vector<16x128xf32>, vector<8x128xf32> -> vector<8x128xf32>
    %210 = arith.addf %208, %209 : vector<8x128xf32>
    %cst_119 = arith.constant 2.500000e-01 : f32
    %211 = vector.broadcast %cst_119 : f32 to vector<8x128xf32>
    %212 = arith.mulf %211, %210 : vector<8x128xf32>
    %c0_120 = arith.constant 0 : index
    %c7_121 = arith.constant 7 : index
    %c0_122 = arith.constant 0 : index
    %c0_123 = arith.constant 0 : index
    %213 = vector.load %arg4[%c0_120, %c7_121, %c0_122, %c0_123] : memref<1x8x8x128xf32, #tpu.memory_space<vmem>>, vector<1x1x8x128xf32>
    %214 = vector.shape_cast %213 : vector<1x1x8x128xf32> to vector<8x128xf32>
    %215 = vector.shape_cast %212 : vector<8x128xf32> to vector<1x1x8x128xf32>
    tpu.vector_store %arg4[%c0_120, %c7_121, %c0_122, %c0_123], %215 {strides = array<i32>} : memref<1x8x8x128xf32, #tpu.memory_space<vmem>>, vector<1x1x8x128xf32>,
    return
  }
  func.func @transform_0(%arg0: i32) -> (i32, i32, i32, i32) {
    %c0_i32 = arith.constant 0 : i32
    %c0_i32_0 = arith.constant 0 : i32
    %c0_i32_1 = arith.constant 0 : i32
    %c0_i32_2 = arith.constant 0 : i32
    return %arg0, %c0_i32, %c0_i32_0, %c0_i32_1 : i32, i32, i32, i32
  }
  func.func @transform_1(%arg0: i32) -> (i32, i32) {
    %c0_i32 = arith.constant 0 : i32
    %c0_i32_0 = arith.constant 0 : i32
    %c0_i32_1 = arith.constant 0 : i32
    return %c0_i32, %c0_i32_0 : i32, i32
  }
  func.func @transform_2(%arg0: i32) -> (i32, i32) {
    %c0_i32 = arith.constant 0 : i32
    %c0_i32_0 = arith.constant 0 : i32
    %c0_i32_1 = arith.constant 0 : i32
    return %c0_i32, %c0_i32_0 : i32, i32
  }
  func.func @transform_3(%arg0: i32) -> (i32, i32, i32, i32) {
    %c0_i32 = arith.constant 0 : i32
    %c0_i32_0 = arith.constant 0 : i32
    %c0_i32_1 = arith.constant 0 : i32
    %c0_i32_2 = arith.constant 0 : i32
    return %arg0, %c0_i32, %c0_i32_0, %c0_i32_1 : i32, i32, i32, i32
  }
}

</mosaic_0001>

<bundles_post_ra>
// kernel: conv_block_forward.3
= control target key start
LH: loop header
LB: loop body
LE: loop exit
PB: predicated region body
PF: predicated region fallthrough
CT: control target
= control target key end

     0   :  { %s3118_s18 = smov 0   ;;  %s3644_s0 = inlined_call_operand.vmem [shape: f32[4,10,18,128], index: 0, kind: input, shape index: {}]   ;;  %s3645_s1 = inlined_call_operand.vmem [shape: bf16[3,3,128,128], index: 1, kind: input, shape index: {}]   ;;  %s3646_s2 = inlined_call_operand.vmem [shape: f32[1,128], index: 2, kind: input, shape index: {}]   ;;  %s3647_s3 = inlined_call_operand.vmem [shape: f32[1,128], index: 3, kind: input, shape index: {}]   ;;  %s3648_s4 = inlined_call_operand.vmem [shape: f32[4,8,16,128], index: 4, kind: output, shape index: {0}]   ;;  %s3649_s5 = inlined_call_operand.vmem [shape: f32[4,2,128], index: 5, kind: output, shape index: {1}]  }
   0x1 LB: > { %s2211_s2 = sadd.s32 4294967295, %s3086_s18   ;;  %p2215_p0 = scmp.ge.s32.totalorder %s3086_s18, 1  ;;  %s3086_s18 = sphi %s3118_s18, %s16_s18  }
   0x2   : > { %p190_p1 = scmp.lt.s32.totalorder %s3086_s18, 5 }
   0x4   : > { %p191_p2 = pnand %p2215_p0, %p190_p1 }
   0x5   : > { %v3008_v0 = vld [vmem:[%s3645_s1 + $0x40] sm:$0xff] (!%p191_p2)   ;;  %p222_p3 = scmp.lt.s32.totalorder (!%p191_p2), %s2211_s2, 3  ;;  %v3010_v2 = vld [vmem:[%s3645_s1 + $0x48] sm:$0xff] (!%p191_p2)   ;;  %v3012_v4 = vld [vmem:[%s3645_s1 + $0x50] sm:$0xff] (!%p191_p2)   ;;  %vm303_vm0 = vsmask.f32 (!%p191_p2), 7424 }
   0x6   : > { %194 = sbr.rel (%p191_p2) target bundleno = 430 (0x1ae), region = 36  ;;  %v3009_v1 = vld [vmem:[%s3645_s1 + $0x100] sm:$0xff] (!%p191_p2)   ;;  %2567 = vmatprep.subr.bf16.mxu1 (!%p191_p2), %v3008_v0  ;;  %v3011_v3 = vld [vmem:[%s3645_s1 + $0x108] sm:$0xff] (!%p191_p2)   ;;  %v3013_v5 = vld [vmem:[%s3645_s1 + $0x110] sm:$0xff] (!%p191_p2)   ;;  %vm731_vm1 = vcmask (!%p191_p2), 1046528   ;;  %vm2122_vm2 = vcmask (!%p191_p2), 1040384  }
   0x7   : > { %2695 = vmatprep.subr.bf16.mxu0 (!%p191_p2), %v3009_v1  ;;  %2568 = vmatpush3.bf16.msra.mxu1 (!%p191_p2), %v3008_v0  ;;  %v3014_v6 = vld [vmem:[%s3645_s1 + $0x58] sm:$0xff] (!%p191_p2)   ;;  %v3016_v8 = vld [vmem:[%s3645_s1 + $0x60] sm:$0xff] (!%p191_p2)   ;;  %v3018_v10 = vld [vmem:[%s3645_s1 + $0x68] sm:$0xff] (!%p191_p2)  }
   0x8   : > { %2696 = vmatpush3.bf16.msra.mxu0 (!%p191_p2), %v3009_v1  ;;  %2569 = vmatprep.subr.bf16.mxu1 (!%p191_p2), %v3010_v2  ;;  %v3015_v7 = vld [vmem:[%s3645_s1 + $0x118] sm:$0xff] (!%p191_p2)   ;;  %v3017_v9 = vld [vmem:[%s3645_s1 + $0x120] sm:$0xff] (!%p191_p2)   ;;  %v3019_v11 = vld [vmem:[%s3645_s1 + $0x128] sm:$0xff] (!%p191_p2)  }
   0x9   : > { %2697 = vmatprep.subr.bf16.mxu0 (!%p191_p2), %v3011_v3  ;;  %v3020_v22 = vld [vmem:[%s3645_s1 + $0x70] sm:$0xff] (!%p191_p2)   ;;  %v3022_v40 = vld [vmem:[%s3645_s1 + $0x78] sm:$0xff] (!%p191_p2)   ;;  %v3024_v53 = vld [vmem:[%s3645_s1] sm:$0xff] (!%p191_p2)  }
   0xa   : > { %v3021_v28 = vld [vmem:[%s3645_s1 + $0x130] sm:$0xff] (!%p191_p2)   ;;  %v3023_v48 = vld [vmem:[%s3645_s1 + $0x138] sm:$0xff] (!%p191_p2)   ;;  %v3025_v1 = vld [vmem:[%s3645_s1 + $0x140] sm:$0xff] (!%p191_p2)  }
   0xb   : > { %2570 = vmatpush3.bf16.msra.mxu1 (!%p191_p2), %v3010_v2 }
   0xc   : > { %2698 = vmatpush3.bf16.msra.mxu0 (!%p191_p2), %v3011_v3  ;;  %2571 = vmatprep.subr.bf16.mxu1 (!%p191_p2), %v3012_v4 }
   0xd   : > { %s3651_s2 = smov (!%p222_p3, %s2211_s2), 3  ;;  %2699 = vmatprep.subr.bf16.mxu0 %v3013_v5 }
   0xe   : > { %s2999_s9 = smul.u32 240, %s3651_s2  ;;  %s2422_s20 = sshll.u32 %s3651_s2, 7 }
   0xf   : > { %2572 = vmatpush3.bf16.msra.mxu1 %v3012_v4  ;;  %v3026_v4 = vld [vmem:[%s3645_s1 + $0x8] sm:$0xff]   ;;  %s3597_s23 = scalar_lea.vmem %s3648_s4, %s2422_s20  ;;  %s2219_s24 = sshll.u32 %s3651_s2, 1 }
  0x10   : > { %2700 = vmatpush3.bf16.msra.mxu0 %v3013_v5  ;;  %2573 = vmatprep.subr.bf16.mxu1 %v3014_v6  ;;  %s3162_s16 = scalar_lea.vmem %s3644_s0, %s2999_s9  ;;  %s235_s27 = scalar_lea.vmem %s3649_s5, %s2219_s24 }
  0x11   : > { %2701 = vmatprep.subr.bf16.mxu0 %v3015_v7  ;;  %v237_v12 = vld [vmem:[%s3162_s16] sm:$0xff]  ;;  %v238_v13 = vld [vmem:[%s3162_s16 + $0x8] sm:$0xff]  ;;  %v239_v14 = vld [vmem:[%s3162_s16 + $0x10] sm:$0x3] }
  0x12   : > { %v3173_v15 = vpack.c.bf16 %v238_v13, %v237_v12  ;;  %v3175_v16 = vpack.c.bf16 %v239_v14, %v239_v14  ;;  %v240_v17 = vld [vmem:[%s3162_s16 + $0x18] sm:$0xff]  ;;  %v241_v18 = vld [vmem:[%s3162_s16 + $0x20] sm:$0xff]  ;;  %v242_v19 = vld [vmem:[%s3162_s16 + $0x28] sm:$0x3] }
  0x13   : > { %2574 = vmatpush3.bf16.msra.mxu1 %v3014_v6  ;;  %v3180_v20 = vpack.c.bf16 %v241_v18, %v240_v17  ;;  %v3182_v21 = vpack.c.bf16 %v242_v19, %v242_v19  ;;  %v243_v26 = vld [vmem:[%s3162_s16 + $0x30] sm:$0xff]  ;;  %v244_v27 = vld [vmem:[%s3162_s16 + $0x38] sm:$0xff]  ;;  %v245_v32 = vld [vmem:[%s3162_s16 + $0x40] sm:$0x3] }
  0x14   : > { %2702 = vmatpush3.bf16.msra.mxu0 %v3015_v7  ;;  %2575 = vmatprep.subr.bf16.mxu1 %v3016_v8  ;;  %v305_v23 = vshrl.u32 %v3173_v15, 16  ;;  %v307_v24 = vshll.u32 %v3173_v15, 16  ;;  %v312_v25 = vshll.u32 %v3175_v16, 16  ;;  %v3199_v33 = vpack.c.bf16 %v244_v27, %v243_v26  ;;  %v246_v46 = vld [vmem:[%s3162_s16 + $0x48] sm:$0xff]  ;;  %v247_v47 = vld [vmem:[%s3162_s16 + $0x50] sm:$0xff]  ;;  %v249_v55 = vld [vmem:[%s3162_s16 + $0x60] sm:$0xff] }
  0x15   : > { %2703 = vmatprep.subr.bf16.mxu0 %v3017_v9  ;;  %v317_v29 = vshrl.u32 %v3180_v20, 16  ;;  %v319_v30 = vshll.u32 %v3180_v20, 16  ;;  %v324_v31 = vshll.u32 %v3182_v21, 16  ;;  %v3201_v36 = vpack.c.bf16 %v245_v32, %v245_v32  ;;  %v248_v50 = vld [vmem:[%s3162_s16 + $0x58] sm:$0x3]  ;;  %v250_v56 = vld [vmem:[%s3162_s16 + $0x68] sm:$0xff] }
  0x16   : > { %v309_v34 = vrot.slane %v307_v24, 1  ;;  %v314_v35 = vrot.slane %v312_v25, 1  ;;  %v331_v39 = vshll.u32 %v3199_v33, 16  ;;  %v329_v42 = vshrl.u32 %v3199_v33, 16  ;;  %v251_v59 = vld [vmem:[%s3162_s16 + $0x70] sm:$0x3] }
  0x17   : > { %2576 = vmatpush3.bf16.msra.mxu1 %v3016_v8  ;;  %v321_v37 = vrot.slane %v319_v30, 1  ;;  %v326_v38 = vrot.slane %v324_v31, 1  ;;  %v336_v45 = vshll.u32 %v3201_v36, 16  ;;  %v3216_v51 = vpack.c.bf16 %v247_v47, %v246_v46  ;;  %v3027_v6 = vld [vmem:[%s3645_s1 + $0x148] sm:$0xff]   ;;  %v255_v19 = vld [vmem:[%s3162_s16 + $0x90] sm:$0xff] }
  0x18   : > { %2704 = vmatpush3.bf16.msra.mxu0 %v3017_v9  ;;  %2577 = vmatprep.subr.bf16.mxu1 %v3018_v10  ;;  %v310_v41 = vor.u32 %v309_v34, %v305_v23  ;;  %v333_v44 = vrot.slane %v331_v39, 1  ;;  %v3222_v54 = vpack.c.bf16 %v248_v50, %v248_v50  ;;  %v3229_v60 = vpack.c.bf16 %v250_v56, %v249_v55  ;;  %v252_v9 = vld [vmem:[%s3162_s16 + $0x78] sm:$0xff]  ;;  %v254_v14 = vld [vmem:[%s3162_s16 + $0x88] sm:$0x3]  ;;  %v257_v25 = vld [vmem:[%s3162_s16 + $0xa0] sm:$0x3] }
  0x19   : > { %2705 = vmatprep.subr.bf16.mxu0 %v3019_v11  ;;  %v322_v43 = vor.u32 %v321_v37, %v317_v29  ;;  %v341_v57 = vshrl.u32 %v3216_v51, 16  ;;  %v343_v58 = vshll.u32 %v3216_v51, 16  ;;  %v338_v62 = vrot.slane %v336_v45, 1  ;;  %v3028_v30 = vld [vmem:[%s3645_s1 + $0x10] sm:$0xff]   ;;  %v258_v39 = vld [vmem:[%s3162_s16 + $0xa8] sm:$0xff]  ;;  %v261_v50 = vld [vmem:[%s3162_s16 + $0xc0] sm:$0xff] }
  0x1a   : > { %v315_v49 = vsel %vm303_vm0, %v310_v41, %v314_v35  ;;  %v334_v61 = vor.u32 %v333_v44, %v329_v42  ;;  %v348_v63 = vshll.u32 %v3222_v54, 16  ;;  %v3232_v0 = vpack.c.bf16 %v251_v59, %v251_v59  ;;  %v3029_v37 = vld [vmem:[%s3645_s1 + $0x150] sm:$0xff]   ;;  %v260_v44 = vld [vmem:[%s3162_s16 + $0xb8] sm:$0x3]  ;;  %v3032_v59 = vld [vmem:[%s3645_s1 + $0x20] sm:$0xff]  }
  0x1b   : > { %2578 = vmatpush3.bf16.msra.mxu1 %v3018_v10  ;;  %2583 = vmatprep.mubr.bf16.mxu1 %v315_v49  ;;  %v327_v52 = vsel %vm303_vm0, %v322_v43, %v326_v38  ;;  %v345_v2 = vrot.slane %v343_v58, 1  ;;  %v355_v3 = vshll.u32 %v3229_v60, 16  ;;  %v253_v10 = vld [vmem:[%s3162_s16 + $0x80] sm:$0xff]  ;;  %v353_v12 = vshrl.u32 %v3229_v60, 16  ;;  %v3030_v38 = vld [vmem:[%s3645_s1 + $0x18] sm:$0xff]  }
  0x1c   : > { %2706 = vmatpush3.bf16.msra.mxu0 %v3019_v11  ;;  %2579 = vmatprep.subr.bf16.mxu1 %v3020_v22  ;;  %v360_v5 = vshll.u32 %v3232_v0, 16  ;;  %v350_v8 = vrot.slane %v348_v63, 1  ;;  %v3248_v11 = vsel %vm303_vm0, %v334_v61, %v338_v62  ;;  %v3252_v17 = vpack.c.bf16 %v253_v10, %v252_v9  ;;  %v263_v56 = vld [vmem:[%s3162_s16 + $0xd0] sm:$0x3] }
  0x1d   : > { %2707 = vmatprep.subr.bf16.mxu0 %v3021_v28  ;;  %2711 = vmatprep.mubr.bf16.mxu0 %v327_v52  ;;  %v346_v7 = vor.u32 %v345_v2, %v341_v57  ;;  %v357_v13 = vrot.slane %v355_v3, 1  ;;  %v3254_v18 = vpack.c.bf16 %v254_v14, %v254_v14  ;;  %v3271_v34 = vpack.c.bf16 %v257_v25, %v257_v25  ;;  %v3035_v14 = vld [vmem:[%s3645_s1 + $0x168] sm:$0xff]   ;;  %v3037_v25 = vld [vmem:[%s3645_s1 + $0x170] sm:$0xff]  }
  0x1e   : > { %v362_v23 = vrot.slane %v360_v5, 1  ;;  %v367_v24 = vshll.u32 %v3252_v17, 16  ;;  %v3292_v49 = vpack.c.bf16 %v260_v44, %v260_v44  ;;  %v3313_v3 = vpack.c.bf16 %v263_v56, %v263_v56  ;;  %v3033_v5 = vld [vmem:[%s3645_s1 + $0x160] sm:$0xff]  }
  0x1f   : > { %2580 = vmatpush3.bf16.msra.mxu1 %v3020_v22  ;;  %v256_v22 = vld [vmem:[%s3162_s16 + $0x98] sm:$0xff]  ;;  %v3264_v27 = vsel %vm303_vm0, %v346_v7, %v350_v8  ;;  %v372_v29 = vshll.u32 %v3254_v18, 16  ;;  %v358_v31 = vor.u32 %v357_v13, %v353_v12 }
  0x20   : > { %2708 = vmatpush3.bf16.msra.mxu0 %v3021_v28  ;;  %2581 = vmatprep.subr.bf16.mxu1 %v3022_v40  ;;  %v3260_v26 = vpack.c.bf16 %v256_v22, %v255_v19  ;;  %v365_v28 = vshrl.u32 %v3252_v17, 16  ;;  %v369_v32 = vrot.slane %v367_v24, 1  ;;  %v396_v63 = vshll.u32 %v3292_v49, 16  ;;  %v3036_v22 = vld [vmem:[%s3645_s1 + $0x30] sm:$0xff]  }
  0x21   : > { %2709 = vmatprep.subr.bf16.mxu0 %v3023_v48  ;;  %v374_v42 = vrot.slane %v372_v29, 1  ;;  %v3289_v46 = vsel %vm303_vm0, %v358_v31, %v362_v23  ;;  %v1128_v13 = vshll.u32 %v3313_v3, 16  ;;  %v736_v29 = vrot.slane %v3182_v21, 1  ;;  %v3038_v31 = vld [vmem:[%s3645_s1 + $0x38] sm:$0xff]  }
  0x22   : > { %v379_v35 = vshll.u32 %v3260_v26, 16  ;;  %v370_v41 = vor.u32 %v369_v32, %v365_v28  ;;  %v377_v43 = vshrl.u32 %v3260_v26, 16  ;;  %v398_v8 = vrot.slane %v396_v63, 1 }
  0x23   : > { %2582 = vmatpush3.bf16.msra.mxu1 %v3022_v40  ;;  %v259_v40 = vld [vmem:[%s3162_s16 + $0xb0] sm:$0xff]  ;;  %v1130_v24 = vrot.slane %v1128_v13, 1  ;;  %v735_v28 = vrot.slane %v3180_v20, 1  ;;  %v732_v32 = vrot.slane %v3173_v15, 1  ;;  %v751_v63 = vrot.slane %v3271_v34, 1 }
  0x24   : > { %2710 = vmatpush3.bf16.msra.mxu0 %v3023_v48  ;;  %2599 = vmatprep.subr.bf16.mxu1 %v3024_v53  ;;  %v3286_v45 = vpack.c.bf16 %v259_v40, %v258_v39  ;;  %v381_v47 = vrot.slane %v379_v35, 1  ;;  %v384_v48 = vshll.u32 %v3271_v34, 16  ;;  %v3306_v58 = vsel %vm303_vm0, %v370_v41, %v374_v42  ;;  %v3039_v35 = vld [vmem:[%s3645_s1 + $0x178] sm:$0xff]   ;;  %v3040_v40 = vld [vmem:[%s3645_s1 + $0x80] sm:$0xff]   ;;  %v3050_v34 = vld [vmem:[%s3645_s1 + $0xa8] sm:$0xff]  }
  0x25   : > { %2727 = vmatprep.subr.bf16.mxu0 %v3025_v1  ;;  %v3361_v21 = vsel %vm731_vm1, %v735_v28, %v736_v29  ;;  %v3041_v41 = vld [vmem:[%s3645_s1 + $0x180] sm:$0xff]   ;;  %v741_v42 = vrot.slane %v3216_v51, 1  ;;  %v3060_v28 = vld [vmem:[%s3645_s1 + $0xd0] sm:$0xff]  }
  0x26   : > { %2584 = vmatmul.mubr.bf16.vlgmr.msra.gmra.mrb[0].mxu1 %v327_v52  ;;  %v262_v52 = vld [vmem:[%s3162_s16 + $0xc8] sm:$0xff]  ;;  %v391_v55 = vshll.u32 %v3286_v45, 16  ;;  %v389_v61 = vshrl.u32 %v3286_v45, 16  ;;  %v386_v2 = vrot.slane %v384_v48, 1  ;;  %v3044_v48 = vld [vmem:[%s3645_s1 + $0x90] sm:$0xff]  }
  0x27   : > { %2712 = vmatmul.mubr.bf16.vlgmr.msra.gmra.mrb[0].mxu0 %v3248_v11  ;;  %2600 = vmatpush3.bf16.msra.mxu1 %v3024_v53  ;;  %v3031_v53 = vld [vmem:[%s3645_s1 + $0x158] sm:$0xff]   ;;  %v3301_v57 = vpack.c.bf16 %v262_v52, %v261_v50  ;;  %v745_v50 = vrot.slane %v3232_v0, 1  ;;  %v3045_v52 = vld [vmem:[%s3645_s1 + $0x190] sm:$0xff]  }
  0x28   : > { %2728 = vmatpush3.bf16.msra.mxu0 %v3025_v1  ;;  %2601 = vmatprep.subr.bf16.mxu1 %v3026_v4  ;;  %v393_v62 = vrot.slane %v391_v55, 1  ;;  %v382_v1 = vor.u32 %v381_v47, %v377_v43  ;;  %v742_v43 = vrot.slane %v3222_v54, 1  ;;  %v744_v47 = vrot.slane %v3229_v60, 1  ;;  %v3046_v0 = vld [vmem:[%s3645_s1 + $0x98] sm:$0xff]   ;;  %v3061_v29 = vld [vmem:[%s3645_s1 + $0x1d0] sm:$0xff]  }
  0x29   : > { %2729 = vmatprep.subr.bf16.mxu0 %v3027_v6  ;;  %2587 = vmatprep.mubr.bf16.mxu1 %v3248_v11  ;;  %v1121_v9 = vshrl.u32 %v3301_v57, 16  ;;  %v748_v55 = vrot.slane %v3254_v18, 1 }
  0x2a   : > { %2715 = vmatprep.mubr.bf16.mxu0 %v3264_v27  ;;  %v394_v7 = vor.u32 %v393_v62, %v389_v61  ;;  %v3326_v10 = vsel %vm303_vm0, %v382_v1, %v386_v2  ;;  %v3390_v54 = vsel %vm731_vm1, %v741_v42, %v742_v43  ;;  %v3405_v56 = vsel %vm731_vm1, %v744_v47, %v745_v50  ;;  %v3048_v62 = vld [vmem:[%s3645_s1 + $0xa0] sm:$0xff]   ;;  %v3070_v43 = vld [vmem:[%s3645_s1 + $0xf8] sm:$0xff]   ;;  %v3073_v47 = vld [vmem:[%s3645_s1 + $0x208] sm:$0xff]  }
  0x2b   : > { %2602 = vmatpush3.bf16.msra.mxu1 %v3026_v4  ;;  %v1123_v4 = vshll.u32 %v3301_v57, 16  ;;  %v750_v61 = vrot.slane %v3260_v26, 1  ;;  %v3049_v1 = vld [vmem:[%s3645_s1 + $0x1a0] sm:$0xff]   ;;  %v753_v2 = vrot.slane %v3286_v45, 1 }
  0x2c   : > { %2730 = vmatpush3.bf16.msra.mxu0 %v3027_v6  ;;  %2603 = vmatprep.subr.bf16.mxu1 %v3028_v30  ;;  %v3034_v6 = vld [vmem:[%s3645_s1 + $0x28] sm:$0xff]   ;;  %v3335_v19 = vsel %vm303_vm0, %v394_v7, %v398_v8  ;;  %v1313_v7 = vrot.slane %v3301_v57, 1  ;;  %v3052_v8 = vld [vmem:[%s3645_s1 + $0xb0] sm:$0xff]  }
  0x2d   : > { %2731 = vmatprep.subr.bf16.mxu0 %v3029_v37  ;;  %v1125_v12 = vrot.slane %v1123_v4, 1  ;;  %v754_v4 = vrot.slane %v3292_v49, 1 }
  0x2e   : > { %2588 = vmatmul.mubr.bf16.gmra.mrb[4].mxu1 %v3264_v27 }
  0x2f   : > { %2716 = vmatmul.mubr.bf16.gmra.mrb[4].mxu0 %v3289_v46  ;;  %2604 = vmatpush3.bf16.msra.mxu1 %v3028_v30  ;;  %v1126_v23 = vor.u32 %v1125_v12, %v1121_v9  ;;  %v3442_v49 = vsel %vm731_vm1, %v753_v2, %v754_v4  ;;  %v1314_v9 = vrot.slane %v3313_v3, 1  ;;  %v3053_v12 = vld [vmem:[%s3645_s1 + $0x1b0] sm:$0xff]   ;;  %v3055_v3 = vld [vmem:[%s3645_s1 + $0x1b8] sm:$0xff]  }
  0x30   : > { %2732 = vmatpush3.bf16.msra.mxu0 %v3029_v37  ;;  %2605 = vmatprep.subr.bf16.mxu1 %v3030_v38  ;;  %v733_v37 = vrot.slane %v3175_v16, 1  ;;  %v739_v16 = vrot.slane %v3201_v36, 1  ;;  %v3043_v36 = vld [vmem:[%s3645_s1 + $0x188] sm:$0xff]  }
  0x31   : > { %2733 = vmatprep.subr.bf16.mxu0 %v3031_v53  ;;  %2591 = vmatprep.mubr.bf16.mxu1 %v3289_v46  ;;  %v3348_v30 = vsel %vm303_vm0, %v1126_v23, %v1130_v24  ;;  %v3455_v13 = vsel %vm731_vm1, %v1313_v7, %v1314_v9  ;;  %v3057_v23 = vld [vmem:[%s3645_s1 + $0x1c0] sm:$0xff]   ;;  %v3058_v24 = vld [vmem:[%s3645_s1 + $0xc8] sm:$0xff]  }
  0x32   : > { %2719 = vmatprep.mubr.bf16.mxu0 %v3306_v58  ;;  %v3365_v39 = vsel %vm731_vm1, %v732_v32, %v733_v37  ;;  %v3063_v32 = vld [vmem:[%s3645_s1 + $0x1d8] sm:$0xff]   ;;  %v3065_v37 = vld [vmem:[%s3645_s1 + $0x1e0] sm:$0xff]  }
  0x33   : > { %2606 = vmatpush3.bf16.msra.mxu1 %v3030_v38  ;;  %v738_v38 = vrot.slane %v3199_v33, 1 }
  0x34   : > { %2734 = vmatpush3.bf16.msra.mxu0 %v3031_v53  ;;  %2607 = vmatprep.subr.bf16.mxu1 %v3032_v59  ;;  %v747_v53 = vrot.slane %v3252_v17, 1 }
  0x35   : > { %2735 = vmatprep.subr.bf16.mxu0 %v3033_v5  ;;  %v3379_v44 = vsel %vm731_vm1, %v738_v38, %v739_v16  ;;  %v3067_v38 = vld [vmem:[%s3645_s1 + $0x1e8] sm:$0xff]   ;;  %v265_v16 = vld [vmem:[%s3162_s16 + $0xe0] sm:$0xff] }
  0x36   : > { %2592 = vmatmul.mubr.bf16.gmra.mrb[8].mxu1 %v3306_v58  ;;  %v3416_v18 = vsel %vm731_vm1, %v747_v53, %v748_v55 }
  0x37   : > { %2720 = vmatmul.mubr.bf16.gmra.mrb[8].mxu0 %v3326_v10  ;;  %2608 = vmatpush3.bf16.msra.mxu1 %v3032_v59  ;;  %v3047_v59 = vld [vmem:[%s3645_s1 + $0x198] sm:$0xff]  }
  0x38   : > { %2736 = vmatpush3.bf16.msra.mxu0 %v3033_v5  ;;  %2609 = vmatprep.subr.bf16.mxu1 %v3034_v6  ;;  %v3431_v5 = vsel %vm731_vm1, %v750_v61, %v751_v63 }
  0x39   : > { %2737 = vmatprep.subr.bf16.mxu0 %v3035_v14  ;;  %2595 = vmatprep.mubr.bf16.mxu1 %v3326_v10 }
  0x3a   : > { %2723 = vmatprep.mubr.bf16.mxu0 %v3335_v19 }
  0x3b   : > { %2610 = vmatpush3.bf16.msra.mxu1 %v3034_v6  ;;  %v3051_v6 = vld [vmem:[%s3645_s1 + $0x1a8] sm:$0xff]  }
  0x3c   : > { %2738 = vmatpush3.bf16.msra.mxu0 %v3035_v14  ;;  %2611 = vmatprep.subr.bf16.mxu1 %v3036_v22  ;;  %v3054_v14 = vld [vmem:[%s3645_s1 + $0xb8] sm:$0xff]  }
  0x3d   : > { %2739 = vmatprep.subr.bf16.mxu0 %v3037_v25 }
  0x3e   : > { %2596 = vmatmul.mubr.bf16.gmra.mrb[12].mxu1 %v3335_v19 }
  0x3f   : > { %2724 = vmatmul.mubr.bf16.gmra.mrb[12].mxu0 %v3348_v30  ;;  %2612 = vmatpush3.bf16.msra.mxu1 %v3036_v22  ;;  %v3056_v22 = vld [vmem:[%s3645_s1 + $0xc0] sm:$0xff]  }
  0x40   : > { %2740 = vmatpush3.bf16.msra.mxu0 %v3037_v25  ;;  %2613 = vmatprep.subr.bf16.mxu1 %v3038_v31  ;;  %v3059_v25 = vld [vmem:[%s3645_s1 + $0x1c8] sm:$0xff]  }
  0x41   : > { %2741 = vmatprep.subr.bf16.mxu0 %v3039_v35  ;;  %2615 = vmatprep.mubr.bf16.mxu1 %v3173_v15  ;;  %v3042_v15 = vld [vmem:[%s3645_s1 + $0x88] sm:$0xff]  }
  0x42   : > { %2743 = vmatprep.mubr.bf16.mxu0 %v3361_v21 }
  0x43   : > { %2614 = vmatpush3.bf16.msra.mxu1 %v3038_v31  ;;  %v3062_v31 = vld [vmem:[%s3645_s1 + $0xd8] sm:$0xff]  }
  0x44   : > { %2742 = vmatpush3.bf16.msra.mxu0 %v3039_v35  ;;  %2631 = vmatprep.subr.bf16.mxu1 %v3040_v40  ;;  %v3064_v35 = vld [vmem:[%s3645_s1 + $0xe0] sm:$0xff]  }
  0x45   : > { %2759 = vmatprep.subr.bf16.mxu0 %v3041_v41 }
  0x46   : > { %2616 = vmatmul.mubr.bf16.vlgmr.msra.gmra.mrb[0].mxu1 %v3180_v20 }
  0x47   : > { %2744 = vmatmul.mubr.bf16.vlgmr.msra.gmra.mrb[0].mxu0 %v3379_v44  ;;  %2632 = vmatpush3.bf16.msra.mxu1 %v3040_v40  ;;  %v264_v40 = vld [vmem:[%s3162_s16 + $0xd8] sm:$0xff] }
  0x48   : > { %2760 = vmatpush3.bf16.msra.mxu0 %v3041_v41  ;;  %2633 = vmatprep.subr.bf16.mxu1 %v3042_v15  ;;  %v3069_v41 = vld [vmem:[%s3645_s1 + $0x1f0] sm:$0xff]   ;;  %v3523_v42 = vpack.c.bf16 %v265_v16, %v264_v40 }
  0x49   : > { %2761 = vmatprep.subr.bf16.mxu0 %v3043_v36  ;;  %2619 = vmatprep.mubr.bf16.mxu1 %v3199_v33 }
  0x4a   : > { %2747 = vmatprep.mubr.bf16.mxu0 %v3390_v54 }
  0x4b   : > { %2634 = vmatpush3.bf16.msra.mxu1 %v3042_v15  ;;  %v3071_v15 = vld [vmem:[%s3645_s1 + $0x1f8] sm:$0xff]  }
  0x4c   : > { %2762 = vmatpush3.bf16.msra.mxu0 %v3043_v36  ;;  %2635 = vmatprep.subr.bf16.mxu1 %v3044_v48  ;;  %v3072_v36 = vld [vmem:[%s3645_s1 + $0x200] sm:$0xff]  }
  0x4d   : > { %2763 = vmatprep.subr.bf16.mxu0 %v3045_v52 }
  0x4e   : > { %2620 = vmatmul.mubr.bf16.gmra.mrb[4].mxu1 %v3216_v51 }
  0x4f   : > { %2748 = vmatmul.mubr.bf16.gmra.mrb[4].mxu0 %v3405_v56  ;;  %2636 = vmatpush3.bf16.msra.mxu1 %v3044_v48 }
  0x50   : > { %2764 = vmatpush3.bf16.msra.mxu0 %v3045_v52  ;;  %2637 = vmatprep.subr.bf16.mxu1 %v3046_v0  ;;  %v3078_v52 = vld [vmem:[%s3645_s1 + $0x230] sm:$0xff]  }
  0x51   : > { %2765 = vmatprep.subr.bf16.mxu0 %v3047_v59  ;;  %2623 = vmatprep.mubr.bf16.mxu1 %v3229_v60 }
  0x52   : > { %2751 = vmatprep.mubr.bf16.mxu0 %v3416_v18 }
  0x53   : > { %2638 = vmatpush3.bf16.msra.mxu1 %v3046_v0 }
  0x54   : > { %2766 = vmatpush3.bf16.msra.mxu0 %v3047_v59  ;;  %2639 = vmatprep.subr.bf16.mxu1 %v3048_v62 }
  0x55   : > { %2767 = vmatprep.subr.bf16.mxu0 %v3049_v1 }
  0x56   : > { %2624 = vmatmul.mubr.bf16.gmra.mrb[8].mxu1 %v3252_v17 }
  0x57   : > { %2752 = vmatmul.mubr.bf16.gmra.mrb[8].mxu0 %v3431_v5  ;;  %2640 = vmatpush3.bf16.msra.mxu1 %v3048_v62 }
  0x58   : > { %2768 = vmatpush3.bf16.msra.mxu0 %v3049_v1  ;;  %2641 = vmatprep.subr.bf16.mxu1 %v3050_v34 }
  0x59   : > { %2769 = vmatprep.subr.bf16.mxu0 %v3051_v6  ;;  %2627 = vmatprep.mubr.bf16.mxu1 %v3260_v26 }
  0x5a   : > { %2755 = vmatprep.mubr.bf16.mxu0 %v3442_v49 }
  0x5b   : > { %2642 = vmatpush3.bf16.msra.mxu1 %v3050_v34 }
  0x5c   : > { %2770 = vmatpush3.bf16.msra.mxu0 %v3051_v6  ;;  %2643 = vmatprep.subr.bf16.mxu1 %v3052_v8 }
  0x5d   : > { %2771 = vmatprep.subr.bf16.mxu0 %v3053_v12 }
  0x5e   : > { %2628 = vmatmul.mubr.bf16.gmra.mrb[12].mxu1 %v3286_v45 }
  0x5f   : > { %2756 = vmatmul.mubr.bf16.gmra.mrb[12].mxu0 %v3455_v13  ;;  %2644 = vmatpush3.bf16.msra.mxu1 %v3052_v8 }
  0x60   : > { %2772 = vmatpush3.bf16.msra.mxu0 %v3053_v12  ;;  %2645 = vmatprep.subr.bf16.mxu1 %v3054_v14 }
  0x61   : > { %2773 = vmatprep.subr.bf16.mxu0 %v3055_v3  ;;  %2647 = vmatprep.mubr.bf16.mxu1 %v3365_v39  ;;  %v3068_v39 = vld [vmem:[%s3645_s1 + $0xf0] sm:$0xff]  }
  0x62   : > { %2775 = vmatprep.mubr.bf16.mxu0 %v3199_v33 }
  0x63   : > { %2646 = vmatpush3.bf16.msra.mxu1 %v3054_v14 }
  0x64   : > { %2774 = vmatpush3.bf16.msra.mxu0 %v3055_v3  ;;  %2663 = vmatprep.subr.bf16.mxu1 %v3056_v22 }
  0x65   : > { %2791 = vmatprep.subr.bf16.mxu0 %v3057_v23 }
  0x66   : > { %2648 = vmatmul.mubr.bf16.vlgmr.msra.gmra.mrb[0].mxu1 %v3361_v21  ;;  %v3066_v21 = vld [vmem:[%s3645_s1 + $0xe8] sm:$0xff]  }
  0x67   : > { %2776 = vmatmul.mubr.bf16.vlgmr.msra.gmra.mrb[0].mxu0 %v3216_v51  ;;  %2664 = vmatpush3.bf16.msra.mxu1 %v3056_v22 }
  0x68   : > { %2792 = vmatpush3.bf16.msra.mxu0 %v3057_v23  ;;  %2665 = vmatprep.subr.bf16.mxu1 %v3058_v24 }
  0x69   : > { %2793 = vmatprep.subr.bf16.mxu0 %v3059_v25  ;;  %2651 = vmatprep.mubr.bf16.mxu1 %v3379_v44 }
  0x6a   : > { %2779 = vmatprep.mubr.bf16.mxu0 %v3229_v60 }
  0x6b   : > { %2666 = vmatpush3.bf16.msra.mxu1 %v3058_v24 }
  0x6c   : > { %2794 = vmatpush3.bf16.msra.mxu0 %v3059_v25  ;;  %2667 = vmatprep.subr.bf16.mxu1 %v3060_v28 }
  0x6d   : > { %2795 = vmatprep.subr.bf16.mxu0 %v3061_v29 }
  0x6e   : > { %2652 = vmatmul.mubr.bf16.gmra.mrb[4].mxu1 %v3390_v54 }
  0x6f   : > { %2780 = vmatmul.mubr.bf16.gmra.mrb[4].mxu0 %v3252_v17  ;;  %2668 = vmatpush3.bf16.msra.mxu1 %v3060_v28 }
  0x70   : > { %2796 = vmatpush3.bf16.msra.mxu0 %v3061_v29  ;;  %2669 = vmatprep.subr.bf16.mxu1 %v3062_v31 }
  0x71   : > { %2797 = vmatprep.subr.bf16.mxu0 %v3063_v32  ;;  %2655 = vmatprep.mubr.bf16.mxu1 %v3405_v56 }
  0x72   : > { %2783 = vmatprep.mubr.bf16.mxu0 %v3260_v26 }
  0x73   : > { %2670 = vmatpush3.bf16.msra.mxu1 %v3062_v31 }
  0x74   : > { %2798 = vmatpush3.bf16.msra.mxu0 %v3063_v32  ;;  %2671 = vmatprep.subr.bf16.mxu1 %v3064_v35 }
  0x75   : > { %2799 = vmatprep.subr.bf16.mxu0 %v3065_v37 }
  0x76   : > { %2656 = vmatmul.mubr.bf16.gmra.mrb[8].mxu1 %v3416_v18 }
  0x77   : > { %2784 = vmatmul.mubr.bf16.gmra.mrb[8].mxu0 %v3286_v45  ;;  %2672 = vmatpush3.bf16.msra.mxu1 %v3064_v35 }
  0x78   : > { %2800 = vmatpush3.bf16.msra.mxu0 %v3065_v37  ;;  %2673 = vmatprep.subr.bf16.mxu1 %v3066_v21 }
  0x79   : > { %2801 = vmatprep.subr.bf16.mxu0 %v3067_v38  ;;  %2659 = vmatprep.mubr.bf16.mxu1 %v3431_v5 }
  0x7a   : > { %2787 = vmatprep.mubr.bf16.mxu0 %v3301_v57 }
  0x7b   : > { %2674 = vmatpush3.bf16.msra.mxu1 %v3066_v21 }
  0x7c   : > { %2802 = vmatpush3.bf16.msra.mxu0 %v3067_v38  ;;  %2675 = vmatprep.subr.bf16.mxu1 %v3068_v39 }
  0x7d   : > { %2803 = vmatprep.subr.bf16.mxu0 %v3069_v41 }
  0x7e   : > { %2660 = vmatmul.mubr.bf16.gmra.mrb[12].mxu1 %v3442_v49 }
  0x7f   : > { %2788 = vmatmul.mubr.bf16.gmra.mrb[12].mxu0 %v3523_v42  ;;  %2676 = vmatpush3.bf16.msra.mxu1 %v3068_v39 }
  0x80   : > { %2804 = vmatpush3.bf16.msra.mxu0 %v3069_v41  ;;  %2677 = vmatprep.subr.bf16.mxu1 %v3070_v43 }
  0x81   : > { %2805 = vmatprep.subr.bf16.mxu0 %v3071_v15  ;;  %2679 = vmatprep.mubr.bf16.mxu1 %v3180_v20  ;;  %v3074_v20 = vld [vmem:[%s3645_s1 + $0x210] sm:$0xff]  }
  0x82   : > { %2807 = vmatprep.mubr.bf16.mxu0 %v3248_v11  ;;  %v266_v11 = vld [vmem:[%s3162_s16 + $0xe8] sm:$0x3] }
  0x83   : > { %2678 = vmatpush3.bf16.msra.mxu1 %v3070_v43 }
  0x84   : > { %2806 = vmatpush3.bf16.msra.mxu0 %v3071_v15  ;;  %2855 = vmatprep.subr.bf16.mxu1 %v3072_v36 }
  0x85   : > { %2823 = vmatprep.subr.bf16.mxu0 %v3072_v36 }
  0x86   : > { %2680 = vmatmul.mubr.bf16.vlgmr.msra.gmra.mrb[0].mxu1 %v3199_v33  ;;  %v3075_v33 = vld [vmem:[%s3645_s1 + $0x218] sm:$0xff]  }
  0x87   : > { %2808 = vmatmul.mubr.bf16.vlgmr.msra.gmra.mrb[0].mxu0 %v3264_v27  ;;  %2863 = vmatpush3.bf16.msra.mxu1 %v3072_v36  ;;  %v286_v27 = vpack.c.bf16 %v266_v11, %v266_v11 }
  0x88   : > { %2824 = vmatpush3.bf16.msra.mxu0 %v3072_v36  ;;  %2856 = vmatprep.subr.bf16.mxu1 %v3073_v47 }
  0x89   : > { %2825 = vmatprep.subr.bf16.mxu0 %v3073_v47  ;;  %2683 = vmatprep.mubr.bf16.mxu1 %v3216_v51  ;;  %v3076_v51 = vld [vmem:[%s3645_s1 + $0x220] sm:$0xff]   ;;  %v1681_v50 = vshll.u32 %v286_v27, 16 }
  0x8a   : > { %2811 = vmatprep.mubr.bf16.mxu0 %v3289_v46  ;;  %v1676_v46 = vshll.u32 %v3523_v42, 16 }
  0x8b   : > { %2864 = vmatpush3.bf16.msra.mxu1 %v3073_v47 }
  0x8c   : > { %2826 = vmatpush3.bf16.msra.mxu0 %v3073_v47  ;;  %2857 = vmatprep.subr.bf16.mxu1 %v3074_v20  ;;  %v1678_v48 = vrot.slane %v1676_v46, 1 }
  0x8d   : > { %2827 = vmatprep.subr.bf16.mxu0 %v3074_v20 }
  0x8e   : > { %2684 = vmatmul.mubr.bf16.gmra.mrb[4].mxu1 %v3229_v60  ;;  %v3077_v60 = vld [vmem:[%s3645_s1 + $0x228] sm:$0xff]  }
  0x8f   : > { %2812 = vmatmul.mubr.bf16.gmra.mrb[4].mxu0 %v3306_v58  ;;  %2865 = vmatpush3.bf16.msra.mxu1 %v3074_v20  ;;  %v1674_v58 = vshrl.u32 %v3523_v42, 16 }
  0x90   : > { %2828 = vmatpush3.bf16.msra.mxu0 %v3074_v20  ;;  %2858 = vmatprep.subr.bf16.mxu1 %v3075_v33 }
  0x91   : > { %2829 = vmatprep.subr.bf16.mxu0 %v3075_v33  ;;  %2687 = vmatprep.mubr.bf16.mxu1 %v3252_v17  ;;  %v1679_v17 = vor.u32 %v1678_v48, %v1674_v58 }
  0x92   : > { %2815 = vmatprep.mubr.bf16.mxu0 %v3326_v10  ;;  %v1683_v10 = vrot.slane %v1681_v50, 1 }
  0x93   : > { %2866 = vmatpush3.bf16.msra.mxu1 %v3075_v33 }
  0x94   : > { %2830 = vmatpush3.bf16.msra.mxu0 %v3075_v33  ;;  %2859 = vmatprep.subr.bf16.mxu1 %v3076_v51 }
  0x95   : > { %2831 = vmatprep.subr.bf16.mxu0 %v3076_v51 }
  0x96   : > { %2688 = vmatmul.mubr.bf16.gmra.mrb[8].mxu1 %v3260_v26  ;;  %v1684_v26 = vsel %vm303_vm0, %v1679_v17, %v1683_v10 }
  0x97   : > { %2816 = vmatmul.mubr.bf16.gmra.mrb[8].mxu0 %v3335_v19  ;;  %2867 = vmatpush3.bf16.msra.mxu1 %v3076_v51  ;;  %v3079_v19 = vld [vmem:[%s3645_s1 + $0x238] sm:$0xff]  }
  0x98   : > { %2832 = vmatpush3.bf16.msra.mxu0 %v3076_v51  ;;  %2860 = vmatprep.subr.bf16.mxu1 %v3077_v60 }
  0x99   : > { %2833 = vmatprep.subr.bf16.mxu0 %v3077_v60  ;;  %2691 = vmatprep.mubr.bf16.mxu1 %v3286_v45  ;;  %v1866_v45 = vrot.slane %v3523_v42, 1 }
  0x9a   : > { %2819 = vmatprep.mubr.bf16.mxu0 %v3348_v30 }
  0x9b   : > { %2868 = vmatpush3.bf16.msra.mxu1 %v3077_v60 }
  0x9c   : > { %2834 = vmatpush3.bf16.msra.mxu0 %v3077_v60  ;;  %2861 = vmatprep.subr.bf16.mxu1 %v3078_v52 }
  0x9d   : > { %2835 = vmatprep.subr.bf16.mxu0 %v3078_v52 }
  0x9e   : > { %2692 = vmatmul.mubr.bf16.gmra.mrb[12].mxu1 %v3301_v57  ;;  %v1867_v57 = vrot.slane %v286_v27, 1 }
  0x9f   : > { %2820 = vmatmul.mubr.bf16.gmra.mrb[12].mxu0 %v1684_v26  ;;  %2869 = vmatpush3.bf16.msra.mxu1 %v3078_v52 }
  0xa0   : > { %2836 = vmatpush3.bf16.msra.mxu0 %v3078_v52  ;;  %2862 = vmatprep.subr.bf16.mxu1 %v3079_v19  ;;  %v1868_v30 = vsel %vm731_vm1, %v1866_v45, %v1867_v57 }
  0xa1   : > { %2837 = vmatprep.subr.bf16.mxu0 %v3079_v19  ;;  %2839 = vmatprep.mubr.bf16.mxu0 %v3379_v44 }
  0xa2   : > { %2847 = vmatprep.mubr.bf16.mxu1 %v3431_v5 }
  0xa3   : > { %2870 = vmatpush3.bf16.msra.mxu1 %v3079_v19 }
  0xa4   : > { %2838 = vmatpush3.bf16.msra.mxu0 %v3079_v19 }
  0xa6   : > { %2848 = vmatmul.mubr.bf16.vlgmr.msra.gmra.mrb[16].mxu1 %v3442_v49 }
  0xa7   : > { %2840 = vmatmul.mubr.bf16.vlgmr.msra.gmra.mrb[0].mxu0 %v3390_v54  ;;  %2851 = vmatprep.mubr.bf16.mxu1 %v3455_v13 }
  0xa8   : > { %2843 = vmatprep.mubr.bf16.mxu0 %v3405_v56 }
  0xae   : > { %2852 = vmatmul.mubr.bf16.gmra.mrb[20].mxu1 %v1868_v30 }
  0xaf   : > { %2844 = vmatmul.mubr.bf16.gmra.mrb[4].mxu0 %v3416_v18 }
 0x159   : > { %v2681_v44 = vpop.f32.mrb[0].mxu1 }
 0x15a   : > { %v1041_v53 = vpop.f32.mrb[1].mxu1 }
 0x15b   : > { %v2682_v55 = vpop.f32.mrb[2].mxu1 }
 0x15c   : > { %v1044_v0 = vpop.f32.mrb[3].mxu1 }
 0x161   : > { %v3585_v59 = vpop.f32.mrb[4].mxu1 }
 0x162   : > { %v3587_v61 = vpop.f32.mrb[5].mxu1 }
 0x163   : > { %v3589_v54 = vpop.f32.mrb[6].mxu1 }
 0x164   : > { %v3591_v62 = vpop.f32.mrb[7].mxu1 }
 0x169   : > { %v2689_v63 = vpop.f32.mrb[8].mxu1 }
 0x16a   : > { %v2817_v1 = vpop.f32.mrb[8].mxu0  ;;  %v1073_v56 = vpop.f32.mrb[9].mxu1 }
 0x16b   : > { %v2879_v2 = vadd.f32 %v2817_v1, %v2689_v63  ;;  %v1817_v4 = vpop.f32.mrb[9].mxu0  ;;  %v2690_v5 = vpop.f32.mrb[10].mxu1 }
 0x16c   : > { %v2881_v34 = vadd.f32 %v1817_v4, %v1073_v56  ;;  %v2818_v18 = vpop.f32.mrb[10].mxu0  ;;  %v1076_v6 = vpop.f32.mrb[11].mxu1 }
 0x16d   : > { %v2883_v49 = vadd.f32 %v2818_v18, %v2690_v5  ;;  %v1820_v7 = vpop.f32.mrb[11].mxu0 }
 0x16e   : > { %v2885_v8 = vadd.f32 %v1820_v7, %v1076_v6 }
 0x171   : > { %v2693_v9 = vpop.f32.mrb[12].mxu1 }
 0x172   : > { %v2821_v12 = vpop.f32.mrb[12].mxu0  ;;  %v1089_v13 = vpop.f32.mrb[13].mxu1 }
 0x173   : > { %v2887_v14 = vadd.f32 %v2821_v12, %v2693_v9  ;;  %v1833_v3 = vpop.f32.mrb[13].mxu0  ;;  %v2694_v22 = vpop.f32.mrb[14].mxu1 }
 0x174   : > { %v2889_v23 = vadd.f32 %v1833_v3, %v1089_v13  ;;  %v2822_v24 = vpop.f32.mrb[14].mxu0  ;;  %v1092_v25 = vpop.f32.mrb[15].mxu1 }
 0x175   : > { %v2891_v28 = vadd.f32 %v2822_v24, %v2694_v22  ;;  %v1836_v29 = vpop.f32.mrb[15].mxu0 }
 0x176   : > { %v2893_v31 = vadd.f32 %v1836_v29, %v1092_v25 }
 0x179   : > { %v2849_v32 = vpop.f32.mrb[16].mxu1 }
 0x17a   : > { %v2841_v35 = vpop.f32.mrb[0].mxu0  ;;  %v3599_v37 = vadd.f32 %v2879_v2, %v2849_v32  ;;  %v2001_v21 = vpop.f32.mrb[17].mxu1 }
 0x17b   : > { %v2871_v38 = vadd.f32 %v2841_v35, %v2681_v44  ;;  %v1969_v39 = vpop.f32.mrb[1].mxu0  ;;  %v3601_v40 = vadd.f32 %v2881_v34, %v2001_v21  ;;  %v2850_v16 = vpop.f32.mrb[18].mxu1 }
 0x17c   : > { %2058 = vst [vmem:[%s3597_s23 + $0x50] sm:$0xff] %v3599_v37  ;;  %v2872_v41 = vadd.f32 %v1969_v39, %v1041_v53  ;;  %v2842_v42 = vpop.f32.mrb[2].mxu0  ;;  %v3605_v43 = vadd.f32 %v2883_v49, %v2850_v16  ;;  %v2004_v15 = vpop.f32.mrb[19].mxu1  ;;  %v2095_v24 = vmul.f32 %v3599_v37, %v3599_v37 }
 0x17d   : > { %2050 = vst [vmem:[%s3597_s23 + $0x10] sm:$0xff] %v2871_v38  ;;  %2056 = vst [vmem:[%s3597_s23 + $0x40] sm:$0xff] %v3601_v40  ;;  %v2873_v36 = vadd.f32 %v2842_v42, %v2682_v55  ;;  %v1972_v47 = vpop.f32.mrb[3].mxu0  ;;  %v2886_v20 = vadd.f32 %v2885_v8, %v2004_v15  ;;  %v2087_v60 = vmul.f32 %v2871_v38, %v2871_v38 }
 0x17e   : > { %2048 = vst [vmem:[%s3597_s23] sm:$0xff] %v2872_v41  ;;  %2059 = vst [vmem:[%s3597_s23 + $0x58] sm:$0xff] %v3605_v43  ;;  %v2874_v33 = vadd.f32 %v1972_v47, %v1044_v0  ;;  %v2085_v11 = vmul.f32 %v2872_v41, %v2872_v41  ;;  %v2093_v13 = vmul.f32 %v3601_v40, %v3601_v40 }
 0x17f   : > { %2051 = vst [vmem:[%s3597_s23 + $0x18] sm:$0xff] %v2873_v36  ;;  %2057 = vst [vmem:[%s3597_s23 + $0x48] sm:$0xff] %v2886_v20  ;;  %v2088_v57 = vmul.f32 %v2873_v36, %v2873_v36  ;;  %v2094_v3 = vmul.f32 %v2886_v20, %v2886_v20  ;;  %v2096_v29 = vmul.f32 %v3605_v43, %v3605_v43 }
 0x180   : > { %2049 = vst [vmem:[%s3597_s23 + $0x8] sm:$0xff] %v2874_v33  ;;  %v2064_v51 = vadd.f32 %v2874_v33, %v2872_v41  ;;  %v2086_v27 = vmul.f32 %v2874_v33, %v2874_v33 }
 0x181   : > { %v2853_v46 = vpop.f32.mrb[20].mxu1 }
 0x182   : > { %v2065_v58 = vadd.f32 %v2871_v38, %v2064_v51  ;;  %v2101_v48 = vadd.f32 %v2086_v27, %v2085_v11  ;;  %v2845_v50 = vpop.f32.mrb[4].mxu0  ;;  %v2888_v17 = vadd.f32 %v2887_v14, %v2853_v46  ;;  %v2017_v10 = vpop.f32.mrb[21].mxu1 }
 0x183   : > { %v2875_v52 = vadd.f32 %v2845_v50, %v3585_v59  ;;  %v1985_v26 = vpop.f32.mrb[5].mxu0  ;;  %v2890_v19 = vadd.f32 %v2889_v23, %v2017_v10  ;;  %v2854_v45 = vpop.f32.mrb[22].mxu1 }
 0x184   : > { %v2102_v30 = vadd.f32 %v2101_v48, %v2087_v60  ;;  %2062 = vst [vmem:[%s3597_s23 + $0x70] sm:$0xff] %v2888_v17  ;;  %v2876_v44 = vadd.f32 %v1985_v26, %v3587_v61  ;;  %v2066_v53 = vadd.f32 %v2873_v36, %v2065_v58  ;;  %v2846_v55 = vpop.f32.mrb[6].mxu0  ;;  %v2020_v0 = vpop.f32.mrb[23].mxu1  ;;  %v2892_v63 = vadd.f32 %v2891_v28, %v2854_v45 }
 0x185   : > { %2054 = vst [vmem:[%s3597_s23 + $0x30] sm:$0xff] %v2875_v52  ;;  %2060 = vst [vmem:[%s3597_s23 + $0x60] sm:$0xff] %v2890_v19  ;;  %v2877_v59 = vadd.f32 %v2846_v55, %v3589_v54  ;;  %v1988_v1 = vpop.f32.mrb[7].mxu0  ;;  %v2894_v61 = vadd.f32 %v2893_v31, %v2020_v0  ;;  %v2091_v49 = vmul.f32 %v2875_v52, %v2875_v52 }
 0x186   : > { %2052 = vst [vmem:[%s3597_s23 + $0x20] sm:$0xff] %v2876_v44  ;;  %v2067_v56 = vadd.f32 %v2876_v44, %v2066_v53  ;;  %v2089_v2 = vmul.f32 %v2876_v44, %v2876_v44  ;;  %v2103_v4 = vadd.f32 %v2102_v30, %v2088_v57  ;;  %v2878_v5 = vadd.f32 %v1988_v1, %v3591_v62 }
 0x187   : > { %2055 = vst [vmem:[%s3597_s23 + $0x38] sm:$0xff] %v2877_v59  ;;  %2063 = vst [vmem:[%s3597_s23 + $0x78] sm:$0xff] %v2892_v63  ;;  %v2092_v54 = vmul.f32 %v2877_v59, %v2877_v59  ;;  %v2097_v35 = vmul.f32 %v2890_v19, %v2890_v19  ;;  %v2099_v41 = vmul.f32 %v2888_v17, %v2888_v17 }
 0x188   : > { %v2104_v34 = vadd.f32 %v2103_v4, %v2089_v2  ;;  %2053 = vst [vmem:[%s3597_s23 + $0x28] sm:$0xff] %v2878_v5  ;;  %v2068_v18 = vadd.f32 %v2878_v5, %v2067_v56  ;;  %v2090_v6 = vmul.f32 %v2878_v5, %v2878_v5  ;;  %2061 = vst [vmem:[%s3597_s23 + $0x68] sm:$0xff] %v2894_v61 }
 0x189   : > { %v2100_v36 = vmul.f32 %v2892_v63, %v2892_v63 }
 0x18a   : > { %v2069_v7 = vadd.f32 %v2875_v52, %v2068_v18  ;;  %v2105_v8 = vadd.f32 %v2104_v34, %v2090_v6 }
 0x18c   : > { %v2070_v9 = vadd.f32 %v2877_v59, %v2069_v7  ;;  %v2106_v12 = vadd.f32 %v2105_v8, %v2091_v49 }
 0x18e   : > { %v2071_v14 = vadd.f32 %v3601_v40, %v2070_v9  ;;  %v2107_v62 = vadd.f32 %v2106_v12, %v2092_v54  ;;  %v2098_v40 = vmul.f32 %v2894_v61, %v2894_v61 }
 0x190   : > { %v2108_v22 = vadd.f32 %v2107_v62, %v2093_v13  ;;  %v2072_v23 = vadd.f32 %v2886_v20, %v2071_v14 }
 0x192   : > { %v2073_v25 = vadd.f32 %v3599_v37, %v2072_v23  ;;  %v2109_v28 = vadd.f32 %v2108_v22, %v2094_v3 }
 0x194   : > { %v2074_v31 = vadd.f32 %v3605_v43, %v2073_v25  ;;  %v2110_v32 = vadd.f32 %v2109_v28, %v2095_v24 }
 0x196   : > { %v2075_v21 = vadd.f32 %v2890_v19, %v2074_v31  ;;  %v2111_v38 = vadd.f32 %v2110_v32, %v2096_v29 }
 0x198   : > { %v2076_v39 = vadd.f32 %v2894_v61, %v2075_v21  ;;  %v2112_v16 = vadd.f32 %v2111_v38, %v2097_v35 }
 0x19a   : > { %v2077_v42 = vadd.f32 %v2888_v17, %v2076_v39  ;;  %v2113_v15 = vadd.f32 %v2112_v16, %v2098_v40 }
 0x19c   : > { %v2078_v47 = vadd.f32 %v2892_v63, %v2077_v42  ;;  %v2114_v37 = vadd.f32 %v2113_v15, %v2099_v41 }
 0x19e   : > { %v2079_v20 = vrot.slane %v2078_v47, 4  ;;  %v2115_v33 = vadd.f32 %v2114_v37, %v2100_v36 }
 0x1a0   : > { %v2080_v11 = vadd.f32 %v2079_v20, %v2078_v47  ;;  %v2116_v51 = vrot.slane %v2115_v33, 4 }
 0x1a2   : > { %v2081_v27 = vrot.slane %v2080_v11, 2  ;;  %v2117_v43 = vadd.f32 %v2116_v51, %v2115_v33 }
 0x1a4   : > { %v2082_v46 = vadd.f32 %v2081_v27, %v2080_v11  ;;  %v2118_v60 = vrot.slane %v2117_v43, 2 }
 0x1a6   : > { %v2083_v58 = vrot.slane %v2082_v46, 1  ;;  %v2119_v48 = vadd.f32 %v2118_v60, %v2117_v43 }
 0x1a8   : > { %v2120_v50 = vrot.slane %v2119_v48, 1  ;;  %v2084_v17 = vadd.f32 %v2083_v58, %v2082_v46 }
 0x1aa   : > { %v2121_v10 = vadd.f32 %v2120_v50, %v2119_v48 }
 0x1ac   : > { %v2123_v52 = vsel %vm2122_vm2, %v2084_v17, %v2121_v10 }
 0x1ad   : > { %2124 = vst [vmem:[%s235_s27] sm:$0x3] %v2123_v52 }
 0x1ae PF: > { %s16_s18 = sadd.s32 1, %s3086_s18  }
 0x1af   : > { %p13_p4 = scmp.ge.s32.totalorder %s16_s18, 6  }
 0x1b1   :  { %15 = sbr.rel (!%p13_p4) target bundleno = 1 (0x1), region = 86 }

// kernel: conv_block_forward.5
= control target key start
LH: loop header
LB: loop body
LE: loop exit
PB: predicated region body
PF: predicated region fallthrough
CT: control target
= control target key end

     0   :  { %s1897_s12 = smov 0   ;;  %s2141_s0 = inlined_call_operand.vmem [shape: f32[2,16,16,128], index: 0, kind: input, shape index: {}]   ;;  %s2142_s1 = inlined_call_operand.vmem [shape: f32[1,128], index: 1, kind: input, shape index: {}]   ;;  %s2143_s2 = inlined_call_operand.vmem [shape: f32[1,128], index: 2, kind: input, shape index: {}]   ;;  %s2144_s3 = inlined_call_operand.vmem [shape: f32[2,8,8,128], index: 3, kind: output, shape index: {}]  }
   0x1 LB: > { %s1561_s13 = sadd.s32 4294967295, %s1872_s12   ;;  %p1565_p0 = scmp.ge.s32.totalorder %s1872_s12, 1  ;;  %s1872_s12 = sphi %s1897_s12, %s13_s12  }
   0x2   : > { %p137_p1 = scmp.lt.s32.totalorder %s1872_s12, 3 }
   0x4   : > { %p138_p2 = pnand %p1565_p0, %p137_p1 }
   0x5   : > { %p161_p3 = scmp.lt.s32.totalorder (!%p138_p2), %s1561_s13, 1  ;;  %v173_v0 = vlaneseq (!%p138_p2)  ;;  %v1874_v1 = vmov (!%p138_p2), 0.0|0.0   ;;  %vm1875_vm0 = vmmov (!%p138_p2), 0   ;;  %v1876_v2 = vmov (!%p138_p2), 0.0   ;;  %v1919_v4 = vld [vmem:[%s2142_s1] ss:$0 sm:$0xff] (!%p138_p2) }
   0x6   : > { %141 = sbr.rel (%p138_p2) target bundleno = 292 (0x124), region = 32  ;;  %1791 = vmatprep.subr.bf16.mxu0 (!%p138_p2), %v1874_v1  ;;  %1797 = vmatprep.subr.bf16.mxu1 (!%p138_p2), %v1874_v1  ;;  %v1932_v7 = vld [vmem:[%s2143_s2] ss:$0 sm:$0xff] (!%p138_p2)  ;;  %vm216_vm2 = vcmask (!%p138_p2), 130048  }
   0x7   : > { %1683 = vmatprep.mubr.msk.f32.mxu0 (!%p138_p2), %vm1875_vm0, %v1876_v2  ;;  %1697 = vmatprep.mubr.msk.f32.mxu1 (!%p138_p2), %vm1875_vm0, %v1876_v2  ;;  %v1913_v3 = vshrl.u32 (!%p138_p2), %v173_v0, 7  ;;  %v1921_v5 = vand.u32 (!%p138_p2), 127, %v173_v0 }
   0x9   : > { %v177_v6 = vmul.u32 (!%p138_p2), 2, %v1913_v3 }
   0xb   : > { %v181_v11 = vadd.s32 (!%p138_p2), 1, %v177_v6  ;;  %vm2011_vm3 = vcmp.eq.s32.totalorder (!%p138_p2), %v1921_v5, %v177_v6 }
   0xd   : > { %s2148_s13 = smov (!%p161_p3, %s1561_s13), 1  ;;  %vm182_vm1 = vcmp.eq.s32.totalorder %v1921_v5, %v181_v11 }
   0xe   : > { %s1629_s14 = sshll.u32 %s2148_s13, 8  ;;  %v1969_v46 = vsel %vm182_vm1, 1.0, %v1876_v2  ;;  %s1630_s22 = sshll.u32 %s2148_s13, 6 }
   0xf   : > { %s1927_s19 = scalar_lea.vmem %s2141_s0, %s1629_s14  ;;  %s2128_s25 = scalar_lea.vmem %s2144_s3, %s1630_s22 }
  0x10   : > { %v185_v8 = vld [vmem:[%s1927_s19] sm:$0xff]  ;;  %v186_v9 = vld [vmem:[%s1927_s19 + $0x8] sm:$0xff]  ;;  %v1574_v10 = vld [vmem:[%s1927_s19 + $0x10] sm:$0xff] }
  0x11   : > { %v193_v12 = vmul.f32 %v1919_v4, %v185_v8  ;;  %v194_v13 = vmul.f32 %v1919_v4, %v186_v9  ;;  %v1575_v14 = vld [vmem:[%s1927_s19 + $0x18] sm:$0xff]  ;;  %v208_v15 = vmul.f32 %v1574_v10, %v1919_v4  ;;  %v1578_v16 = vld [vmem:[%s1927_s19 + $0x20] sm:$0xff]  ;;  %v1579_v17 = vld [vmem:[%s1927_s19 + $0x28] sm:$0xff] }
  0x12   : > { %v209_v18 = vmul.f32 %v1575_v14, %v1919_v4  ;;  %v368_v19 = vmul.f32 %v1578_v16, %v1919_v4  ;;  %v369_v20 = vmul.f32 %v1579_v17, %v1919_v4  ;;  %v1580_v21 = vld [vmem:[%s1927_s19 + $0x30] sm:$0xff]  ;;  %v1581_v22 = vld [vmem:[%s1927_s19 + $0x38] sm:$0xff]  ;;  %v1585_v31 = vld [vmem:[%s1927_s19 + $0x40] sm:$0xff] }
  0x13   : > { %v201_v23 = vadd.f32 %v1932_v7, %v193_v12  ;;  %v202_v24 = vadd.f32 %v1932_v7, %v194_v13  ;;  %v210_v25 = vadd.f32 %v1932_v7, %v208_v15  ;;  %v377_v26 = vmul.f32 %v1580_v21, %v1919_v4  ;;  %v1586_v36 = vld [vmem:[%s1927_s19 + $0x48] sm:$0xff]  ;;  %v1587_v37 = vld [vmem:[%s1927_s19 + $0x50] sm:$0xff]  ;;  %v1588_v42 = vld [vmem:[%s1927_s19 + $0x58] sm:$0xff] }
  0x14   : > { %v211_v27 = vadd.f32 %v1932_v7, %v209_v18  ;;  %v370_v28 = vadd.f32 %v1932_v7, %v368_v19  ;;  %v371_v29 = vadd.f32 %v1932_v7, %v369_v20  ;;  %v378_v30 = vmul.f32 %v1581_v22, %v1919_v4  ;;  %v1592_v43 = vld [vmem:[%s1927_s19 + $0x60] sm:$0xff]  ;;  %v1593_v52 = vld [vmem:[%s1927_s19 + $0x68] sm:$0xff]  ;;  %v1594_v57 = vld [vmem:[%s1927_s19 + $0x70] sm:$0xff] }
  0x15   : > { %v203_v32 = vmax.f32 %v201_v23, 0.0  ;;  %v204_v33 = vmax.f32 %v202_v24, 0.0  ;;  %v212_v34 = vmax.f32 %v210_v25, 0.0  ;;  %v379_v35 = vadd.f32 %v1932_v7, %v377_v26  ;;  %v1595_v62 = vld [vmem:[%s1927_s19 + $0x78] sm:$0xff]  ;;  %v1599_v10 = vld [vmem:[%s1927_s19 + $0x80] sm:$0xff]  ;;  %v1600_v11 = vld [vmem:[%s1927_s19 + $0x88] sm:$0xff] }
  0x16   : > { %v213_v38 = vmax.f32 %v211_v27, 0.0  ;;  %v372_v39 = vmax.f32 %v370_v28, 0.0  ;;  %v373_v40 = vmax.f32 %v371_v29, 0.0  ;;  %v380_v41 = vadd.f32 %v1932_v7, %v378_v30  ;;  %v1601_v16 = vld [vmem:[%s1927_s19 + $0x90] sm:$0xff]  ;;  %v1602_v20 = vld [vmem:[%s1927_s19 + $0x98] sm:$0xff]  ;;  %v1606_v25 = vld [vmem:[%s1927_s19 + $0xa0] sm:$0xff] }
  0x17   : > { %v214_v44 = vadd.f32 %v212_v34, %v203_v32  ;;  %v381_v45 = vmax.f32 %v379_v35, 0.0  ;;  %v531_v47 = vmul.f32 %v1585_v31, %v1919_v4  ;;  %v532_v50 = vmul.f32 %v1586_v36, %v1919_v4 }
  0x18   : > { %v215_v48 = vadd.f32 %v213_v38, %v204_v33  ;;  %v382_v49 = vmax.f32 %v380_v41, 0.0  ;;  %v540_v51 = vmul.f32 %v1587_v37, %v1919_v4  ;;  %v541_v55 = vmul.f32 %v1588_v42, %v1919_v4  ;;  %v1607_v33 = vld [vmem:[%s1927_s19 + $0xa8] sm:$0xff]  ;;  %v1608_v37 = vld [vmem:[%s1927_s19 + $0xb0] sm:$0xff]  ;;  %v1609_v38 = vld [vmem:[%s1927_s19 + $0xb8] sm:$0xff] }
  0x19   : > { %v383_v53 = vadd.f32 %v381_v45, %v372_v39  ;;  %v533_v54 = vadd.f32 %v1932_v7, %v531_v47  ;;  %v694_v56 = vmul.f32 %v1592_v43, %v1919_v4  ;;  %v534_v60 = vadd.f32 %v1932_v7, %v532_v50 }
  0x1a   : > { %v1792_v58 = vpack.c.bf16 %v215_v48, %v214_v44  ;;  %v384_v59 = vadd.f32 %v382_v49, %v373_v40  ;;  %v542_v61 = vadd.f32 %v1932_v7, %v540_v51  ;;  %v543_v0 = vadd.f32 %v1932_v7, %v541_v55 }
  0x1b   : > { %v535_v63 = vmax.f32 %v533_v54, 0.0  ;;  %v695_v8 = vmul.f32 %v1593_v52, %v1919_v4  ;;  %v696_v9 = vadd.f32 %v1932_v7, %v694_v56  ;;  %v536_v13 = vmax.f32 %v534_v60, 0.0 }
  0x1c   : > { %1793 = vmatpush3.bf16.msra.mxu0 %v1792_v58  ;;  %v1798_v12 = vpack.c.bf16 %v384_v59, %v383_v53  ;;  %v544_v14 = vmax.f32 %v542_v61, 0.0  ;;  %v703_v15 = vmul.f32 %v1594_v57, %v1919_v4  ;;  %v545_v17 = vmax.f32 %v543_v0, 0.0  ;;  %v1613_v57 = vld [vmem:[%s1927_s19 + $0xc0] sm:$0xff]  ;;  %v1616_v0 = vld [vmem:[%s1927_s19 + $0xd8] sm:$0xff] }
  0x1d   : > { %1794 = vmatprep.subr.bf16.mxu0 %v1874_v1  ;;  %v697_v18 = vadd.f32 %v1932_v7, %v695_v8  ;;  %v704_v19 = vmul.f32 %v1595_v62, %v1919_v4  ;;  %v698_v21 = vmax.f32 %v696_v9, 0.0  ;;  %v857_v23 = vmul.f32 %v1599_v10, %v1919_v4  ;;  %v1620_v8 = vld [vmem:[%s1927_s19 + $0xe0] sm:$0xff] }
  0x1e   : > { %1799 = vmatpush3.bf16.msra.mxu1 %v1798_v12  ;;  %v705_v22 = vadd.f32 %v1932_v7, %v703_v15  ;;  %v858_v24 = vmul.f32 %v1600_v11, %v1919_v4  ;;  %v866_v28 = vmul.f32 %v1601_v16, %v1919_v4  ;;  %v546_v29 = vadd.f32 %v544_v14, %v535_v63  ;;  %v1615_v63 = vld [vmem:[%s1927_s19 + $0xd0] sm:$0xff]  ;;  %v1623_v14 = vld [vmem:[%s1927_s19 + $0xf8] sm:$0xff] }
  0x1f   : > { %1684 = vmatmul.mubr.msk.f32.vlgmr.msra.gmra.mrb[0].mxu0 %vm216_vm2, %v1969_v46  ;;  %1800 = vmatprep.subr.bf16.mxu1 %v1874_v1  ;;  %v699_v26 = vmax.f32 %v697_v18, 0.0  ;;  %v706_v27 = vadd.f32 %v1932_v7, %v704_v19  ;;  %v547_v30 = vadd.f32 %v545_v17, %v536_v13  ;;  %v867_v32 = vmul.f32 %v1602_v20, %v1919_v4  ;;  %v1622_v13 = vld [vmem:[%s1927_s19 + $0xf0] sm:$0xff] }
  0x20   : > { %1796 = vmatpush3.bf16.msra.mxu0 %v1792_v58  ;;  %1690 = vmatprep.mubr.msk.f32.mxu0 %vm1875_vm0, %v1876_v2  ;;  %v707_v31 = vmax.f32 %v705_v22, 0.0  ;;  %v1020_v36 = vmul.f32 %v1606_v25, %v1919_v4  ;;  %v859_v40 = vadd.f32 %v1932_v7, %v857_v23  ;;  %v860_v3 = vadd.f32 %v1932_v7, %v858_v24  ;;  %v1614_v58 = vld [vmem:[%s1927_s19 + $0xc8] sm:$0xff] }
  0x21   : > { %1698 = vmatmul.mubr.msk.f32.vlgmr.msra.gmra.mrb[0].mxu1 %vm216_vm2, %v1969_v46  ;;  %1803 = vmatprep.subr.bf16.mxu0 %v1874_v1  ;;  %v708_v35 = vmax.f32 %v706_v27, 0.0  ;;  %v868_v6 = vadd.f32 %v1932_v7, %v866_v28  ;;  %v869_v41 = vadd.f32 %v1932_v7, %v867_v32  ;;  %v1021_v42 = vmul.f32 %v1607_v33, %v1919_v4 }
  0x22   : > { %1802 = vmatpush3.bf16.msra.mxu1 %v1798_v12  ;;  %1704 = vmatprep.mubr.msk.f32.mxu1 %vm1875_vm0, %v1876_v2  ;;  %v709_v39 = vadd.f32 %v707_v31, %v698_v21  ;;  %v2030_v43 = vsel %vm2011_vm3, 1.0, %v1876_v2  ;;  %v1804_v44 = vpack.c.bf16 %v547_v30, %v546_v29  ;;  %v1029_v45 = vmul.f32 %v1608_v37, %v1919_v4  ;;  %v1621_v12 = vld [vmem:[%s1927_s19 + $0xe8] sm:$0xff] }
  0x23   : > { %1809 = vmatprep.subr.bf16.mxu1 %v1874_v1  ;;  %v710_v5 = vadd.f32 %v708_v35, %v699_v26  ;;  %v1030_v47 = vmul.f32 %v1609_v38, %v1919_v4  ;;  %v1022_v48 = vadd.f32 %v1932_v7, %v1020_v36  ;;  %v1023_v49 = vadd.f32 %v1932_v7, %v1021_v42 }
  0x24   : > { %v1031_v51 = vadd.f32 %v1932_v7, %v1029_v45  ;;  %v861_v53 = vmax.f32 %v859_v40, 0.0  ;;  %v862_v54 = vmax.f32 %v860_v3, 0.0  ;;  %v870_v55 = vmax.f32 %v868_v6, 0.0 }
  0x25   : > { %v1810_v50 = vpack.c.bf16 %v710_v5, %v709_v39  ;;  %v1032_v52 = vadd.f32 %v1932_v7, %v1030_v47  ;;  %v871_v56 = vmax.f32 %v869_v41, 0.0  ;;  %v1024_v59 = vmax.f32 %v1022_v48, 0.0 }
  0x26   : > { %v1025_v60 = vmax.f32 %v1023_v49, 0.0  ;;  %v1033_v61 = vmax.f32 %v1031_v51, 0.0  ;;  %v872_v9 = vadd.f32 %v870_v55, %v861_v53  ;;  %v1183_v11 = vmul.f32 %v1613_v57, %v1919_v4 }
  0x27   : > { %1691 = vmatmul.mubr.msk.f32.vlgmr.msra.gmra.mrb[0].mxu0 %vm216_vm2, %v2030_v43  ;;  %v1034_v62 = vmax.f32 %v1032_v52, 0.0  ;;  %v873_v10 = vadd.f32 %v871_v56, %v862_v54  ;;  %v1184_v15 = vmul.f32 %v1614_v58, %v1919_v4  ;;  %v1192_v16 = vmul.f32 %v1615_v63, %v1919_v4 }
  0x28   : > { %1805 = vmatpush3.bf16.msra.mxu0 %v1804_v44  ;;  %1711 = vmatprep.mubr.msk.f32.mxu0 %vm1875_vm0, %v1876_v2  ;;  %v1193_v17 = vmul.f32 %v1616_v0, %v1919_v4  ;;  %v1035_v18 = vadd.f32 %v1033_v61, %v1024_v59  ;;  %v1346_v20 = vmul.f32 %v1620_v8, %v1919_v4 }
  0x29   : > { %1705 = vmatmul.mubr.msk.f32.vlgmr.msra.gmra.mrb[0].mxu1 %vm216_vm2, %v2030_v43  ;;  %1806 = vmatprep.subr.bf16.mxu0 %v1874_v1  ;;  %v1036_v19 = vadd.f32 %v1034_v62, %v1025_v60  ;;  %v1347_v21 = vmul.f32 %v1621_v12, %v1919_v4  ;;  %v1355_v22 = vmul.f32 %v1622_v13, %v1919_v4 }
  0x2a   : > { %1811 = vmatpush3.bf16.msra.mxu1 %v1810_v50  ;;  %1725 = vmatprep.mubr.msk.f32.mxu1 %vm1875_vm0, %v1876_v2  ;;  %v1356_v23 = vmul.f32 %v1623_v14, %v1919_v4  ;;  %v1185_v24 = vadd.f32 %v1932_v7, %v1183_v11  ;;  %v1816_v25 = vpack.c.bf16 %v873_v10, %v872_v9 }
  0x2b   : > { %1712 = vmatmul.mubr.msk.f32.vlgmr.msra.gmra.mrb[2].mxu0 %vm216_vm2, %v1969_v46  ;;  %1812 = vmatprep.subr.bf16.mxu1 %v1874_v1  ;;  %v1186_v26 = vadd.f32 %v1932_v7, %v1184_v15  ;;  %v1194_v27 = vadd.f32 %v1932_v7, %v1192_v16  ;;  %v1195_v28 = vadd.f32 %v1932_v7, %v1193_v17 }
  0x2c   : > { %1808 = vmatpush3.bf16.msra.mxu0 %v1804_v44  ;;  %1718 = vmatprep.mubr.msk.f32.mxu0 %vm1875_vm0, %v1876_v2  ;;  %v1348_v29 = vadd.f32 %v1932_v7, %v1346_v20  ;;  %v1822_v30 = vpack.c.bf16 %v1036_v19, %v1035_v18  ;;  %v1349_v31 = vadd.f32 %v1932_v7, %v1347_v21  ;;  %v1187_v33 = vmax.f32 %v1185_v24, 0.0 }
  0x2d   : > { %1726 = vmatmul.mubr.msk.f32.vlgmr.msra.gmra.mrb[2].mxu1 %vm216_vm2, %v1969_v46  ;;  %1815 = vmatprep.subr.bf16.mxu0 %v1874_v1  ;;  %v1357_v32 = vadd.f32 %v1932_v7, %v1355_v22  ;;  %v1358_v4 = vadd.f32 %v1932_v7, %v1356_v23  ;;  %v1188_v34 = vmax.f32 %v1186_v26, 0.0  ;;  %v1196_v35 = vmax.f32 %v1194_v27, 0.0 }
  0x2e   : > { %1814 = vmatpush3.bf16.msra.mxu1 %v1810_v50  ;;  %1732 = vmatprep.mubr.msk.f32.mxu1 %vm1875_vm0, %v1876_v2  ;;  %v1197_v36 = vmax.f32 %v1195_v28, 0.0  ;;  %v1350_v7 = vmax.f32 %v1348_v29, 0.0  ;;  %v1351_v37 = vmax.f32 %v1349_v31, 0.0 }
  0x2f   : > { %1821 = vmatprep.subr.bf16.mxu1 %v1874_v1  ;;  %v1359_v38 = vmax.f32 %v1357_v32, 0.0  ;;  %v1360_v39 = vmax.f32 %v1358_v4, 0.0  ;;  %v1198_v40 = vadd.f32 %v1196_v35, %v1187_v33 }
  0x30   : > { %v1199_v3 = vadd.f32 %v1197_v36, %v1188_v34 }
  0x31   : > { %v1361_v5 = vadd.f32 %v1359_v38, %v1350_v7  ;;  %v1362_v6 = vadd.f32 %v1360_v39, %v1351_v37 }
  0x32   : > { %v1828_v41 = vpack.c.bf16 %v1199_v3, %v1198_v40 }
  0x33   : > { %1719 = vmatmul.mubr.msk.f32.vlgmr.msra.gmra.mrb[2].mxu0 %vm216_vm2, %v2030_v43  ;;  %v1834_v42 = vpack.c.bf16 %v1362_v6, %v1361_v5 }
  0x34   : > { %1817 = vmatpush3.bf16.msra.mxu0 %v1816_v25  ;;  %1739 = vmatprep.mubr.msk.f32.mxu0 %vm1875_vm0, %v1876_v2 }
  0x35   : > { %1733 = vmatmul.mubr.msk.f32.vlgmr.msra.gmra.mrb[2].mxu1 %vm216_vm2, %v2030_v43  ;;  %1818 = vmatprep.subr.bf16.mxu0 %v1874_v1 }
  0x36   : > { %1823 = vmatpush3.bf16.msra.mxu1 %v1822_v30  ;;  %1753 = vmatprep.mubr.msk.f32.mxu1 %vm1875_vm0, %v1876_v2 }
  0x37   : > { %1740 = vmatmul.mubr.msk.f32.vlgmr.msra.gmra.mrb[4].mxu0 %vm216_vm2, %v1969_v46  ;;  %1824 = vmatprep.subr.bf16.mxu1 %v1874_v1 }
  0x38   : > { %1820 = vmatpush3.bf16.msra.mxu0 %v1816_v25  ;;  %1746 = vmatprep.mubr.msk.f32.mxu0 %vm1875_vm0, %v1876_v2 }
  0x39   : > { %1754 = vmatmul.mubr.msk.f32.vlgmr.msra.gmra.mrb[4].mxu1 %vm216_vm2, %v1969_v46  ;;  %1827 = vmatprep.subr.bf16.mxu0 %v1874_v1 }
  0x3a   : > { %1826 = vmatpush3.bf16.msra.mxu1 %v1822_v30  ;;  %1760 = vmatprep.mubr.msk.f32.mxu1 %vm1875_vm0, %v1876_v2 }
  0x3b   : > { %1833 = vmatprep.subr.bf16.mxu1 %v1874_v1 }
  0x3f   : > { %1747 = vmatmul.mubr.msk.f32.vlgmr.msra.gmra.mrb[4].mxu0 %vm216_vm2, %v2030_v43 }
  0x40   : > { %1829 = vmatpush3.bf16.msra.mxu0 %v1828_v41  ;;  %1767 = vmatprep.mubr.msk.f32.mxu0 %vm1875_vm0, %v1876_v2 }
  0x41   : > { %1761 = vmatmul.mubr.msk.f32.vlgmr.msra.gmra.mrb[4].mxu1 %vm216_vm2, %v2030_v43  ;;  %1830 = vmatprep.subr.bf16.mxu0 %v1874_v1 }
  0x42   : > { %1835 = vmatpush3.bf16.msra.mxu1 %v1834_v42  ;;  %1781 = vmatprep.mubr.msk.f32.mxu1 %vm1875_vm0, %v1876_v2 }
  0x43   : > { %1768 = vmatmul.mubr.msk.f32.vlgmr.msra.gmra.mrb[6].mxu0 %vm216_vm2, %v1969_v46  ;;  %1836 = vmatprep.subr.bf16.mxu1 %v1874_v1 }
  0x44   : > { %1832 = vmatpush3.bf16.msra.mxu0 %v1828_v41  ;;  %1774 = vmatprep.mubr.msk.f32.mxu0 %vm1875_vm0, %v1876_v2 }
  0x45   : > { %1782 = vmatmul.mubr.msk.f32.vlgmr.msra.gmra.mrb[6].mxu1 %vm216_vm2, %v1969_v46 }
  0x46   : > { %1838 = vmatpush3.bf16.msra.mxu1 %v1834_v42  ;;  %1788 = vmatprep.mubr.msk.f32.mxu1 %vm1875_vm0, %v1876_v2 }
  0x4b   : > { %1775 = vmatmul.mubr.msk.f32.vlgmr.msra.gmra.mrb[6].mxu0 %vm216_vm2, %v2030_v43 }
  0x4d   : > { %1789 = vmatmul.mubr.msk.f32.vlgmr.msra.gmra.mrb[6].mxu1 %vm216_vm2, %v2030_v43 }
  0xfa   : > { %v359_v1 = vpop.f32.mrb[0].mxu0 }
  0xfb   : > { %v363_v46 = vmul.f32 0.25, %v359_v1  ;;  %v1692_v44 = vpop.f32.mrb[1].mxu0 }
  0xfc   : > { %v521_v2 = vpop.f32.mrb[0].mxu1 }
  0xfd   : > { %364 = vst [vmem:[%s2128_s25] sm:$0xff] %v363_v46  ;;  %v525_v45 = vmul.f32 0.25, %v521_v2  ;;  %v1706_v47 = vpop.f32.mrb[1].mxu1 }
  0xff   : > { %1584 = vst [vmem:[%s2128_s25 + $0x8] sm:$0xff] %v525_v45 }
 0x106   : > { %v684_v43 = vpop.f32.mrb[2].mxu0 }
 0x107   : > { %v688_v48 = vmul.f32 0.25, %v684_v43  ;;  %v1720_v49 = vpop.f32.mrb[3].mxu0 }
 0x108   : > { %v847_v50 = vpop.f32.mrb[2].mxu1 }
 0x109   : > { %1591 = vst [vmem:[%s2128_s25 + $0x10] sm:$0xff] %v688_v48  ;;  %v851_v51 = vmul.f32 0.25, %v847_v50  ;;  %v1734_v52 = vpop.f32.mrb[3].mxu1 }
 0x10b   : > { %1598 = vst [vmem:[%s2128_s25 + $0x18] sm:$0xff] %v851_v51 }
 0x112   : > { %v1010_v53 = vpop.f32.mrb[4].mxu0 }
 0x113   : > { %v1014_v54 = vmul.f32 0.25, %v1010_v53  ;;  %v1748_v55 = vpop.f32.mrb[5].mxu0 }
 0x114   : > { %v1173_v56 = vpop.f32.mrb[4].mxu1 }
 0x115   : > { %1605 = vst [vmem:[%s2128_s25 + $0x20] sm:$0xff] %v1014_v54  ;;  %v1177_v57 = vmul.f32 0.25, %v1173_v56  ;;  %v1762_v58 = vpop.f32.mrb[5].mxu1 }
 0x117   : > { %1612 = vst [vmem:[%s2128_s25 + $0x28] sm:$0xff] %v1177_v57 }
 0x11e   : > { %v1336_v59 = vpop.f32.mrb[6].mxu0 }
 0x11f   : > { %v1340_v60 = vmul.f32 0.25, %v1336_v59  ;;  %v1776_v61 = vpop.f32.mrb[7].mxu0 }
 0x120   : > { %v1499_v62 = vpop.f32.mrb[6].mxu1 }
 0x121   : > { %1619 = vst [vmem:[%s2128_s25 + $0x30] sm:$0xff] %v1340_v60  ;;  %v1503_v63 = vmul.f32 0.25, %v1499_v62  ;;  %v1790_v0 = vpop.f32.mrb[7].mxu1 }
 0x123   : > { %1626 = vst [vmem:[%s2128_s25 + $0x38] sm:$0xff] %v1503_v63 }
 0x124 PF: > { %s13_s12 = sadd.s32 1, %s1872_s12  }
 0x125   : > { %p10_p4 = scmp.ge.s32.totalorder %s13_s12, 4  }
 0x127   :  { %12 = sbr.rel (!%p10_p4) target bundleno = 1 (0x1), region = 84 }

// kernel: conv_block_forward.4
= control target key start
LH: loop header
LB: loop body
LE: loop exit
PB: predicated region body
PF: predicated region fallthrough
CT: control target
= control target key end

     0   :  { %s3515_s18 = smov 0   ;;  %s4629_s0 = inlined_call_operand.vmem [shape: f32[4,10,18,128], index: 0, kind: input, shape index: {}]   ;;  %s4630_s1 = inlined_call_operand.vmem [shape: bf16[3,3,128,128], index: 1, kind: input, shape index: {}]   ;;  %s4631_s2 = inlined_call_operand.vmem [shape: f32[1,128], index: 2, kind: input, shape index: {}]   ;;  %s4632_s3 = inlined_call_operand.vmem [shape: f32[1,128], index: 3, kind: input, shape index: {}]   ;;  %s4633_s4 = inlined_call_operand.vmem [shape: f32[4,8,16,128], index: 4, kind: output, shape index: {0}]   ;;  %s4634_s5 = inlined_call_operand.vmem [shape: f32[4,2,128], index: 5, kind: output, shape index: {1}]  }
   0x1 LB: > { %s2528_s19 = sadd.s32 4294967295, %s3483_s18   ;;  %p2532_p0 = scmp.ge.s32.totalorder %s3483_s18, 1  ;;  %s3483_s18 = sphi %s3515_s18, %s16_s18  }
   0x2   : > { %p190_p1 = scmp.lt.s32.totalorder %s3483_s18, 5 }
   0x4   : > { %p191_p2 = pnand %p2532_p0, %p190_p1 }
   0x6   : > { %194 = sbr.rel (%p191_p2) target bundleno = 456 (0x1c8), region = 36 }
   0xd   : > { %v3403_v0 = vld [vmem:[%s4630_s1 + $0x40] sm:$0xff]   ;;  %p222_p3 = scmp.lt.s32.totalorder %s2528_s19, 3  ;;  %p371_p4 = scmp.lt.s32.totalorder %s2528_s19, 0  ;;  %v3405_v2 = vld [vmem:[%s4630_s1 + $0x48] sm:$0xff]   ;;  %v3407_v4 = vld [vmem:[%s4630_s1 + $0x50] sm:$0xff]   ;;  %v394_v6 = vlaneseq }
   0xe   : > { %v3404_v1 = vld [vmem:[%s4630_s1 + $0x100] sm:$0xff]   ;;  %2962 = vmatprep.subr.bf16.mxu1 %v3403_v0  ;;  %v3406_v3 = vld [vmem:[%s4630_s1 + $0x108] sm:$0xff]   ;;  %s372_s29 = ssub.s32 0, %s2528_s19  ;;  %v3408_v5 = vld [vmem:[%s4630_s1 + $0x110] sm:$0xff]   ;;  %vm4650_vm10 = vsmask.f32 7424 }
   0xf   : > { %s3532_s26 = scalar_select %p222_p3, %s2528_s19, 3  ;;  %3090 = vmatprep.subr.bf16.mxu0 %v3404_v1  ;;  %2963 = vmatpush3.bf16.msra.mxu1 %v3403_v0  ;;  %v3409_v7 = vld [vmem:[%s4630_s1 + $0x58] sm:$0xff]   ;;  %v3551_v9 = vshrl.u32 %v394_v6, 7  ;;  %v3411_v10 = vld [vmem:[%s4630_s1 + $0x60] sm:$0xff]   ;;  %v3413_v13 = vld [vmem:[%s4630_s1 + $0x68] sm:$0xff]  }
  0x10   : > { %3091 = vmatpush3.bf16.msra.mxu0 %v3404_v1  ;;  %2964 = vmatprep.subr.bf16.mxu1 %v3405_v2  ;;  %s2539_s7 = smin.u32 %s2528_s19, %s372_s29  ;;  %v3410_v8 = vld [vmem:[%s4630_s1 + $0x118] sm:$0xff]   ;;  %v3412_v11 = vld [vmem:[%s4630_s1 + $0x120] sm:$0xff]   ;;  %v3414_v15 = vld [vmem:[%s4630_s1 + $0x128] sm:$0xff]  }
  0x11   : > { %3092 = vmatprep.subr.bf16.mxu0 %v3406_v3  ;;  %s374_s10 = sand.u32 1, %s2539_s7   ;;  %s3394_s16 = smul.u32 240, %s3532_s26  ;;  %v3565_v12 = vadd.s32 16, %v3551_v9  ;;  %vm4657_vm1 = vcmp.ge.s32.totalorder %v3551_v9, 1  ;;  %v3585_v20 = vld [vmem:[%s4631_s2] ss:$0 sm:$0xff] }
  0x12   : > { %s375_s11 = ssub.s32 0, %s374_s10  ;;  %v3590_v21 = vld [vmem:[%s4632_s3] ss:$0 sm:$0xff]  ;;  %v3415_v23 = vld [vmem:[%s4630_s1 + $0x70] sm:$0xff]   ;;  %v3417_v46 = vld [vmem:[%s4630_s1 + $0x78] sm:$0xff]   ;;  %s2536_s6 = sshll.u32 %s3532_s26, 1 }
  0x13   : > { %2965 = vmatpush3.bf16.msra.mxu1 %v3405_v2  ;;  %s4790_s11 = smov (!%p371_p4, %s375_s11), %s374_s10  ;;  %s3562_s25 = scalar_lea.vmem %s4629_s0, %s3394_s16  ;;  %4671 = vst [vmem:[#allocation2_spill] sm:$0xff] %v3565_v12  ;;  %vm4642_vm4 = vcmp.le.s32.totalorder %v3565_v12, 16  ;;  %v3416_v33 = vld [vmem:[%s4630_s1 + $0x130] sm:$0xff]   ;;  %v3418_v57 = vld [vmem:[%s4630_s1 + $0x138] sm:$0xff]  }
  0x14   : > { %3093 = vmatpush3.bf16.msra.mxu0 %v3406_v3  ;;  %2966 = vmatprep.subr.bf16.mxu1 %v3407_v4  ;;  %p2541_p5 = scmp.lt.s32.totalorder %s4790_s11, 0  ;;  %s381_s17 = sadd.s32 2, %s4790_s11  ;;  %v237_v16 = vld [vmem:[%s3562_s25] sm:$0xff]  ;;  %v238_v17 = vld [vmem:[%s3562_s25 + $0x8] sm:$0xff]  ;;  %v239_v18 = vld [vmem:[%s3562_s25 + $0x10] sm:$0x3] }
  0x15   : > { %3094 = vmatprep.subr.bf16.mxu0 %v3408_v5  ;;  %v274_v24 = vmul.f32 %v3585_v20, %v237_v16  ;;  %v275_v25 = vmul.f32 %v3585_v20, %v238_v17  ;;  %v276_v26 = vmul.f32 %v3585_v20, %v239_v18  ;;  %v240_v27 = vld [vmem:[%s3562_s25 + $0x18] sm:$0xff]  ;;  %v241_v28 = vld [vmem:[%s3562_s25 + $0x20] sm:$0xff]  ;;  %v242_v30 = vld [vmem:[%s3562_s25 + $0x28] sm:$0x3]  ;;  %s235_s9 = scalar_lea.vmem %s4634_s5, %s2536_s6 }
  0x16   : > { %s4792_s17 = smov (!%p2541_p5, %s381_s17), %s4790_s11  ;;  %v277_v31 = vmul.f32 %v3585_v20, %v240_v27  ;;  %v278_v32 = vmul.f32 %v3585_v20, %v241_v28  ;;  %v279_v40 = vmul.f32 %v3585_v20, %v242_v30  ;;  %v243_v43 = vld [vmem:[%s3562_s25 + $0x30] sm:$0xff]  ;;  %v244_v44 = vld [vmem:[%s3562_s25 + $0x38] sm:$0xff]  ;;  %v245_v51 = vld [vmem:[%s3562_s25 + $0x40] sm:$0x3] }
  0x17   : > { %2967 = vmatpush3.bf16.msra.mxu1 %v3407_v4  ;;  %s2542_s27 = sshll.u32 %s4792_s17, 3  ;;  %v3620_v34 = vadd.f32 %v3590_v21, %v274_v24  ;;  %v3623_v35 = vadd.f32 %v3590_v21, %v275_v25  ;;  %v313_v36 = vadd.f32 %v3590_v21, %v276_v26  ;;  %v280_v52 = vmul.f32 %v3585_v20, %v243_v43  ;;  %v3709_v4 = vld [vmem:[%s4630_s1] sm:$0xff]   ;;  %v248_v24 = vld [vmem:[%s3562_s25 + $0x58] sm:$0x3]  ;;  %v266_v50 = vld [vmem:[%s3562_s25 + $0xe8] sm:$0x3] }
  0x18   : > { %3095 = vmatpush3.bf16.msra.mxu0 %v3408_v5  ;;  %2968 = vmatprep.subr.bf16.mxu1 %v3409_v7  ;;  %v3570_v14 = vstv %s2542_s27  ;;  %v3643_v41 = vadd.f32 %v3590_v21, %v277_v31  ;;  %v3646_v42 = vadd.f32 %v3590_v21, %v278_v32  ;;  %v316_v53 = vadd.f32 %v3590_v21, %v279_v40  ;;  %v3466_v37 = vld [vmem:[%s4630_s1 + $0x1f8] sm:$0xff]   ;;  %s2817_s27 = sshll.u32 %s3532_s26, 7 }
  0x19   : > { %3096 = vmatprep.subr.bf16.mxu0 %v3410_v8  ;;  %4672 = vst [vmem:[#allocation3_spill] sm:$0xff] %v3570_v14  ;;  %vm398_vm0 = vcmp.ge.s32.totalorder %v3570_v14, 1  ;;  %vm408_vm2 = vcmp.le.s32.totalorder %v3570_v14, 16  ;;  %v385_v19 = vadd.s32 1, %v3570_v14  ;;  %v3631_v38 = vadd.s32 2, %v3570_v14  ;;  %s4570_s30 = scalar_lea.vmem %s4633_s4, %s2817_s27 }
  0x1a   : > { %vm3592_vm3 = vmand %vm398_vm0, %vm408_vm2  ;;  %v3651_v45 = vadd.s32 3, %v3570_v14  ;;  %v4646_v47 = vmax.f32 %v3620_v34, 0.0  ;;  %v4644_v48 = vmax.f32 %v3623_v35, 0.0  ;;  %v343_v49 = vmax.f32 %v313_v36, 0.0 }
  0x1b   : > { %2969 = vmatpush3.bf16.msra.mxu1 %v3409_v7  ;;  %vm399_vm5 = vcmp.ge.s32.totalorder %v385_v19, 1  ;;  %vm3609_vm6 = vmand %vm3592_vm3, %vm4657_vm1  ;;  %vm409_vm7 = vcmp.le.s32.totalorder %v385_v19, 16  ;;  %v4643_v54 = vmax.f32 %v3643_v41, 0.0  ;;  %v4641_v55 = vmax.f32 %v3646_v42, 0.0 }
  0x1c   : > { %3097 = vmatpush3.bf16.msra.mxu0 %v3410_v8  ;;  %2970 = vmatprep.subr.bf16.mxu1 %v3411_v10  ;;  %vm3626_vm8 = vmand %vm399_vm5, %vm409_vm7  ;;  %v281_v56 = vmul.f32 %v3585_v20, %v244_v44  ;;  %v554_v58 = vsel %vm3609_vm6, %v4646_v47, 0.0  ;;  %v555_v59 = vsel %vm3592_vm3, %v4644_v48, 0.0  ;;  %v282_v62 = vmul.f32 %v3585_v20, %v245_v51 }
  0x1d   : > { %3098 = vmatprep.subr.bf16.mxu0 %v3412_v11  ;;  %vm3637_vm9 = vmand %vm3592_vm3, %vm4642_vm4  ;;  %v3694_v63 = vpack.c.bf16 %v555_v59, %v554_v58  ;;  %v346_v1 = vmax.f32 %v316_v53, 0.0  ;;  %v558_v3 = vsel %vm3626_vm8, %v4641_v55, 0.0  ;;  %v3712_v5 = vadd.f32 %v3590_v21, %v280_v52  ;;  %v249_v52 = vld [vmem:[%s3562_s25 + $0x60] sm:$0xff]  ;;  %v250_v59 = vld [vmem:[%s3562_s25 + $0x68] sm:$0xff] }
  0x1e   : > { %vm3662_vm11 = vmand %vm3626_vm8, %vm4657_vm1  ;;  %v556_v60 = vsel %vm3637_vm9, %v343_v49, 0.0  ;;  %v3715_v6 = vadd.f32 %v3590_v21, %v281_v56  ;;  %vm400_vm13 = vcmp.ge.s32.totalorder %v3631_v38, 1  ;;  %v319_v18 = vadd.f32 %v3590_v21, %v282_v62 }
  0x1f   : > { %2971 = vmatpush3.bf16.msra.mxu1 %v3411_v10  ;;  %vm3689_vm12 = vmand %vm3626_vm8, %vm4642_vm4  ;;  %v3696_v0 = vpack.c.bf16 %v556_v60, %v556_v60  ;;  %v557_v2 = vsel %vm3662_vm11, %v4643_v54, 0.0  ;;  %v622_v7 = vshrl.u32 %v3694_v63, 16  ;;  %v624_v8 = vshll.u32 %v3694_v63, 16  ;;  %v259_v54 = vld [vmem:[%s3562_s25 + $0xb0] sm:$0xff] }
  0x20   : > { %3099 = vmatpush3.bf16.msra.mxu0 %v3412_v11  ;;  %2972 = vmatprep.subr.bf16.mxu1 %v3413_v13  ;;  %v559_v11 = vsel %vm3689_vm12, %v346_v1, 0.0  ;;  %v3729_v16 = vpack.c.bf16 %v558_v3, %v557_v2  ;;  %v4640_v19 = vmax.f32 %v3712_v5, 0.0  ;;  %v4639_v27 = vmax.f32 %v3715_v6, 0.0  ;;  %v251_v2 = vld [vmem:[%s3562_s25 + $0x70] sm:$0x3] }
  0x21   : > { %3100 = vmatprep.subr.bf16.mxu0 %v3414_v15  ;;  %v629_v10 = vshll.u32 %v3696_v0, 16  ;;  %v3731_v17 = vpack.c.bf16 %v559_v11, %v559_v11  ;;  %v626_v25 = vrot.slane %v624_v8, 1  ;;  %vm410_vm14 = vcmp.le.s32.totalorder %v3631_v38, 16  ;;  %v3421_v8 = vld [vmem:[%s4630_s1 + $0x8] sm:$0xff]   ;;  %v252_v11 = vld [vmem:[%s3562_s25 + $0x78] sm:$0xff] }
  0x22   : > { %v634_v28 = vshrl.u32 %v3729_v16, 16  ;;  %v636_v30 = vshll.u32 %v3729_v16, 16  ;;  %v349_v32 = vmax.f32 %v319_v18, 0.0  ;;  %vm3744_vm15 = vmand %vm400_vm13, %vm410_vm14  ;;  %v285_v51 = vmul.f32 %v3585_v20, %v248_v24 }
  0x23   : > { %2973 = vmatpush3.bf16.msra.mxu1 %v3413_v13  ;;  %v3726_v13 = vld [vmem:[%s4630_s1 + $0x140] sm:$0xff]   ;;  %v631_v26 = vrot.slane %v629_v10, 1  ;;  %v641_v31 = vshll.u32 %v3731_v17, 16  ;;  %v627_v36 = vor.u32 %v626_v25, %v622_v7  ;;  %vm3752_vm0 = vmand %vm3744_vm15, %vm4657_vm1  ;;  %v561_v40 = vsel %vm3744_vm15, %v4639_v27, 0.0 }
  0x24   : > { %3101 = vmatpush3.bf16.msra.mxu0 %v3414_v15  ;;  %2974 = vmatprep.subr.bf16.mxu1 %v3415_v23  ;;  %v246_v15 = vld [vmem:[%s3562_s25 + $0x48] sm:$0xff]  ;;  %v638_v44 = vrot.slane %v636_v30, 1  ;;  %vm472_vm2 = vmand %vm3744_vm15, %vm4642_vm4  ;;  %v560_v49 = vsel %vm3752_vm0, %v4640_v19, 0.0  ;;  %v322_v1 = vadd.f32 %v3590_v21, %v285_v51  ;;  %vm401_vm5 = vcmp.ge.s32.totalorder %v3651_v45, 1 }
  0x25   : > { %3102 = vmatprep.subr.bf16.mxu0 %v3416_v33  ;;  %v283_v38 = vmul.f32 %v3585_v20, %v246_v15  ;;  %v632_v53 = vsel %vm4650_vm10, %v627_v36, %v631_v26  ;;  %v562_v56 = vsel %vm472_vm2, %v349_v32, 0.0  ;;  %vm411_vm7 = vcmp.le.s32.totalorder %v3651_v45, 16 }
  0x26   : > { %2978 = vmatprep.mubr.bf16.mxu1 %v632_v53  ;;  %v639_v60 = vor.u32 %v638_v44, %v634_v28  ;;  %v3781_v61 = vpack.c.bf16 %v562_v56, %v562_v56  ;;  %v352_v24 = vmax.f32 %v322_v1, 0.0  ;;  %v286_v26 = vmul.f32 %v3585_v20, %v249_v52  ;;  %vm3808_vm9 = vmand %vm401_vm5, %vm411_vm7  ;;  %v3423_v53 = vld [vmem:[%s4630_s1 + $0x10] sm:$0xff]  }
  0x27   : > { %2975 = vmatpush3.bf16.msra.mxu1 %v3415_v23  ;;  %v247_v23 = vld [vmem:[%s3562_s25 + $0x50] sm:$0xff]  ;;  %v3778_v58 = vadd.f32 %v3590_v21, %v283_v38  ;;  %v287_v28 = vmul.f32 %v3585_v20, %v250_v59  ;;  %v288_v36 = vmul.f32 %v3585_v20, %v251_v2  ;;  %v253_v38 = vld [vmem:[%s3562_s25 + $0x80] sm:$0xff]  ;;  %v289_v44 = vmul.f32 %v3585_v20, %v252_v11  ;;  %vm3821_vm12 = vmand %vm3808_vm9, %vm4657_vm1 }
  0x28   : > { %3103 = vmatpush3.bf16.msra.mxu0 %v3416_v33  ;;  %2976 = vmatprep.subr.bf16.mxu1 %v3417_v46  ;;  %v284_v43 = vmul.f32 %v3585_v20, %v247_v23  ;;  %v653_v18 = vshll.u32 %v3781_v61, 16  ;;  %vm475_vm13 = vmand %vm3808_vm9, %vm4642_vm4  ;;  %v1053_v29 = vrot.slane %v3731_v17, 1  ;;  %v1056_v39 = vrot.slane %v3781_v61, 1 }
  0x29   : > { %3104 = vmatprep.subr.bf16.mxu0 %v3418_v57  ;;  %v4638_v10 = vmax.f32 %v3778_v58, 0.0  ;;  %v3833_v51 = vadd.f32 %v3590_v21, %v287_v28  ;;  %v325_v56 = vadd.f32 %v3590_v21, %v288_v36 }
  0x2a   : > { %v3784_v62 = vadd.f32 %v3590_v21, %v284_v43  ;;  %v655_v30 = vrot.slane %v653_v18, 1  ;;  %v254_v43 = vld [vmem:[%s3562_s25 + $0x88] sm:$0x3] }
  0x2b   : > { %2977 = vmatpush3.bf16.msra.mxu1 %v3417_v46  ;;  %v643_v46 = vrot.slane %v641_v31, 1  ;;  %v3422_v31 = vld [vmem:[%s4630_s1 + $0x148] sm:$0xff]   ;;  %v563_v52 = vsel %vm3821_vm12, %v4638_v10, 0.0  ;;  %v4635_v11 = vmax.f32 %v3833_v51, 0.0  ;;  %v291_v28 = vmul.f32 %v3585_v20, %v254_v43 }
  0x2c   : > { %3105 = vmatpush3.bf16.msra.mxu0 %v3418_v57  ;;  %2994 = vmatprep.subr.bf16.mxu1 %v3709_v4  ;;  %v3774_v57 = vpack.c.bf16 %v561_v40, %v560_v49  ;;  %v4637_v23 = vmax.f32 %v3784_v62, 0.0  ;;  %v388_v40 = vadd.s32 4, %v3570_v14  ;;  %v3830_v49 = vadd.f32 %v3590_v21, %v286_v26 }
  0x2d   : > { %3122 = vmatprep.subr.bf16.mxu0 %v3726_v13  ;;  %v644_v15 = vsel %vm4650_vm10, %v639_v60, %v643_v46  ;;  %v565_v60 = vsel %vm475_vm13, %v352_v24, 0.0  ;;  %v290_v24 = vmul.f32 %v3585_v20, %v253_v38  ;;  %v3424_v38 = vld [vmem:[%s4630_s1 + $0x150] sm:$0xff]  }
  0x2e   : > { %v646_v3 = vshrl.u32 %v3774_v57, 16  ;;  %v648_v7 = vshll.u32 %v3774_v57, 16  ;;  %3106 = vmatprep.mubr.bf16.mxu0 %v644_v15  ;;  %2979 = vmatmul.mubr.bf16.vlgmr.msra.gmra.mrb[0].mxu1 %v644_v15  ;;  %vm402_vm14 = vcmp.ge.s32.totalorder %v388_v40, 1  ;;  %vm412_vm2 = vcmp.le.s32.totalorder %v388_v40, 16 }
  0x2f   : > { %2995 = vmatpush3.bf16.msra.mxu1 %v3709_v4  ;;  %v564_v4 = vsel %vm3808_vm9, %v4637_v23, 0.0  ;;  %v4636_v2 = vmax.f32 %v3830_v49, 0.0  ;;  %vm3853_vm5 = vmand %vm402_vm14, %vm412_vm2  ;;  %v355_v15 = vmax.f32 %v325_v56, 0.0  ;;  %v3902_v56 = vadd.f32 %v3590_v21, %v290_v24  ;;  %v255_v24 = vld [vmem:[%s3562_s25 + $0x90] sm:$0xff]  ;;  %v258_v23 = vld [vmem:[%s3562_s25 + $0xa8] sm:$0xff] }
  0x30   : > { %v650_v25 = vrot.slane %v648_v7, 1  ;;  %2996 = vmatprep.subr.bf16.mxu1 %v3421_v8  ;;  %v3850_v1 = vpack.c.bf16 %v564_v4, %v563_v52  ;;  %v3858_v7 = vpack.c.bf16 %v565_v60, %v565_v60  ;;  %vm3865_vm7 = vmand %vm3853_vm5, %vm4657_vm1  ;;  %v567_v36 = vsel %vm3853_vm5, %v4635_v11, 0.0 }
  0x31   : > { %vm478_vm13 = vmand %vm3853_vm5, %vm4642_vm4  ;;  %v566_v26 = vsel %vm3865_vm7, %v4636_v2, 0.0  ;;  %4699 = vst [vmem:[#allocation6_spill] sm:$0xff] %v3902_v56  ;;  %v328_v11 = vadd.f32 %v3590_v21, %v291_v28  ;;  %v257_v28 = vld [vmem:[%s3562_s25 + $0xa0] sm:$0x3]  ;;  %v4645_v10 = vmax.f32 %v3902_v56, 0.0  ;;  %v292_v55 = vmul.f32 %v3585_v20, %v255_v24 }
  0x32   : > { %v651_v46 = vor.u32 %v650_v25, %v646_v3  ;;  %v660_v25 = vshll.u32 %v3850_v1, 16  ;;  %v568_v40 = vsel %vm478_vm13, %v355_v15, 0.0  ;;  %v3897_v4 = vpack.c.bf16 %v567_v36, %v566_v26  ;;  %v3426_v15 = vld [vmem:[%s4630_s1 + $0x158] sm:$0xff]   ;;  %v3427_v26 = vld [vmem:[%s4630_s1 + $0x20] sm:$0xff]  }
  0x33   : > { %2997 = vmatpush3.bf16.msra.mxu1 %v3421_v8  ;;  %v658_v8 = vshrl.u32 %v3850_v1, 16  ;;  %v3899_v52 = vpack.c.bf16 %v568_v40, %v568_v40  ;;  %v256_v36 = vld [vmem:[%s3562_s25 + $0x98] sm:$0xff]  ;;  %v358_v27 = vmax.f32 %v328_v11, 0.0  ;;  %v4704_v11 = vmov 0 }
  0x34   : > { %v3848_v59 = vsel %vm4650_vm10, %v651_v46, %v655_v30  ;;  %v665_v30 = vshll.u32 %v3858_v7, 16  ;;  %2998 = vmatprep.subr.bf16.mxu1 %v3423_v53  ;;  %v3895_v46 = vadd.f32 %v3590_v21, %v289_v44  ;;  %v662_v43 = vrot.slane %v660_v25, 1 }
  0x35   : > { %4693 = vst [vmem:[#allocation4_spill] sm:$0xff] %v3848_v59  ;;  %3107 = vmatmul.mubr.bf16.vlgmr.msra.gmra.mrb[0].mxu0 %v3848_v59  ;;  %2982 = vmatprep.mubr.bf16.mxu1 %v3848_v59  ;;  %v389_v25 = vadd.s32 5, %v3570_v14  ;;  %v672_v40 = vshll.u32 %v3897_v4, 16  ;;  %v677_v2 = vshll.u32 %v3899_v52, 16  ;;  %v390_v24 = vadd.s32 6, %v3570_v14 }
  0x36   : > { %3123 = vmatpush3.bf16.msra.mxu0 %v3726_v13  ;;  %v3425_v13 = vld [vmem:[%s4630_s1 + $0x18] sm:$0xff]   ;;  %4698 = vst [vmem:[#allocation5_spill] sm:$0xff] %v3895_v46  ;;  %v667_v60 = vrot.slane %v665_v30, 1  ;;  %v4649_v44 = vmax.f32 %v3895_v46, 0.0  ;;  %v663_v30 = vor.u32 %v662_v43, %v658_v8  ;;  %v4701_v43 = vmov 0 }
  0x37   : > { %3124 = vmatprep.subr.bf16.mxu0 %v3422_v31  ;;  %2999 = vmatpush3.bf16.msra.mxu1 %v3423_v53  ;;  %v670_v53 = vshrl.u32 %v3897_v4, 16  ;;  %vm403_vm14 = vcmp.ge.s32.totalorder %v389_v25, 1  ;;  %vm413_vm2 = vcmp.le.s32.totalorder %v389_v25, 16  ;;  %v679_v8 = vrot.slane %v677_v2, 1 }
  0x38   : > { %3000 = vmatprep.subr.bf16.mxu1 %v3425_v13  ;;  %v3922_v19 = vsel %vm4650_vm10, %v663_v30, %v667_v60  ;;  %vm3924_vm13 = vmand %vm403_vm14, %vm413_vm2  ;;  %v293_v60 = vmul.f32 %v3585_v20, %v256_v36  ;;  %v294_v25 = vmul.f32 %v3585_v20, %v257_v28  ;;  %v3428_v30 = vld [vmem:[%s4630_s1 + $0x160] sm:$0xff]   ;;  %vm4706_vm14 = vcmp.le.s32.totalorder %v3565_v12, 16 }
  0x39   : > { %4700 = vst [vmem:[#allocation7_spill] sm:$0xff] %v3922_v19  ;;  %v4702_v43 = vsel %vm3924_vm13, 4294967295, %v4701_v43  ;;  %3110 = vmatprep.mubr.bf16.mxu0 %v3922_v19  ;;  %2983 = vmatmul.mubr.bf16.gmra.mrb[4].mxu1 %v3922_v19  ;;  %vm3935_vm4 = vmand %vm3924_vm13, %vm4657_vm1  ;;  %v570_v2 = vsel %vm3924_vm13, %v4645_v10, 0.0  ;;  %v3962_v28 = vadd.f32 %v3590_v21, %v292_v55  ;;  %v260_v10 = vld [vmem:[%s3562_s25 + $0xb8] sm:$0x3]  ;;  %v295_v47 = vmul.f32 %v3585_v20, %v258_v23  ;;  %v261_v19 = vld [vmem:[%s3562_s25 + $0xc0] sm:$0xff] }
  0x3a   : > { %3125 = vmatpush3.bf16.msra.mxu0 %v3422_v31  ;;  %v674_v31 = vrot.slane %v672_v40, 1  ;;  %4703 = vst [vmem:[#allocation8_spill] sm:$0xff] %v4702_v43  ;;  %v4705_v11 = vsel %vm3935_vm4, 4294967295, %v4704_v11  ;;  %v3429_v40 = vld [vmem:[%s4630_s1 + $0x28] sm:$0xff]   ;;  %vm481_vm2 = vmand %vm3924_vm13, %vm4706_vm14  ;;  %v569_v36 = vsel %vm3935_vm4, %v4649_v44, 0.0  ;;  %vm404_vm14 = vcmp.ge.s32.totalorder %v390_v24, 1 }
  0x3b   : > { %3126 = vmatprep.subr.bf16.mxu0 %v3424_v38  ;;  %3001 = vmatpush3.bf16.msra.mxu1 %v3425_v13  ;;  %4707 = vst [vmem:[#allocation9_spill] sm:$0xff] %v3962_v28  ;;  %v3969_v13 = vadd.f32 %v3590_v21, %v293_v60  ;;  %v262_v55 = vld [vmem:[%s3562_s25 + $0xc8] sm:$0xff]  ;;  %v4717_v46 = vmax.f32 %v3962_v28, 0.0  ;;  %v1055_v33 = vrot.slane %v3774_v57, 1  ;;  %v4749_v45 = vmax.f32 %v3830_v49, 0.0  ;;  %v3440_v49 = vld [vmem:[%s4630_s1 + $0x190] sm:$0xff]  }
  0x3c   : > { %v675_v48 = vor.u32 %v674_v31, %v670_v53  ;;  %v571_v53 = vsel %vm481_vm2, %v358_v27, 0.0  ;;  %3002 = vmatprep.subr.bf16.mxu1 %v3427_v26  ;;  %v331_v31 = vadd.f32 %v3590_v21, %v294_v25  ;;  %vm414_vm2 = vcmp.le.s32.totalorder %v390_v24, 16 }
  0x3d   : > { %4708 = vst [vmem:[#allocation10_spill] sm:$0xff] %v3969_v13  ;;  %v3976_v44 = vpack.c.bf16 %v571_v53, %v571_v53  ;;  %v297_v53 = vmul.f32 %v3585_v20, %v260_v10  ;;  %v4715_v10 = vmax.f32 %v3969_v13, 0.0  ;;  %v1062_v3 = vrot.slane %v3899_v52, 1 }
  0x3e   : > { %3127 = vmatpush3.bf16.msra.mxu0 %v3424_v38  ;;  %v3966_v38 = vpack.c.bf16 %v570_v2, %v569_v36  ;;  %v3974_v59 = vsel %vm4650_vm10, %v675_v48, %v679_v8  ;;  %v361_v60 = vmax.f32 %v331_v31, 0.0  ;;  %v3430_v48 = vld [vmem:[%s4630_s1 + $0x168] sm:$0xff]   ;;  %v3431_v8 = vld [vmem:[%s4630_s1 + $0x30] sm:$0xff]   ;;  %v296_v36 = vmul.f32 %v3585_v20, %v259_v54  ;;  %vm3995_vm10 = vmand %vm404_vm14, %vm414_vm2 }
  0x3f   : > { %3128 = vmatprep.subr.bf16.mxu0 %v3426_v15  ;;  %4709 = vst [vmem:[#allocation11_spill] sm:$0xff] %v3974_v59  ;;  %3111 = vmatmul.mubr.bf16.gmra.mrb[4].mxu0 %v3974_v59  ;;  %v689_v25 = vshll.u32 %v3976_v44, 16  ;;  %v4710_v2 = vmov 0  ;;  %vm4008_vm13 = vmand %vm3995_vm10, %vm4657_vm1  ;;  %v4713_v54 = vmov 0  ;;  %v573_v24 = vsel %vm3995_vm10, %v4715_v10, 0.0 }
  0x40   : > { %2986 = vmatprep.mubr.bf16.mxu1 %v3974_v59  ;;  %v682_v27 = vshrl.u32 %v3966_v38, 16  ;;  %v684_v23 = vshll.u32 %v3966_v38, 16  ;;  %3003 = vmatpush3.bf16.msra.mxu1 %v3427_v26  ;;  %v4711_v2 = vsel %vm3995_vm10, 4294967295, %v4710_v2  ;;  %v391_v59 = vadd.s32 7, %v3570_v14 }
  0x41   : > { %4712 = vst [vmem:[#allocation12_spill] sm:$0xff] %v4711_v2  ;;  %3004 = vmatprep.subr.bf16.mxu1 %v3429_v40  ;;  %v298_v26 = vmul.f32 %v3585_v20, %v261_v19  ;;  %v691_v56 = vrot.slane %v689_v25, 1  ;;  %v4714_v54 = vsel %vm4008_vm13, 4294967295, %v4713_v54  ;;  %v263_v19 = vld [vmem:[%s3562_s25 + $0xd0] sm:$0x3]  ;;  %vm4716_vm14 = vcmp.le.s32.totalorder %v3565_v12, 16 }
  0x42   : > { %3129 = vmatpush3.bf16.msra.mxu0 %v3426_v15  ;;  %v686_v31 = vrot.slane %v684_v23, 1  ;;  %v4000_v15 = vadd.f32 %v3590_v21, %v295_v47  ;;  %v4017_v47 = vadd.f32 %v3590_v21, %v296_v36  ;;  %v334_v23 = vadd.f32 %v3590_v21, %v297_v53  ;;  %vm484_vm2 = vmand %vm3995_vm10, %vm4716_vm14 }
  0x43   : > { %3130 = vmatprep.subr.bf16.mxu0 %v3428_v30  ;;  %v572_v13 = vsel %vm4008_vm13, %v4717_v46, 0.0  ;;  %vm405_vm1 = vcmp.ge.s32.totalorder %v391_v59, 1  ;;  %v574_v10 = vsel %vm484_vm2, %v361_v60, 0.0  ;;  %vm4718_vm14 = vsmask.f32 7424 }
  0x44   : > { %v687_v25 = vor.u32 %v686_v31, %v682_v27  ;;  %v4665_v43 = vmax.f32 %v4000_v15, 0.0  ;;  %v4030_v36 = vpack.c.bf16 %v573_v24, %v572_v13  ;;  %3005 = vmatpush3.bf16.msra.mxu1 %v3429_v40  ;;  %v4662_v27 = vmax.f32 %v4017_v47, 0.0  ;;  %v3432_v31 = vld [vmem:[%s4630_s1 + $0x170] sm:$0xff]  }
  0x45   : > { %v364_v53 = vmax.f32 %v334_v23, 0.0  ;;  %v4039_v2 = vpack.c.bf16 %v574_v10, %v574_v10  ;;  %vm415_vm10 = vcmp.le.s32.totalorder %v391_v59, 16  ;;  %3006 = vmatprep.subr.bf16.mxu1 %v3431_v8  ;;  %v299_v46 = vmul.f32 %v3585_v20, %v262_v55 }
  0x46   : > { %3131 = vmatpush3.bf16.msra.mxu0 %v3428_v30  ;;  %v4037_v28 = vsel %vm4718_vm14, %v687_v25, %v691_v56  ;;  %v3433_v30 = vld [vmem:[%s4630_s1 + $0x38] sm:$0xff]   ;;  %v694_v40 = vshrl.u32 %v4030_v36, 16  ;;  %v696_v56 = vshll.u32 %v4030_v36, 16  ;;  %vm4050_vm2 = vmand %vm405_vm1, %vm415_vm10  ;;  %v4720_v13 = vmov 0 }
  0x47   : > { %4719 = vst [vmem:[#allocation13_spill] sm:$0xff] %v4037_v28  ;;  %3132 = vmatprep.subr.bf16.mxu0 %v3430_v48  ;;  %3114 = vmatprep.mubr.bf16.mxu0 %v4037_v28  ;;  %v4721_v13 = vsel %vm4050_vm2, 4294967295, %v4720_v13  ;;  %v300_v60 = vmul.f32 %v3585_v20, %v263_v19  ;;  %v4056_v55 = vadd.f32 %v3590_v21, %v298_v26  ;;  %v701_v24 = vshll.u32 %v4039_v2, 16 }
  0x48   : > { %2987 = vmatmul.mubr.bf16.gmra.mrb[8].mxu1 %v4037_v28  ;;  %vm4722_vm14 = vcmp.ge.s32.totalorder %v3551_v9, 1  ;;  %v4723_v23 = vmov 0  ;;  %v576_v59 = vsel %vm4050_vm2, %v4662_v27, 0.0  ;;  %v4072_v20 = vadd.f32 %v3590_v21, %v299_v46  ;;  %v3434_v46 = vld [vmem:[%s4630_s1 + $0x178] sm:$0xff]  }
  0x49   : > { %vm4063_vm13 = vmand %vm4050_vm2, %vm4722_vm14  ;;  %v392_v26 = vadd.s32 8, %v3570_v14  ;;  %v698_v19 = vrot.slane %v696_v56, 1  ;;  %vm4725_vm1 = vcmp.le.s32.totalorder %v3565_v12, 16  ;;  %v337_v10 = vadd.f32 %v3590_v21, %v300_v60  ;;  %3007 = vmatpush3.bf16.msra.mxu1 %v3431_v8  ;;  %v4093_v14 = vld [vmem:[%s4630_s1 + $0x80] sm:$0xff]  }
  0x4a   : > { %v4724_v23 = vsel %vm4063_vm13, 4294967295, %v4723_v23  ;;  %3133 = vmatpush3.bf16.msra.mxu0 %v3430_v48  ;;  %vm487_vm10 = vmand %vm4050_vm2, %vm4725_vm1  ;;  %v575_v25 = vsel %vm4063_vm13, %v4665_v43, 0.0  ;;  %v703_v27 = vrot.slane %v701_v24, 1  ;;  %v366_v28 = vmax.f32 %v4072_v20, 0.0  ;;  %3008 = vmatprep.subr.bf16.mxu1 %v3433_v30 }
  0x4b   : > { %v577_v56 = vsel %vm487_vm10, %v364_v53, 0.0  ;;  %v4087_v48 = vpack.c.bf16 %v576_v59, %v575_v25  ;;  %3134 = vmatprep.subr.bf16.mxu0 %v3432_v31  ;;  %v699_v43 = vor.u32 %v698_v19, %v694_v40  ;;  %v365_v8 = vmax.f32 %v4056_v55, 0.0 }
  0x4c   : > { %v4095_v21 = vpack.c.bf16 %v577_v56, %v577_v56  ;;  %vm406_vm14 = vcmp.ge.s32.totalorder %v392_v26, 1  ;;  %v367_v24 = vmax.f32 %v337_v10, 0.0  ;;  %vm416_vm1 = vcmp.le.s32.totalorder %v392_v26, 16 }
  0x4d   : > { %v706_v60 = vshrl.u32 %v4087_v48, 16  ;;  %v708_v53 = vshll.u32 %v4087_v48, 16  ;;  %vm4726_vm10 = vsmask.f32 7424  ;;  %vm4104_vm2 = vmand %vm406_vm14, %vm416_vm1  ;;  %3009 = vmatpush3.bf16.msra.mxu1 %v3433_v30  ;;  %vm4730_vm13 = vcmp.ge.s32.totalorder %v3551_v9, 1 }
  0x4e   : > { %v4101_v59 = vsel %vm4726_vm10, %v699_v43, %v703_v27  ;;  %v713_v20 = vshll.u32 %v4095_v21, 16  ;;  %3135 = vmatpush3.bf16.msra.mxu0 %v3432_v31  ;;  %vm4114_vm4 = vmand %vm4104_vm2, %vm4730_vm13  ;;  %v579_v27 = vsel %vm4104_vm2, %v366_v28, 0.0  ;;  %v3436_v31 = vld [vmem:[%s4630_s1 + $0x180] sm:$0xff]   ;;  %vm4733_vm14 = vcmp.le.s32.totalorder %v3565_v12, 16  ;;  %3026 = vmatprep.subr.bf16.mxu1 %v4093_v14 }
  0x4f   : > { %4727 = vst [vmem:[#allocation14_spill] sm:$0xff] %v4101_v59  ;;  %3115 = vmatmul.mubr.bf16.gmra.mrb[8].mxu0 %v4101_v59  ;;  %2990 = vmatprep.mubr.bf16.mxu1 %v4101_v59  ;;  %v710_v40 = vrot.slane %v708_v53, 1  ;;  %vm490_vm1 = vmand %vm4104_vm2, %vm4733_vm14  ;;  %v578_v55 = vsel %vm4114_vm4, %v365_v8, 0.0  ;;  %v4734_v56 = vmax.f32 %v3620_v34, 0.0  ;;  %v4735_v53 = vmax.f32 %v3623_v35, 0.0 }
  0x50   : > { %v715_v30 = vrot.slane %v713_v20, 1  ;;  %3136 = vmatprep.subr.bf16.mxu0 %v3434_v46  ;;  %v580_v19 = vsel %vm490_vm1, %v367_v24, 0.0  ;;  %v4130_v10 = vpack.c.bf16 %v579_v27, %v578_v55  ;;  %vm2575_vm13 = vmpackc.low %vm3592_vm3, %vm3609_vm6  ;;  %v1052_v34 = vrot.slane %v3729_v16, 1 }
  0x51   : > { %v711_v26 = vor.u32 %v710_v40, %v706_v60  ;;  %v2576_v20 = vpack.c.bf16 %v4735_v53, %v4734_v56  ;;  %v4136_v59 = vpack.c.bf16 %v580_v19, %v580_v19  ;;  %vm2668_vm14 = vmpackc.low %vm4104_vm2, %vm4114_vm4  ;;  %vm1048_vm3 = vcmask 1046528  }
  0x52   : > { %3137 = vmatpush3.bf16.msra.mxu0 %v3434_v46  ;;  %v1438_v60 = vshrl.u32 %v4130_v10, 16  ;;  %v1440_v24 = vshll.u32 %v4130_v10, 16  ;;  %v4736_v16 = vmax.f32 %v3643_v41, 0.0  ;;  %v4737_v27 = vmax.f32 %v3646_v42, 0.0  ;;  %vm2578_vm6 = vmpackc.low %vm3626_vm8, %vm3662_vm11  ;;  %v3470_v41 = vld [vmem:[%s4630_s1 + $0x218] sm:$0xff]  }
  0x53   : > { %v4143_v12 = vsel %vm4726_vm10, %v711_v26, %v715_v30  ;;  %3154 = vmatprep.subr.bf16.mxu0 %v3436_v31  ;;  %v1445_v22 = vshll.u32 %v4136_v59, 16  ;;  %v4163_v55 = vsel %vm1048_vm3, %v1052_v34, %v1053_v29  ;;  %vm4738_vm1 = vmmov %vm4726_vm10  ;;  %v3437_v26 = vld [vmem:[%s4630_s1 + $0x88] sm:$0xff]   ;;  %v4741_v42 = vmax.f32 %v3712_v5, 0.0  ;;  %v4756_v29 = vld [vmem:[#allocation5_spill] sm:$0xff] }
  0x54   : > { %3118 = vmatprep.mubr.bf16.mxu0 %v4143_v12  ;;  %2991 = vmatmul.mubr.bf16.gmra.mrb[12].mxu1 %v4143_v12  ;;  %v1442_v35 = vrot.slane %v1440_v24, 1  ;;  %v4160_v30 = vpack.c.bf16 %v4737_v27, %v4736_v16  ;;  %v4742_v19 = vmax.f32 %v3715_v6, 0.0  ;;  %v1049_v53 = vrot.slane %v3694_v63, 1  ;;  %v3439_v6 = vld [vmem:[%s4630_s1 + $0x90] sm:$0xff]   ;;  %v3474_v27 = vld [vmem:[%s4630_s1 + $0x238] sm:$0xff]  }
  0x55   : > { %3010 = vmatprep.mubr.msk.bf16.mxu1 %vm2575_vm13, %v2576_v20  ;;  %v1447_v46 = vrot.slane %v1445_v22, 1  ;;  %vm4179_vm13 = vmpackc.low %vm3744_vm15, %vm3752_vm0  ;;  %v1050_v20 = vrot.slane %v3696_v0, 1  ;;  %v1058_v63 = vrot.slane %v3850_v1, 1  ;;  %v1059_v0 = vrot.slane %v3858_v7, 1 }
  0x56   : > { %v1443_v40 = vor.u32 %v1442_v35, %v1438_v60  ;;  %v4187_v56 = vpack.c.bf16 %v4742_v19, %v4741_v42  ;;  %v4192_v60 = vpack.c.bf16 %v366_v28, %v365_v8  ;;  %v4216_v57 = vsel %vm1048_vm3, %v1055_v33, %v1056_v39  ;;  %vm4222_vm15 = vmpackc.low %vm3808_vm9, %vm3821_vm12  ;;  %v4767_v19 = vld [vmem:[#allocation10_spill] sm:$0xff] }
  0x57   : > { %v4198_v5 = vsel %vm1048_vm3, %v1049_v53, %v1050_v20  ;;  %v4230_v1 = vsel %vm1048_vm3, %v1058_v63, %v1059_v0  ;;  %v4745_v7 = vmax.f32 %v3778_v58, 0.0  ;;  %v4746_v28 = vmax.f32 %v3784_v62, 0.0  ;;  %vm4242_vm0 = vmpackc.low %vm3853_vm5, %vm3865_vm7  ;;  %v3441_v58 = vld [vmem:[%s4630_s1 + $0x98] sm:$0xff]   ;;  %v3444_v33 = vld [vmem:[%s4630_s1 + $0x1a0] sm:$0xff]  }
  0x58   : > { %v4170_v17 = vsel %vm4738_vm1, %v1443_v40, %v1447_v46  ;;  %v4750_v24 = vmax.f32 %v3833_v51, 0.0  ;;  %v1061_v62 = vrot.slane %v3897_v4, 1  ;;  %v1064_v51 = vrot.slane %v3966_v38, 1  ;;  %v3443_v4 = vld [vmem:[%s4630_s1 + $0xa0] sm:$0xff]   ;;  %v3442_v38 = vld [vmem:[%s4630_s1 + $0x198] sm:$0xff]  }
  0x59   : > { %3119 = vmatmul.mubr.bf16.gmra.mrb[12].mxu0 %v4170_v17  ;;  %v4236_v8 = vpack.c.bf16 %v4746_v28, %v4745_v7  ;;  %v1065_v18 = vrot.slane %v3976_v44, 1  ;;  %vm4751_vm9 = vnez %v4705_v11  ;;  %v4757_v35 = vmax.f32 %v4756_v29, 0.0  ;;  %v4758_v46 = vld [vmem:[#allocation6_spill] sm:$0xff]  ;;  %v4761_v11 = vld [vmem:[#allocation12_spill] sm:$0xff]  ;;  %v3472_v44 = vld [vmem:[%s4630_s1 + $0x228] sm:$0xff]  }
  0x5a   : > { %3138 = vmatprep.mubr.bf16.mxu0 %v4163_v55  ;;  %v4250_v34 = vpack.c.bf16 %v4750_v24, %v4749_v45  ;;  %v4274_v52 = vsel %vm1048_vm3, %v1061_v62, %v1062_v3  ;;  %v4759_v40 = vmax.f32 %v4758_v46, 0.0  ;;  %vm4760_vm7 = vnez %v4714_v54  ;;  %v3445_v54 = vld [vmem:[%s4630_s1 + $0xa8] sm:$0xff]   ;;  %v3451_v24 = vld [vmem:[%s4630_s1 + $0xc0] sm:$0xff]   ;;  %v3455_v62 = vld [vmem:[%s4630_s1 + $0xd0] sm:$0xff]  }
  0x5b   : > { %v4288_v22 = vsel %vm1048_vm3, %v1064_v51, %v1065_v18  ;;  %vm4762_vm10 = vnez %v4761_v11  ;;  %v4768_v53 = vmax.f32 %v4767_v19, 0.0  ;;  %v1067_v39 = vrot.slane %v4030_v36, 1  ;;  %v3447_v36 = vld [vmem:[%s4630_s1 + $0xb0] sm:$0xff]   ;;  %v3454_v3 = vld [vmem:[%s4630_s1 + $0x1c8] sm:$0xff]   ;;  %v3459_v51 = vld [vmem:[%s4630_s1 + $0xe0] sm:$0xff]  }
  0x5c   : > { %3011 = vmatmul.mubr.msk.bf16.vlgmr.msra.gmra.mrb[0].mxu1 %vm2578_vm6, %v4160_v30  ;;  %v4294_v16 = vpack.c.bf16 %v4759_v40, %v4757_v35  ;;  %vm4300_vm1 = vmpackc.low %vm4762_vm10, %vm4760_vm7  ;;  %v1068_v63 = vrot.slane %v4039_v2, 1  ;;  %v1070_v0 = vrot.slane %v4087_v48, 1  ;;  %v3446_v48 = vld [vmem:[%s4630_s1 + $0x1a8] sm:$0xff]   ;;  %v4770_v7 = vmax.f32 %v4017_v47, 0.0  ;;  %v264_v18 = vld [vmem:[%s3562_s25 + $0xd8] sm:$0xff] }
  0x5d   : > { %3027 = vmatpush3.bf16.msra.mxu1 %v4093_v14  ;;  %3014 = vmatprep.mubr.msk.bf16.mxu1 %vm4179_vm13, %v4187_v56  ;;  %v3438_v14 = vld [vmem:[%s4630_s1 + $0x188] sm:$0xff]   ;;  %v1630_v47 = vrot.slane %v4130_v10, 1  ;;  %v3450_v10 = vld [vmem:[%s4630_s1 + $0x1b8] sm:$0xff]   ;;  %v3475_v29 = vld [vmem:[%s4631_s2] ss:$0 sm:$0xff]  ;;  %vm2439_vm4 = vcmask 1040384  }
  0x5e   : > { %3028 = vmatprep.subr.bf16.mxu1 %v3437_v26  ;;  %v4332_v2 = vsel %vm1048_vm3, %v1067_v39, %v1068_v63  ;;  %v301_v35 = vmul.f32 %v3475_v29, %v264_v18  ;;  %v4775_v40 = vld [vmem:[#allocation3_spill] sm:$0xff]  ;;  %v3476_v19 = vld [vmem:[%s4632_s3] ss:$0 sm:$0xff] }
  0x5f   : > { %v393_v11 = vadd.s32 9, %v4775_v40 }
  0x61   : > { %3029 = vmatpush3.bf16.msra.mxu1 %v3437_v26  ;;  %3139 = vmatmul.mubr.bf16.vlgmr.msra.gmra.mrb[0].mxu0 %v4216_v57  ;;  %v4765_v26 = vld [vmem:[#allocation9_spill] sm:$0xff]  ;;  %vm407_vm10 = vcmp.ge.s32.totalorder %v393_v11, 1 }
  0x62   : > { %3030 = vmatprep.subr.bf16.mxu1 %v3439_v6  ;;  %3155 = vmatpush3.bf16.msra.mxu0 %v3436_v31  ;;  %v4752_v31 = vld [vmem:[#allocation8_spill] sm:$0xff]  ;;  %v4766_v42 = vmax.f32 %v4765_v26, 0.0  ;;  %v3460_v26 = vld [vmem:[%s4630_s1 + $0x1e0] sm:$0xff]  }
  0x63   : > { %3142 = vmatprep.mubr.bf16.mxu0 %v4230_v1  ;;  %3156 = vmatprep.subr.bf16.mxu0 %v3438_v14  ;;  %vm4753_vm12 = vnez %v4752_v31  ;;  %v3458_v31 = vld [vmem:[%s4630_s1 + $0x1d8] sm:$0xff]  }
  0x64   : > { %3015 = vmatmul.mubr.msk.bf16.gmra.mrb[4].mxu1 %vm4222_vm15, %v4236_v8  ;;  %vm4280_vm5 = vmpackc.low %vm4753_vm12, %vm4751_vm9  ;;  %v4308_v20 = vpack.c.bf16 %v4768_v53, %v4766_v42  ;;  %vm4771_vm9 = vnez %v4724_v23  ;;  %vm4772_vm12 = vnez %v4721_v13  ;;  %v1631_v23 = vrot.slane %v4136_v59, 1  ;;  %v3448_v13 = vld [vmem:[%s4630_s1 + $0x1b0] sm:$0xff]  }
  0x65   : > { %3031 = vmatpush3.bf16.msra.mxu1 %v3439_v6  ;;  %3018 = vmatprep.mubr.msk.bf16.mxu1 %vm4242_vm0, %v4250_v34  ;;  %v1071_v6 = vrot.slane %v4095_v21, 1  ;;  %vm4350_vm7 = vmpackc.low %vm4772_vm12, %vm4771_vm9  ;;  %v3463_v42 = vld [vmem:[%s4630_s1 + $0xf0] sm:$0xff]   ;;  %v338_v53 = vadd.f32 %v3476_v19, %v301_v35  ;;  %vm417_vm9 = vcmp.le.s32.totalorder %v393_v11, 16 }
  0x66   : > { %3032 = vmatprep.subr.bf16.mxu1 %v3441_v58  ;;  %3157 = vmatpush3.bf16.msra.mxu0 %v3438_v14  ;;  %v4769_v14 = vmax.f32 %v4000_v15, 0.0  ;;  %v3449_v15 = vld [vmem:[%s4630_s1 + $0xb8] sm:$0xff]   ;;  %v4372_v59 = vsel %vm1048_vm3, %v1630_v47, %v1631_v23  ;;  %vm4444_vm12 = vmand %vm407_vm10, %vm417_vm9  ;;  %vm4778_vm10 = vcmp.ge.s32.totalorder %v3551_v9, 1  ;;  %v3467_v9 = vld [vmem:[%s4630_s1 + $0x200] sm:$0xff]  }
  0x67   : > { %3158 = vmatprep.subr.bf16.mxu0 %v3440_v49  ;;  %v4338_v21 = vsel %vm1048_vm3, %v1070_v0, %v1071_v6  ;;  %v368_v63 = vmax.f32 %v338_v53, 0.0  ;;  %v3465_v6 = vld [vmem:[%s4630_s1 + $0xf8] sm:$0xff]   ;;  %vm4465_vm9 = vmand %vm4444_vm12, %vm4778_vm10  ;;  %v3469_v47 = vld [vmem:[%s4630_s1 + $0x210] sm:$0xff]  }
  0x68   : > { %v4344_v28 = vpack.c.bf16 %v4770_v7, %v4769_v14  ;;  %vm2764_vm10 = vmpackc.low %vm4444_vm12, %vm4465_vm9  ;;  %v4781_v7 = vld [vmem:[#allocation4_spill] sm:$0xff] }
  0x69   : > { %3033 = vmatpush3.bf16.msra.mxu1 %v3441_v58  ;;  %3143 = vmatmul.mubr.bf16.gmra.mrb[4].mxu0 %v4274_v52  ;;  %v3452_v58 = vld [vmem:[%s4630_s1 + $0x1c0] sm:$0xff]   ;;  %v581_v61 = vsel %vm4465_vm9, %v368_v63, 0.0 }
  0x6a   : > { %3034 = vmatprep.subr.bf16.mxu1 %v3443_v4  ;;  %3159 = vmatpush3.bf16.msra.mxu0 %v3440_v49  ;;  %v3456_v49 = vld [vmem:[%s4630_s1 + $0x1d0] sm:$0xff]  }
  0x6b   : > { %3146 = vmatprep.mubr.bf16.mxu0 %v4288_v22  ;;  %3160 = vmatprep.subr.bf16.mxu0 %v3442_v38 }
  0x6c   : > { %3019 = vmatmul.mubr.msk.bf16.gmra.mrb[8].mxu1 %vm4280_vm5, %v4294_v16 }
  0x6d   : > { %3035 = vmatpush3.bf16.msra.mxu1 %v3443_v4  ;;  %3022 = vmatprep.mubr.msk.bf16.mxu1 %vm4300_vm1, %v4308_v20  ;;  %v265_v4 = vld [vmem:[%s3562_s25 + $0xe0] sm:$0xff] }
  0x6e   : > { %3036 = vmatprep.subr.bf16.mxu1 %v3445_v54  ;;  %3161 = vmatpush3.bf16.msra.mxu0 %v3442_v38  ;;  %v3461_v38 = vld [vmem:[%s4630_s1 + $0xe8] sm:$0xff]   ;;  %v302_v46 = vmul.f32 %v3475_v29, %v265_v4 }
  0x6f   : > { %3162 = vmatprep.subr.bf16.mxu0 %v3444_v33 }
  0x71   : > { %3037 = vmatpush3.bf16.msra.mxu1 %v3445_v54  ;;  %3147 = vmatmul.mubr.bf16.gmra.mrb[8].mxu0 %v4332_v2  ;;  %v3462_v54 = vld [vmem:[%s4630_s1 + $0x1e8] sm:$0xff]  }
  0x72   : > { %3038 = vmatprep.subr.bf16.mxu1 %v3447_v36  ;;  %3163 = vmatpush3.bf16.msra.mxu0 %v3444_v33  ;;  %v339_v33 = vadd.f32 %v3476_v19, %v302_v46 }
  0x73   : > { %3150 = vmatprep.mubr.bf16.mxu0 %v4338_v21  ;;  %3164 = vmatprep.subr.bf16.mxu0 %v3446_v48 }
  0x74   : > { %3023 = vmatmul.mubr.msk.bf16.gmra.mrb[12].mxu1 %vm4350_vm7, %v4344_v28  ;;  %v369_v0 = vmax.f32 %v339_v33, 0.0 }
  0x75   : > { %3039 = vmatpush3.bf16.msra.mxu1 %v3447_v36  ;;  %3042 = vmatprep.mubr.bf16.mxu1 %v4198_v5  ;;  %v3453_v5 = vld [vmem:[%s4630_s1 + $0xc8] sm:$0xff]  }
  0x76   : > { %3040 = vmatprep.subr.bf16.mxu1 %v3449_v15  ;;  %3165 = vmatpush3.bf16.msra.mxu0 %v3446_v48  ;;  %v3464_v48 = vld [vmem:[%s4630_s1 + $0x1f0] sm:$0xff]   ;;  %v2765_v14 = vpack.c.bf16 %v369_v0, %v368_v63 }
  0x77   : > { %3166 = vmatprep.subr.bf16.mxu0 %v3448_v13 }
  0x79   : > { %3041 = vmatpush3.bf16.msra.mxu1 %v3449_v15  ;;  %3151 = vmatmul.mubr.bf16.gmra.mrb[12].mxu0 %v4372_v59  ;;  %v303_v15 = vmul.f32 %v3475_v29, %v266_v50 }
  0x7a   : > { %3058 = vmatprep.subr.bf16.mxu1 %v3451_v24  ;;  %3167 = vmatpush3.bf16.msra.mxu0 %v3448_v13  ;;  %v4782_v13 = vld [vmem:[#allocation7_spill] sm:$0xff] }
  0x7b   : > { %3170 = vmatprep.mubr.msk.bf16.mxu0 %vm4179_vm13, %v4187_v56  ;;  %3168 = vmatprep.subr.bf16.mxu0 %v3450_v10  ;;  %v340_v23 = vadd.f32 %v3476_v19, %v303_v15 }
  0x7c   : > { %3043 = vmatmul.mubr.bf16.vlgmr.msra.gmra.mrb[0].mxu1 %v4163_v55  ;;  %v3457_v55 = vld [vmem:[%s4630_s1 + $0xd8] sm:$0xff]  }
  0x7d   : > { %3059 = vmatpush3.bf16.msra.mxu1 %v3451_v24  ;;  %3046 = vmatprep.mubr.bf16.mxu1 %v4216_v57  ;;  %v370_v24 = vmax.f32 %v340_v23, 0.0 }
  0x7e   : > { %3060 = vmatprep.subr.bf16.mxu1 %v3453_v5  ;;  %3169 = vmatpush3.bf16.msra.mxu0 %v3450_v10  ;;  %v4784_v10 = vld [vmem:[#allocation2_spill] sm:$0xff] }
  0x7f   : > { %3186 = vmatprep.subr.bf16.mxu0 %v3452_v58  ;;  %vm4785_vm8 = vcmp.le.s32.totalorder %v4784_v10, 16 }
  0x80   : > { %vm493_vm11 = vmand %vm4444_vm12, %vm4785_vm8 }
  0x81   : > { %3061 = vmatpush3.bf16.msra.mxu1 %v3453_v5  ;;  %3171 = vmatmul.mubr.msk.bf16.vlgmr.msra.gmra.mrb[0].mxu0 %vm4222_vm15, %v4236_v8  ;;  %v3471_v5 = vld [vmem:[%s4630_s1 + $0x220] sm:$0xff]   ;;  %v583_v32 = vsel %vm493_vm11, %v370_v24, 0.0 }
  0x82   : > { %3062 = vmatprep.subr.bf16.mxu1 %v3455_v62  ;;  %3187 = vmatpush3.bf16.msra.mxu0 %v3452_v58 }
  0x83   : > { %3174 = vmatprep.mubr.msk.bf16.mxu0 %vm4242_vm0, %v4250_v34  ;;  %3188 = vmatprep.subr.bf16.mxu0 %v3454_v3 }
  0x84   : > { %3047 = vmatmul.mubr.bf16.gmra.mrb[4].mxu1 %v4230_v1 }
  0x85   : > { %3063 = vmatpush3.bf16.msra.mxu1 %v3455_v62  ;;  %3050 = vmatprep.mubr.bf16.mxu1 %v4274_v52  ;;  %v603_v62 = vpack.c.bf16 %v583_v32, %v583_v32 }
  0x86   : > { %3064 = vmatprep.subr.bf16.mxu1 %v3457_v55  ;;  %3189 = vmatpush3.bf16.msra.mxu0 %v3454_v3 }
  0x87   : > { %3190 = vmatprep.subr.bf16.mxu0 %v3456_v49  ;;  %v1998_v18 = vshll.u32 %v603_v62, 16  ;;  %v2184_v43 = vrot.slane %v603_v62, 1 }
  0x89   : > { %3065 = vmatpush3.bf16.msra.mxu1 %v3457_v55  ;;  %3175 = vmatmul.mubr.msk.bf16.gmra.mrb[4].mxu0 %vm4280_vm5, %v4294_v16  ;;  %v3473_v55 = vld [vmem:[%s4630_s1 + $0x230] sm:$0xff]  }
  0x8a   : > { %3066 = vmatprep.subr.bf16.mxu1 %v3459_v51  ;;  %3191 = vmatpush3.bf16.msra.mxu0 %v3456_v49 }
  0x8b   : > { %3178 = vmatprep.mubr.msk.bf16.mxu0 %vm4300_vm1, %v4308_v20  ;;  %3192 = vmatprep.subr.bf16.mxu0 %v3458_v31 }
  0x8c   : > { %3051 = vmatmul.mubr.bf16.gmra.mrb[8].mxu1 %v4288_v22 }
  0x8d   : > { %3067 = vmatpush3.bf16.msra.mxu1 %v3459_v51  ;;  %3054 = vmatprep.mubr.bf16.mxu1 %v4332_v2 }
  0x8e   : > { %3068 = vmatprep.subr.bf16.mxu1 %v3461_v38  ;;  %3193 = vmatpush3.bf16.msra.mxu0 %v3458_v31 }
  0x8f   : > { %3194 = vmatprep.subr.bf16.mxu0 %v3460_v26 }
  0x91   : > { %3069 = vmatpush3.bf16.msra.mxu1 %v3461_v38  ;;  %3179 = vmatmul.mubr.msk.bf16.gmra.mrb[8].mxu0 %vm4350_vm7, %v4344_v28 }
  0x92   : > { %3070 = vmatprep.subr.bf16.mxu1 %v3463_v42  ;;  %3195 = vmatpush3.bf16.msra.mxu0 %v3460_v26 }
  0x93   : > { %3182 = vmatprep.mubr.msk.bf16.mxu0 %vm2668_vm14, %v4192_v60  ;;  %3196 = vmatprep.subr.bf16.mxu0 %v3462_v54 }
  0x94   : > { %3055 = vmatmul.mubr.bf16.gmra.mrb[12].mxu1 %v4338_v21 }
  0x95   : > { %3071 = vmatpush3.bf16.msra.mxu1 %v3463_v42  ;;  %3074 = vmatprep.mubr.msk.bf16.mxu1 %vm2578_vm6, %v4160_v30  ;;  %v3468_v30 = vld [vmem:[%s4630_s1 + $0x208] sm:$0xff]   ;;  %vm4788_vm6 = vsmask.f32 7424 }
  0x96   : > { %3072 = vmatprep.subr.bf16.mxu1 %v3465_v6  ;;  %3197 = vmatpush3.bf16.msra.mxu0 %v3462_v54 }
  0x97   : > { %3198 = vmatprep.subr.bf16.mxu0 %v3464_v48 }
  0x99   : > { %3073 = vmatpush3.bf16.msra.mxu1 %v3465_v6  ;;  %3183 = vmatmul.mubr.msk.bf16.gmra.mrb[12].mxu0 %vm2764_vm10, %v2765_v14 }
  0x9a   : > { %3250 = vmatprep.subr.bf16.mxu1 %v3467_v9  ;;  %3199 = vmatpush3.bf16.msra.mxu0 %v3464_v48 }
  0x9b   : > { %3202 = vmatprep.mubr.bf16.mxu0 %v4781_v7  ;;  %3200 = vmatprep.subr.bf16.mxu0 %v3466_v37 }
  0x9c   : > { %3075 = vmatmul.mubr.msk.bf16.vlgmr.msra.gmra.mrb[0].mxu1 %vm4179_vm13, %v4187_v56  ;;  %v4783_v56 = vld [vmem:[#allocation11_spill] sm:$0xff] }
  0x9d   : > { %3258 = vmatpush3.bf16.msra.mxu1 %v3467_v9  ;;  %3078 = vmatprep.mubr.msk.bf16.mxu1 %vm4222_vm15, %v4236_v8  ;;  %v582_v8 = vsel %vm4444_vm12, %v369_v0, 0.0 }
  0x9e   : > { %3251 = vmatprep.subr.bf16.mxu1 %v3468_v30  ;;  %3201 = vmatpush3.bf16.msra.mxu0 %v3466_v37  ;;  %v602_v58 = vpack.c.bf16 %v582_v8, %v581_v61 }
  0x9f   : > { %3218 = vmatprep.subr.bf16.mxu0 %v3467_v9 }
  0xa0   : > { %v1993_v3 = vshll.u32 %v602_v58, 16  ;;  %v1991_v49 = vshrl.u32 %v602_v58, 16  ;;  %v2183_v25 = vrot.slane %v602_v58, 1 }
  0xa1   : > { %3259 = vmatpush3.bf16.msra.mxu1 %v3468_v30  ;;  %3203 = vmatmul.mubr.bf16.vlgmr.msra.gmra.mrb[0].mxu0 %v4782_v13 }
  0xa2   : > { %3252 = vmatprep.subr.bf16.mxu1 %v3469_v47  ;;  %3219 = vmatpush3.bf16.msra.mxu0 %v3467_v9  ;;  %v1995_v51 = vrot.slane %v1993_v3, 1 }
  0xa3   : > { %3206 = vmatprep.mubr.bf16.mxu0 %v4783_v56  ;;  %3220 = vmatprep.subr.bf16.mxu0 %v3468_v30 }
  0xa4   : > { %3079 = vmatmul.mubr.msk.bf16.gmra.mrb[4].mxu1 %vm4242_vm0, %v4250_v34  ;;  %v4786_v34 = vld [vmem:[#allocation13_spill] sm:$0xff] }
  0xa5   : > { %3260 = vmatpush3.bf16.msra.mxu1 %v3469_v47  ;;  %3082 = vmatprep.mubr.msk.bf16.mxu1 %vm4280_vm5, %v4294_v16  ;;  %v4787_v16 = vld [vmem:[#allocation14_spill] sm:$0xff] }
  0xa6   : > { %3253 = vmatprep.subr.bf16.mxu1 %v3470_v41  ;;  %3221 = vmatpush3.bf16.msra.mxu0 %v3468_v30 }
  0xa7   : > { %3222 = vmatprep.subr.bf16.mxu0 %v3469_v47 }
  0xa9   : > { %3261 = vmatpush3.bf16.msra.mxu1 %v3470_v41  ;;  %3207 = vmatmul.mubr.bf16.gmra.mrb[4].mxu0 %v4786_v34 }
  0xaa   : > { %3254 = vmatprep.subr.bf16.mxu1 %v3471_v5  ;;  %3223 = vmatpush3.bf16.msra.mxu0 %v3469_v47 }
  0xab   : > { %3210 = vmatprep.mubr.bf16.mxu0 %v4787_v16  ;;  %3224 = vmatprep.subr.bf16.mxu0 %v3470_v41 }
  0xac   : > { %3083 = vmatmul.mubr.msk.bf16.gmra.mrb[8].mxu1 %vm4300_vm1, %v4308_v20  ;;  %v1996_v20 = vor.u32 %v1995_v51, %v1991_v49 }
  0xad   : > { %3262 = vmatpush3.bf16.msra.mxu1 %v3471_v5  ;;  %3086 = vmatprep.mubr.msk.bf16.mxu1 %vm4350_vm7, %v4344_v28  ;;  %v2000_v28 = vrot.slane %v1998_v18, 1 }
  0xae   : > { %3255 = vmatprep.subr.bf16.mxu1 %v3472_v44  ;;  %3225 = vmatpush3.bf16.msra.mxu0 %v3470_v41 }
  0xaf   : > { %3226 = vmatprep.subr.bf16.mxu0 %v3471_v5 }
  0xb1   : > { %3263 = vmatpush3.bf16.msra.mxu1 %v3472_v44  ;;  %3211 = vmatmul.mubr.bf16.gmra.mrb[8].mxu0 %v4143_v12  ;;  %v2001_v12 = vsel %vm4788_vm6, %v1996_v20, %v2000_v28 }
  0xb2   : > { %3256 = vmatprep.subr.bf16.mxu1 %v3473_v55  ;;  %3227 = vmatpush3.bf16.msra.mxu0 %v3471_v5 }
  0xb3   : > { %3214 = vmatprep.mubr.bf16.mxu0 %v4170_v17  ;;  %3228 = vmatprep.subr.bf16.mxu0 %v3472_v44  ;;  %v2185_v17 = vsel %vm1048_vm3, %v2183_v25, %v2184_v43 }
  0xb4   : > { %3087 = vmatmul.mubr.msk.bf16.gmra.mrb[12].mxu1 %vm2668_vm14, %v4192_v60 }
  0xb5   : > { %3264 = vmatpush3.bf16.msra.mxu1 %v3473_v55  ;;  %3242 = vmatprep.mubr.bf16.mxu1 %v4332_v2 }
  0xb6   : > { %3257 = vmatprep.subr.bf16.mxu1 %v3474_v27  ;;  %3229 = vmatpush3.bf16.msra.mxu0 %v3472_v44 }
  0xb7   : > { %3230 = vmatprep.subr.bf16.mxu0 %v3473_v55 }
  0xb9   : > { %3265 = vmatpush3.bf16.msra.mxu1 %v3474_v27  ;;  %3215 = vmatmul.mubr.bf16.gmra.mrb[12].mxu0 %v2001_v12 }
  0xba   : > { %3231 = vmatpush3.bf16.msra.mxu0 %v3473_v55  ;;  %3234 = vmatprep.mubr.bf16.mxu0 %v4216_v57 }
  0xbb   : > { %3232 = vmatprep.subr.bf16.mxu0 %v3474_v27 }
  0xbc   : > { %3243 = vmatmul.mubr.bf16.vlgmr.msra.gmra.mrb[16].mxu1 %v4338_v21 }
  0xbd   : > { %3246 = vmatprep.mubr.bf16.mxu1 %v4372_v59 }
  0xbe   : > { %3233 = vmatpush3.bf16.msra.mxu0 %v3474_v27 }
  0xc1   : > { %3235 = vmatmul.mubr.bf16.vlgmr.msra.gmra.mrb[0].mxu0 %v4230_v1 }
  0xc2   : > { %3238 = vmatprep.mubr.bf16.mxu0 %v4274_v52 }
  0xc4   : > { %3247 = vmatmul.mubr.bf16.gmra.mrb[20].mxu1 %v2185_v17 }
  0xc9   : > { %3239 = vmatmul.mubr.bf16.gmra.mrb[4].mxu0 %v4288_v22 }
 0x16f   : > { %v3076_v60 = vpop.f32.mrb[0].mxu1 }
 0x170   : > { %v1358_v2 = vpop.f32.mrb[1].mxu1 }
 0x171   : > { %v3077_v57 = vpop.f32.mrb[2].mxu1 }
 0x172   : > { %v1361_v45 = vpop.f32.mrb[3].mxu1 }
 0x177   : > { %v4558_v4 = vpop.f32.mrb[4].mxu1 }
 0x178   : > { %v4560_v21 = vpop.f32.mrb[5].mxu1 }
 0x179   : > { %v4562_v59 = vpop.f32.mrb[6].mxu1 }
 0x17a   : > { %v4564_v31 = vpop.f32.mrb[7].mxu1 }
 0x17f   : > { %v3084_v38 = vpop.f32.mrb[8].mxu1 }
 0x180   : > { %v1390_v1 = vpop.f32.mrb[9].mxu1 }
 0x181   : > { %v3085_v29 = vpop.f32.mrb[10].mxu1 }
 0x182   : > { %v1393_v52 = vpop.f32.mrb[11].mxu1 }
 0x184   : > { %v3212_v35 = vpop.f32.mrb[8].mxu0 }
 0x185   : > { %v3274_v46 = vadd.f32 %v3212_v35, %v3084_v38  ;;  %v2134_v22 = vpop.f32.mrb[9].mxu0 }
 0x186   : > { %v3276_v40 = vadd.f32 %v2134_v22, %v1390_v1  ;;  %v3213_v11 = vpop.f32.mrb[10].mxu0 }
 0x187   : > { %v3088_v26 = vpop.f32.mrb[12].mxu1  ;;  %v3278_v42 = vadd.f32 %v3213_v11, %v3085_v29  ;;  %v2137_v19 = vpop.f32.mrb[11].mxu0 }
 0x188   : > { %v1406_v53 = vpop.f32.mrb[13].mxu1  ;;  %v3280_v33 = vadd.f32 %v2137_v19, %v1393_v52 }
 0x189   : > { %v3089_v54 = vpop.f32.mrb[14].mxu1 }
 0x18a   : > { %v1409_v39 = vpop.f32.mrb[15].mxu1 }
 0x18c   : > { %v3216_v63 = vpop.f32.mrb[12].mxu0 }
 0x18d   : > { %v3282_v0 = vadd.f32 %v3216_v63, %v3088_v26  ;;  %v2150_v6 = vpop.f32.mrb[13].mxu0 }
 0x18e   : > { %v3284_v36 = vadd.f32 %v2150_v6, %v1406_v53  ;;  %v3217_v48 = vpop.f32.mrb[14].mxu0 }
 0x18f   : > { %v3244_v14 = vpop.f32.mrb[16].mxu1  ;;  %v3286_v9 = vadd.f32 %v3217_v48, %v3089_v54  ;;  %v2153_v37 = vpop.f32.mrb[15].mxu0 }
 0x190   : > { %v4572_v50 = vadd.f32 %v3274_v46, %v3244_v14  ;;  %v2318_v30 = vpop.f32.mrb[17].mxu1  ;;  %v3288_v7 = vadd.f32 %v2153_v37, %v1409_v39 }
 0x191   : > { %v4574_v15 = vadd.f32 %v3276_v40, %v2318_v30  ;;  %v3245_v47 = vpop.f32.mrb[18].mxu1 }
 0x192   : > { %2375 = vst [vmem:[%s4570_s30 + $0x50] sm:$0xff] %v4572_v50  ;;  %v4578_v23 = vadd.f32 %v3278_v42, %v3245_v47  ;;  %v2321_v13 = vpop.f32.mrb[19].mxu1 }
 0x193   : > { %2373 = vst [vmem:[%s4570_s30 + $0x40] sm:$0xff] %v4574_v15  ;;  %v4582_v41 = vadd.f32 %v3280_v33, %v2321_v13 }
 0x194   : > { %2376 = vst [vmem:[%s4570_s30 + $0x58] sm:$0xff] %v4578_v23  ;;  %v3236_v56 = vpop.f32.mrb[0].mxu0 }
 0x195   : > { %2374 = vst [vmem:[%s4570_s30 + $0x48] sm:$0xff] %v4582_v41  ;;  %v3266_v61 = vadd.f32 %v3236_v56, %v3076_v60  ;;  %v2286_v8 = vpop.f32.mrb[1].mxu0 }
 0x196   : > { %v3267_v24 = vadd.f32 %v2286_v8, %v1358_v2  ;;  %v3237_v10 = vpop.f32.mrb[2].mxu0 }
 0x197   : > { %v3248_v5 = vpop.f32.mrb[20].mxu1  ;;  %2367 = vst [vmem:[%s4570_s30 + $0x10] sm:$0xff] %v3266_v61  ;;  %v3268_v58 = vadd.f32 %v3237_v10, %v3077_v57  ;;  %v2289_v32 = vpop.f32.mrb[3].mxu0  ;;  %v2404_v28 = vmul.f32 %v3266_v61, %v3266_v61 }
 0x198   : > { %v4589_v34 = vadd.f32 %v3282_v0, %v3248_v5  ;;  %v2334_v44 = vpop.f32.mrb[21].mxu1  ;;  %2365 = vst [vmem:[%s4570_s30] sm:$0xff] %v3267_v24  ;;  %v3269_v16 = vadd.f32 %v2289_v32, %v1361_v45  ;;  %v2402_v51 = vmul.f32 %v3267_v24, %v3267_v24 }
 0x199   : > { %v3285_v62 = vadd.f32 %v3284_v36, %v2334_v44  ;;  %v3249_v3 = vpop.f32.mrb[22].mxu1  ;;  %2368 = vst [vmem:[%s4570_s30 + $0x18] sm:$0xff] %v3268_v58  ;;  %v2405_v2 = vmul.f32 %v3268_v58, %v3268_v58  ;;  %v2412_v36 = vmul.f32 %v4572_v50, %v4572_v50 }
 0x19a   : > { %2379 = vst [vmem:[%s4570_s30 + $0x70] sm:$0xff] %v4589_v34  ;;  %v3287_v55 = vadd.f32 %v3286_v9, %v3249_v3  ;;  %v2337_v49 = vpop.f32.mrb[23].mxu1  ;;  %2366 = vst [vmem:[%s4570_s30 + $0x8] sm:$0xff] %v3269_v16  ;;  %v2381_v18 = vadd.f32 %v3269_v16, %v3267_v24  ;;  %v2403_v27 = vmul.f32 %v3269_v16, %v3269_v16 }
 0x19b   : > { %2377 = vst [vmem:[%s4570_s30 + $0x60] sm:$0xff] %v3285_v62  ;;  %v3289_v20 = vadd.f32 %v3288_v7, %v2337_v49  ;;  %v2413_v9 = vmul.f32 %v4578_v23, %v4578_v23  ;;  %v2414_v7 = vmul.f32 %v3285_v62, %v3285_v62 }
 0x19c   : > { %2380 = vst [vmem:[%s4570_s30 + $0x78] sm:$0xff] %v3287_v55  ;;  %v2382_v12 = vadd.f32 %v3266_v61, %v2381_v18  ;;  %v2418_v25 = vadd.f32 %v2403_v27, %v2402_v51  ;;  %v3240_v43 = vpop.f32.mrb[4].mxu0  ;;  %v2417_v24 = vmul.f32 %v3287_v55, %v3287_v55 }
 0x19d   : > { %2378 = vst [vmem:[%s4570_s30 + $0x68] sm:$0xff] %v3289_v20  ;;  %v3270_v17 = vadd.f32 %v3240_v43, %v4558_v4  ;;  %v2302_v60 = vpop.f32.mrb[5].mxu0  ;;  %v2415_v56 = vmul.f32 %v3289_v20, %v3289_v20 }
 0x19e   : > { %v2419_v57 = vadd.f32 %v2418_v25, %v2404_v28  ;;  %v3271_v45 = vadd.f32 %v2302_v60, %v4560_v21  ;;  %v2383_v38 = vadd.f32 %v3268_v58, %v2382_v12  ;;  %v3241_v1 = vpop.f32.mrb[6].mxu0 }
 0x19f   : > { %2371 = vst [vmem:[%s4570_s30 + $0x30] sm:$0xff] %v3270_v17  ;;  %v3272_v29 = vadd.f32 %v3241_v1, %v4562_v59  ;;  %v2305_v52 = vpop.f32.mrb[7].mxu0  ;;  %v2408_v42 = vmul.f32 %v3270_v17, %v3270_v17  ;;  %v2410_v59 = vmul.f32 %v4574_v15, %v4574_v15 }
 0x1a0   : > { %2369 = vst [vmem:[%s4570_s30 + $0x20] sm:$0xff] %v3271_v45  ;;  %v2384_v35 = vadd.f32 %v3271_v45, %v2383_v38  ;;  %v2406_v46 = vmul.f32 %v3271_v45, %v3271_v45  ;;  %v2420_v22 = vadd.f32 %v2419_v57, %v2405_v2  ;;  %v3273_v40 = vadd.f32 %v2305_v52, %v4564_v31 }
 0x1a1   : > { %2372 = vst [vmem:[%s4570_s30 + $0x38] sm:$0xff] %v3272_v29  ;;  %v2409_v53 = vmul.f32 %v3272_v29, %v3272_v29  ;;  %v2411_v31 = vmul.f32 %v4582_v41, %v4582_v41 }
 0x1a2   : > { %v2421_v4 = vadd.f32 %v2420_v22, %v2406_v46  ;;  %2370 = vst [vmem:[%s4570_s30 + $0x28] sm:$0xff] %v3273_v40  ;;  %v2385_v11 = vadd.f32 %v3273_v40, %v2384_v35  ;;  %v2407_v26 = vmul.f32 %v3273_v40, %v3273_v40 }
 0x1a4   : > { %v2386_v19 = vadd.f32 %v3270_v17, %v2385_v11  ;;  %v2422_v21 = vadd.f32 %v2421_v4, %v2407_v26 }
 0x1a6   : > { %v2387_v33 = vadd.f32 %v3272_v29, %v2386_v19  ;;  %v2423_v54 = vadd.f32 %v2422_v21, %v2408_v42 }
 0x1a8   : > { %v2388_v39 = vadd.f32 %v4574_v15, %v2387_v33  ;;  %v2424_v63 = vadd.f32 %v2423_v54, %v2409_v53 }
 0x1aa   : > { %v2425_v0 = vadd.f32 %v2424_v63, %v2410_v59  ;;  %v2389_v6 = vadd.f32 %v4582_v41, %v2388_v39  ;;  %v2416_v41 = vmul.f32 %v4589_v34, %v4589_v34 }
 0x1ac   : > { %v2390_v48 = vadd.f32 %v4572_v50, %v2389_v6  ;;  %v2426_v14 = vadd.f32 %v2425_v0, %v2411_v31 }
 0x1ae   : > { %v2391_v37 = vadd.f32 %v4578_v23, %v2390_v48  ;;  %v2427_v30 = vadd.f32 %v2426_v14, %v2412_v36 }
 0x1b0   : > { %v2392_v15 = vadd.f32 %v3285_v62, %v2391_v37  ;;  %v2428_v47 = vadd.f32 %v2427_v30, %v2413_v9 }
 0x1b2   : > { %v2393_v13 = vadd.f32 %v3289_v20, %v2392_v15  ;;  %v2429_v61 = vadd.f32 %v2428_v47, %v2414_v7 }
 0x1b4   : > { %v2394_v8 = vadd.f32 %v4589_v34, %v2393_v13  ;;  %v2430_v50 = vadd.f32 %v2429_v61, %v2415_v56 }
 0x1b6   : > { %v2395_v10 = vadd.f32 %v3287_v55, %v2394_v8  ;;  %v2431_v5 = vadd.f32 %v2430_v50, %v2416_v41 }
 0x1b8   : > { %v2396_v58 = vrot.slane %v2395_v10, 4  ;;  %v2432_v32 = vadd.f32 %v2431_v5, %v2417_v24 }
 0x1ba   : > { %v2397_v23 = vadd.f32 %v2396_v58, %v2395_v10  ;;  %v2433_v44 = vrot.slane %v2432_v32, 4 }
 0x1bc   : > { %v2398_v16 = vrot.slane %v2397_v23, 2  ;;  %v2434_v62 = vadd.f32 %v2433_v44, %v2432_v32 }
 0x1be   : > { %v2399_v3 = vadd.f32 %v2398_v16, %v2397_v23  ;;  %v2435_v49 = vrot.slane %v2434_v62, 2 }
 0x1c0   : > { %v2400_v51 = vrot.slane %v2399_v3, 1  ;;  %v2436_v18 = vadd.f32 %v2435_v49, %v2434_v62 }
 0x1c2   : > { %v2437_v27 = vrot.slane %v2436_v18, 1  ;;  %v2401_v34 = vadd.f32 %v2400_v51, %v2399_v3 }
 0x1c4   : > { %v2438_v55 = vadd.f32 %v2437_v27, %v2436_v18 }
 0x1c6   : > { %v2440_v20 = vsel %vm2439_vm4, %v2401_v34, %v2438_v55 }
 0x1c7   : > { %2441 = vst [vmem:[%s235_s9] sm:$0x3] %v2440_v20 }
 0x1c8 PF: > { %s16_s18 = sadd.s32 1, %s3483_s18  }
 0x1c9   : > { %p13_p6 = scmp.ge.s32.totalorder %s16_s18, 6  }
 0x1cb   :  { %15 = sbr.rel (!%p13_p6) target bundleno = 1 (0x1), region = 86 }

</bundles_post_ra>
